<compile_context>
chip_gen: v7x
topology: tpu7x:2x2x1
jax: 0.10.0
libtpu: 0.0.40
codegen_flags: <defaults>
</compile_context>

<pallas_src>
import numpy as np

import jax
import jax.numpy as jnp
from jax.experimental import pallas as pl
from jax.experimental.pallas import tpu as pltpu

_BN_EPS = 1e-5
# 8 already fills the 128-row MXU on v5e; 16 fills the 256-row MXU on v6e/v7x.
_MAX_B_TILE = 16


# --------------------------- synthetic torch-layout params ---------------------------

def init_torch_params(key, input_shape, output_size):
    """Deterministic synthetic parameters in PyTorch layouts (OIHW convs, (out,in) fcs)."""
    cin, h, w = input_shape
    flat = 64 * (h // 4) * (w // 4)
    ks = jax.random.split(key, 20)
    rn = lambda k, shape, s=0.1: s * jax.random.normal(k, shape, jnp.float32)

    def bn(i0, i1, i2, i3, n):
        return (1.0 + rn(ks[i0], (n,)), rn(ks[i1], (n,)),
                rn(ks[i2], (n,)), 0.5 + jnp.abs(rn(ks[i3], (n,))))

    return {
        "conv1_w": rn(ks[0], (32, cin, 5, 5)), "conv1_b": rn(ks[1], (32,)),
        "bn1": bn(2, 3, 4, 5, 32),
        "conv2_w": rn(ks[6], (64, 32, 5, 5)), "conv2_b": rn(ks[7], (64,)),
        "bn2": bn(8, 9, 10, 11, 64),
        "fc3_w": rn(ks[12], (128, flat), s=0.02), "fc3_b": rn(ks[13], (128,)),
        "bn3": bn(14, 15, 16, 17, 128),
        "fc4_w": rn(ks[18], (output_size, 128)), "fc4_b": rn(ks[19], (output_size,)),
    }


# ------------------------------ pure-JAX reference (spec) ----------------------------

def reference_forward(x_nchw, tp):
    x = x_nchw.astype(jnp.float32)

    def conv_block(x, wgt, b, bn):
        g, be, m, v = bn
        y = jax.lax.conv_general_dilated(
            x, wgt, window_strides=(1, 1), padding=((2, 2), (2, 2)),
            dimension_numbers=("NCHW", "OIHW", "NCHW"))
        y = y + b[None, :, None, None]
        sc = g / jnp.sqrt(v + _BN_EPS)
        y = (y - m[None, :, None, None]) * sc[None, :, None, None] + be[None, :, None, None]
        return jnp.maximum(y, 0.0)

    def pool(x):
        return jax.lax.reduce_window(x, -jnp.inf, jax.lax.max,
                                     (1, 1, 2, 2), (1, 1, 2, 2), "VALID")

    x = pool(conv_block(x, tp["conv1_w"], tp["conv1_b"], tp["bn1"]))
    x = pool(conv_block(x, tp["conv2_w"], tp["conv2_b"], tp["bn2"]))
    x = x.reshape(x.shape[0], -1)
    y = x @ tp["fc3_w"].T + tp["fc3_b"]
    g, be, m, v = tp["bn3"]
    y = jnp.maximum((y - m) * (g / jnp.sqrt(v + _BN_EPS)) + be, 0.0)
    return y @ tp["fc4_w"].T + tp["fc4_b"]


# --------------------------- host-side weight packing (runs once) --------------------

def pack_params(tp, input_shape, output_size):
    """Fold kw (and for conv1 also kh) taps, output-column index, BN, biases and the
    NCHW flatten order into kernel-ready weights."""
    cin, h, w = input_shape
    assert h % 4 == 0 and w % 4 == 0, "H and W must be divisible by 4"
    K, P = 5, 2
    C1, C2, F3 = 32, 64, 128
    Ho1, Wo1 = h // 2, w // 2
    Ho2, Wo2 = Ho1 // 2, Wo1 // 2
    out_pad = 128 * ((output_size + 127) // 128)
    f32 = lambda a: np.asarray(a, dtype=np.float32)

    w1, b1 = f32(tp["conv1_w"]), f32(tp["conv1_b"])
    w2, b2 = f32(tp["conv2_w"]), f32(tp["conv2_b"])
    w3, b3 = f32(tp["fc3_w"]), f32(tp["fc3_b"])
    w4, b4 = f32(tp["fc4_w"]), f32(tp["fc4_b"])
    bn1 = [f32(a) for a in tp["bn1"]]
    bn2 = [f32(a) for a in tp["bn2"]]
    bn3 = [f32(a) for a in tp["bn3"]]

    def unfold_w(wt, w_cols, cin_, cout_):
        # wt: (cout, cin, K, K) torch OIHW  ->  (K, w_cols*cin_, 2*(w_cols//2)*cout_)
        # input lane  = w_in*cin_ + ci ; output lane = s*(wo*cout_) + u*cout_ + co,
        # where output column ow = 2u + s (parity-major so pooling is a lane-half max).
        wo = w_cols // 2
        out = np.zeros((K, w_cols * cin_, 2 * wo * cout_), np.float32)
        for kh in range(K):
            for ow in range(w_cols):
                s, u = ow % 2, ow // 2
                c0 = s * (wo * cout_) + u * cout_
                for kw in range(K):
                    wi = ow + kw - P
                    if 0 <= wi < w_cols:  # columns outside = implicit zero padding
                        out[kh, wi * cin_:(wi + 1) * cin_, c0:c0 + cout_] = wt[:, :, kh, kw].T
        return out

    # conv1: fold the kh taps into the contraction dim -> single (320, 512) matmul.
    w1g = unfold_w(w1, w, cin, C1).reshape(K * w * cin, 2 * Wo1 * C1)
    # conv2: keep the 5 K=256 taps (already MXU-shaped).
    w2g = unfold_w(w2, Wo1, C1, C2)                       # (5, Wo1*C1, 2*Wo2*C2)

    def fold_bn(bias, bn):
        g, be, m, v = bn
        sc = g / np.sqrt(v + _BN_EPS)
        return sc, (bias - m) * sc + be

    sc1, sh1 = fold_bn(b1, bn1)
    sc2, sh2 = fold_bn(b2, bn2)
    sc3, sh3 = fold_bn(b3, bn3)

    # fc3 weight permuted so it directly consumes the kernel's (h, w, c) feature order
    # and flattened to (Ho2*Wo2*C2, 128) for a single dot.
    w3r = (w3.T.reshape(C2, Ho2, Wo2, F3)        # [c, h, w, o]  (torch flat = c*HW + h*W + w)
           .transpose(1, 2, 0, 3)                # [h, w, c, o]
           .reshape(Ho2 * Wo2 * C2, F3))         # [h*256 + w*C2 + c, o]

    # fc4: lane-pad the output to a multiple of 128 so the kernel's output store is
    # full-width; the extra columns are zero and sliced off outside the kernel.
    w4p = np.zeros((F3, out_pad), np.float32)
    w4p[:, :output_size] = w4.T
    b4p = np.zeros((1, out_pad), np.float32)
    b4p[0, :output_size] = b4

    bf = lambda a: jnp.asarray(a, dtype=jnp.bfloat16)
    fj = lambda a: jnp.asarray(a, dtype=jnp.float32)
    return {
        "w1": bf(w1g), "s1": fj(np.tile(sc1, 2 * Wo1)[None]), "t1": fj(np.tile(sh1, 2 * Wo1)[None]),
        "w2": bf(w2g), "s2": fj(np.tile(sc2, 2 * Wo2)[None]), "t2": fj(np.tile(sh2, 2 * Wo2)[None]),
        "w3": bf(w3r), "s3": fj(sc3[None]), "t3": fj(sh3[None]),
        "w4": bf(w4p), "b4": fj(b4p),
    }


# ----------------------------------- Pallas kernel -----------------------------------

def build_pallas_forward(input_shape, output_size, max_b_tile=_MAX_B_TILE):
    cin, h, w = input_shape
    assert h % 4 == 0 and w % 4 == 0, "H and W must be divisible by 4"
    K, P = 5, 2
    C1, C2, F3 = 32, 64, 128
    Ho1, Wo1 = h // 2, w // 2
    Ho2, Wo2 = Ho1 // 2, Wo1 // 2
    Hp2 = Ho1 + 2 * P
    L_IN1 = w * cin                      # 64   conv1 input lanes per row
    L_K1 = K * L_IN1                     # 320  folded-kh conv1 contraction
    L_OUT1 = 2 * Wo1 * C1                # 512  conv1 output lanes (w-parity major)
    L_IN2 = Wo1 * C1                     # 256  conv2 input lanes per row
    L_OUT2 = 2 * Wo2 * C2                # 512
    L_P2 = Wo2 * C2                      # 256  pooled conv2 lanes per row
    L_FC = Ho2 * L_P2                    # 1024 flattened fc3 input
    OUT_PAD = 128 * ((output_size + 127) // 128)

    def kernel(x_ref, w1_ref, s1_ref, t1_ref, w2_ref, s2_ref, t2_ref,
               w3_ref, s3_ref, t3_ref, w4_ref, b4_ref, o_ref, a1_ref, a2_ref):
        b_tile = x_ref.shape[0]
        mh, mo1, mo2 = b_tile * h, b_tile * Ho1, b_tile * Ho2

        # ---- conv1: all 5 kh taps folded into one K=320 matmul via an im2col scratch.
        # Only the boundary rows hold implicit zero padding -> zero just those, every
        # step (interior is fully overwritten; per-step zeroing stays correct when the
        # batch grid is split across TensorCores).
        zrow1 = jnp.zeros((b_tile, P, L_K1), jnp.float32)
        a1_ref[:, 0:P, :] = zrow1
        a1_ref[:, h - P:h, :] = zrow1
        for kh in range(K):
            lo_out, hi_out = max(0, P - kh), h - max(0, kh - P)
            lo_in, hi_in = max(0, kh - P), h - max(0, P - kh)
            a1_ref[:, lo_out:hi_out, kh * L_IN1:(kh + 1) * L_IN1] = x_ref[:, lo_in:hi_in, :]
        lhs1 = a1_ref[...].reshape(mh, L_K1).astype(jnp.bfloat16)   # cast hoisted: once
        acc1 = jnp.dot(lhs1, w1_ref[...], preferred_element_type=jnp.float32)
        y1 = jnp.maximum(acc1 * s1_ref[...] + t1_ref[...], 0.0)     # (b*h, 512) f32

        # ---- pool1 (2x2): W via lane halves (w-parity major layout), H via merging
        # adjacent row pairs into lanes + halves-max; single block store into the
        # H-padded conv2 input slab (no per-row store loop).
        p1w = jnp.maximum(y1[:, :L_IN2], y1[:, L_IN2:])             # (b*h, 256)
        p1r = p1w.reshape(mo1, 2 * L_IN2)                           # rows 2a | 2a+1
        p1 = jnp.maximum(p1r[:, :L_IN2], p1r[:, L_IN2:])            # (b*Ho1, 256)
        zrow2 = jnp.zeros((b_tile, P, L_IN2), jnp.float32)
        a2_ref[:, 0:P, :] = zrow2
        a2_ref[:, P + Ho1:, :] = zrow2
        a2_ref[:, P:P + Ho1, :] = p1.reshape(b_tile, Ho1, L_IN2)

        # ---- conv2: 5 row-shifted K=256 matmuls (already well-shaped for the MXU).
        # Each tap reloads its (aligned) slab window from VMEM; the bf16 cast per tap is
        # a handful of vreg converts and keeps the slab/window handling layout-simple.
        def tap2(kh):
            lhs = a2_ref[:, kh:kh + Ho1, :].reshape(mo1, L_IN2).astype(jnp.bfloat16)
            return jnp.dot(lhs, w2_ref[kh], preferred_element_type=jnp.float32)

        acc2 = tap2(0)                                              # init from first tap
        for kh in range(1, K):
            acc2 = acc2 + tap2(kh)
        y2 = jnp.maximum(acc2 * s2_ref[...] + t2_ref[...], 0.0)     # (b*Ho1, 512)

        # ---- pool2 + fc3 (single dot) + fc4 (lane-padded output).
        p2w = jnp.maximum(y2[:, :L_P2], y2[:, L_P2:])               # (b*Ho1, 256)
        p2r = p2w.reshape(mo2, 2 * L_P2)
        p2 = jnp.maximum(p2r[:, :L_P2], p2r[:, L_P2:])              # (b*Ho2, 256)
        lhs3 = p2.reshape(b_tile, L_FC).astype(jnp.bfloat16)        # (b, 1024)
        y3 = jnp.dot(lhs3, w3_ref[...], preferred_element_type=jnp.float32)
        y3 = jnp.maximum(y3 * s3_ref[...] + t3_ref[...], 0.0)       # (b, 128)
        y4 = jnp.dot(y3.astype(jnp.bfloat16), w4_ref[...],
                     preferred_element_type=jnp.float32) + b4_ref[...]
        o_ref[...] = y4                                             # full-width vst

    def forward(x_nchw, p):
        n = x_nchw.shape[0]
        b_tile = n if n <= max_b_tile else max_b_tile
        n_pad = -(-n // b_tile) * b_tile

        # NCHW -> (N, H, W*Cin): the only host-side layout op.
        x = jnp.transpose(x_nchw.astype(jnp.float32), (0, 2, 3, 1)).reshape(n, h, L_IN1)
        if n_pad != n:
            x = jnp.pad(x, ((0, n_pad - n), (0, 0), (0, 0)))

        macs = (h * L_K1 * L_OUT1 + K * Ho1 * L_IN2 * L_OUT2 + L_FC * F3 + F3 * OUT_PAD)
        weight_bytes = 2 * (L_K1 * L_OUT1 + K * L_IN2 * L_OUT2 + L_FC * F3 + F3 * OUT_PAD)
        cost = pl.CostEstimate(
            flops=int(2 * macs * n_pad),
            transcendentals=0,
            bytes_accessed=int(x.size * 4 + n_pad * OUT_PAD * 4 + weight_bytes))

        out = pl.pallas_call(
            kernel,
            out_shape=jax.ShapeDtypeStruct((n_pad, OUT_PAD), jnp.float32),
            grid=(n_pad // b_tile,),
            in_specs=[
                pl.BlockSpec((b_tile, h, L_IN1), lambda i: (i, 0, 0)),
                pl.BlockSpec((L_K1, L_OUT1), lambda i: (0, 0)),
                pl.BlockSpec((1, L_OUT1), lambda i: (0, 0)),
                pl.BlockSpec((1, L_OUT1), lambda i: (0, 0)),
                pl.BlockSpec((K, L_IN2, L_OUT2), lambda i: (0, 0, 0)),
                pl.BlockSpec((1, L_OUT2), lambda i: (0, 0)),
                pl.BlockSpec((1, L_OUT2), lambda i: (0, 0)),
                pl.BlockSpec((L_FC, F3), lambda i: (0, 0)),
                pl.BlockSpec((1, F3), lambda i: (0, 0)),
                pl.BlockSpec((1, F3), lambda i: (0, 0)),
                pl.BlockSpec((F3, OUT_PAD), lambda i: (0, 0)),
                pl.BlockSpec((1, OUT_PAD), lambda i: (0, 0)),
            ],
            out_specs=pl.BlockSpec((b_tile, OUT_PAD), lambda i: (i, 0)),
            scratch_shapes=[
                pltpu.VMEM((b_tile, h, L_K1), jnp.float32),     # conv1 im2col (kh folded)
                pltpu.VMEM((b_tile, Hp2, L_IN2), jnp.float32),  # H-padded conv2 input slab
            ],
            compiler_params=pltpu.CompilerParams(dimension_semantics=("parallel",)),
            cost_estimate=cost,
        )(x, p["w1"], p["s1"], p["t1"], p["w2"], p["s2"], p["t2"],
          p["w3"], p["s3"], p["t3"], p["w4"], p["b4"])
        return out[:n, :output_size]

    return forward


# --------------------------------------- main ----------------------------------------

if __name__ == "__main__":
    key = jax.random.PRNGKey(0)
    kx, kp = jax.random.split(key)

    input_shape = (4, 16, 16)      # (C, H, W) -> flatten_dim = 64 * 4 * 4 = 1024
    output_size = 10
    batch = 2

    torch_params = init_torch_params(kp, input_shape, output_size)
    packed = pack_params(torch_params, input_shape, output_size)
    x = jax.random.normal(kx, (batch,) + input_shape, jnp.float32)   # NCHW input

    fwd = jax.jit(build_pallas_forward(input_shape, output_size))
    y = fwd(x, packed)
    jax.block_until_ready(y)

    assert y.shape == (batch, output_size), y.shape
    assert bool(jnp.all(jnp.isfinite(y)))

    # Numerical check against the pure-JAX reference of the PyTorch module
    # (loose tolerance: kernel matmuls run in bf16 with f32 accumulation).
    y_ref = reference_forward(x, torch_params)
    np.testing.assert_allclose(np.asarray(y), np.asarray(y_ref), rtol=0.1, atol=0.2)

    print("KERNEL_OK")
</pallas_src>

<mosaic_0001>
module attributes {stable_mosaic.version = 11 : i64} {
  func.func @kernel(%arg0: i32, %arg1: memref<2x16x64xf32, #tpu.memory_space<vmem>>, %arg2: memref<320x512xbf16, #tpu.memory_space<vmem>>, %arg3: memref<1x512xf32, #tpu.memory_space<vmem>>, %arg4: memref<1x512xf32, #tpu.memory_space<vmem>>, %arg5: memref<5x256x512xbf16, #tpu.memory_space<vmem>>, %arg6: memref<1x512xf32, #tpu.memory_space<vmem>>, %arg7: memref<1x512xf32, #tpu.memory_space<vmem>>, %arg8: memref<1024x128xbf16, #tpu.memory_space<vmem>>, %arg9: memref<1x128xf32, #tpu.memory_space<vmem>>, %arg10: memref<1x128xf32, #tpu.memory_space<vmem>>, %arg11: memref<128x128xbf16, #tpu.memory_space<vmem>>, %arg12: memref<1x128xf32, #tpu.memory_space<vmem>>, %arg13: memref<2x128xf32, #tpu.memory_space<vmem>>, %arg14: memref<2x16x320xf32, #tpu.memory_space<vmem>>, %arg15: memref<2x12x256xf32, #tpu.memory_space<vmem>>) attributes {dimension_semantics = [#tpu.dimension_semantics<parallel>], iteration_bounds = array<i64: 1>, scalar_prefetch = 0 : i64, scratch_operands = 2 : i64, tpu.core_type = #tpu.core_type<tc>, window_params = [{transform_indices = @transform_0, window_bounds = array<i64: 2, 16, 64>}, {pipeline_mode = #tpu.pipeline_mode<synchronous>, transform_indices = @transform_1, window_bounds = array<i64: 320, 512>}, {pipeline_mode = #tpu.pipeline_mode<synchronous>, transform_indices = @transform_2, window_bounds = array<i64: 1, 512>}, {pipeline_mode = #tpu.pipeline_mode<synchronous>, transform_indices = @transform_3, window_bounds = array<i64: 1, 512>}, {pipeline_mode = #tpu.pipeline_mode<synchronous>, transform_indices = @transform_4, window_bounds = array<i64: 5, 256, 512>}, {pipeline_mode = #tpu.pipeline_mode<synchronous>, transform_indices = @transform_5, window_bounds = array<i64: 1, 512>}, {pipeline_mode = #tpu.pipeline_mode<synchronous>, transform_indices = @transform_6, window_bounds = array<i64: 1, 512>}, {pipeline_mode = #tpu.pipeline_mode<synchronous>, transform_indices = @transform_7, window_bounds = array<i64: 1024, 128>}, {pipeline_mode = #tpu.pipeline_mode<synchronous>, transform_indices = @transform_8, window_bounds = array<i64: 1, 128>}, {pipeline_mode = #tpu.pipeline_mode<synchronous>, transform_indices = @transform_9, window_bounds = array<i64: 1, 128>}, {pipeline_mode = #tpu.pipeline_mode<synchronous>, transform_indices = @transform_10, window_bounds = array<i64: 128, 128>}, {pipeline_mode = #tpu.pipeline_mode<synchronous>, transform_indices = @transform_11, window_bounds = array<i64: 1, 128>}, {transform_indices = @transform_12, window_bounds = array<i64: 2, 128>}]} {
    %cst = arith.constant 0.000000e+00 : f32
    %0 = vector.broadcast %cst : f32 to vector<2x2x320xf32>
    %c0 = arith.constant 0 : index
    %c0_0 = arith.constant 0 : index
    %c0_1 = arith.constant 0 : index
    %1 = vector.load %arg14[%c0, %c0_0, %c0_1] : memref<2x16x320xf32, #tpu.memory_space<vmem>>, vector<2x2x320xf32>
    tpu.vector_store %arg14[%c0, %c0_0, %c0_1], %0 {strides = array<i32>} : memref<2x16x320xf32, #tpu.memory_space<vmem>>, vector<2x2x320xf32>,
    %c0_2 = arith.constant 0 : index
    %c14 = arith.constant 14 : index
    %c0_3 = arith.constant 0 : index
    %2 = vector.load %arg14[%c0_2, %c14, %c0_3] : memref<2x16x320xf32, #tpu.memory_space<vmem>>, vector<2x2x320xf32>
    tpu.vector_store %arg14[%c0_2, %c14, %c0_3], %0 {strides = array<i32>} : memref<2x16x320xf32, #tpu.memory_space<vmem>>, vector<2x2x320xf32>,
    %c0_4 = arith.constant 0 : index
    %c0_5 = arith.constant 0 : index
    %c0_6 = arith.constant 0 : index
    %3 = vector.load %arg1[%c0_4, %c0_5, %c0_6] : memref<2x16x64xf32, #tpu.memory_space<vmem>>, vector<2x14x64xf32>
    %c0_7 = arith.constant 0 : index
    %c2 = arith.constant 2 : index
    %c0_8 = arith.constant 0 : index
    %4 = vector.load %arg14[%c0_7, %c2, %c0_8] : memref<2x16x320xf32, #tpu.memory_space<vmem>>, vector<2x14x64xf32>
    tpu.vector_store %arg14[%c0_7, %c2, %c0_8], %3 {strides = array<i32>} : memref<2x16x320xf32, #tpu.memory_space<vmem>>, vector<2x14x64xf32>,
    %c0_9 = arith.constant 0 : index
    %c0_10 = arith.constant 0 : index
    %c0_11 = arith.constant 0 : index
    %5 = vector.load %arg1[%c0_9, %c0_10, %c0_11] : memref<2x16x64xf32, #tpu.memory_space<vmem>>, vector<2x15x64xf32>
    %c0_12 = arith.constant 0 : index
    %c1 = arith.constant 1 : index
    %c64 = arith.constant 64 : index
    %6 = vector.load %arg14[%c0_12, %c1, %c64] : memref<2x16x320xf32, #tpu.memory_space<vmem>>, vector<2x15x64xf32>
    tpu.vector_store %arg14[%c0_12, %c1, %c64], %5 {strides = array<i32>} : memref<2x16x320xf32, #tpu.memory_space<vmem>>, vector<2x15x64xf32>,
    %c0_13 = arith.constant 0 : index
    %c0_14 = arith.constant 0 : index
    %c0_15 = arith.constant 0 : index
    %7 = vector.load %arg1[%c0_13, %c0_14, %c0_15] : memref<2x16x64xf32, #tpu.memory_space<vmem>>, vector<2x16x64xf32>
    %c0_16 = arith.constant 0 : index
    %c0_17 = arith.constant 0 : index
    %c128 = arith.constant 128 : index
    %8 = vector.load %arg14[%c0_16, %c0_17, %c128] : memref<2x16x320xf32, #tpu.memory_space<vmem>>, vector<2x16x64xf32>
    tpu.vector_store %arg14[%c0_16, %c0_17, %c128], %7 {strides = array<i32>} : memref<2x16x320xf32, #tpu.memory_space<vmem>>, vector<2x16x64xf32>,
    %c0_18 = arith.constant 0 : index
    %c1_19 = arith.constant 1 : index
    %c0_20 = arith.constant 0 : index
    %9 = vector.load %arg1[%c0_18, %c1_19, %c0_20] : memref<2x16x64xf32, #tpu.memory_space<vmem>>, vector<2x15x64xf32>
    %c0_21 = arith.constant 0 : index
    %c0_22 = arith.constant 0 : index
    %c192 = arith.constant 192 : index
    %10 = vector.load %arg14[%c0_21, %c0_22, %c192] : memref<2x16x320xf32, #tpu.memory_space<vmem>>, vector<2x15x64xf32>
    tpu.vector_store %arg14[%c0_21, %c0_22, %c192], %9 {strides = array<i32>} : memref<2x16x320xf32, #tpu.memory_space<vmem>>, vector<2x15x64xf32>,
    %c0_23 = arith.constant 0 : index
    %c2_24 = arith.constant 2 : index
    %c0_25 = arith.constant 0 : index
    %11 = vector.load %arg1[%c0_23, %c2_24, %c0_25] : memref<2x16x64xf32, #tpu.memory_space<vmem>>, vector<2x14x64xf32>
    %c0_26 = arith.constant 0 : index
    %c0_27 = arith.constant 0 : index
    %c256 = arith.constant 256 : index
    %12 = vector.load %arg14[%c0_26, %c0_27, %c256] : memref<2x16x320xf32, #tpu.memory_space<vmem>>, vector<2x14x64xf32>
    tpu.vector_store %arg14[%c0_26, %c0_27, %c256], %11 {strides = array<i32>} : memref<2x16x320xf32, #tpu.memory_space<vmem>>, vector<2x14x64xf32>,
    %c0_28 = arith.constant 0 : index
    %c0_29 = arith.constant 0 : index
    %c0_30 = arith.constant 0 : index
    %13 = vector.load %arg14[%c0_28, %c0_29, %c0_30] : memref<2x16x320xf32, #tpu.memory_space<vmem>>, vector<2x16x320xf32>
    %14 = vector.shape_cast %13 : vector<2x16x320xf32> to vector<32x320xf32>
    %15 = arith.truncf %14 : vector<32x320xf32> to vector<32x320xbf16>
    %c0_31 = arith.constant 0 : index
    %c0_32 = arith.constant 0 : index
    %16 = vector.load %arg2[%c0_31, %c0_32] : memref<320x512xbf16, #tpu.memory_space<vmem>>, vector<320x512xbf16>
    %cst_33 = arith.constant dense<0.000000e+00> : vector<32x512xf32>
    %17 = tpu.matmul %15, %16, %cst_33 {dimension_numbers = #tpu.dot_dimension_numbers<[1], [0], [0], [1], [0, 0, 1, 1], [], []>} : vector<32x320xbf16>, vector<320x512xbf16>, vector<32x512xf32> -> vector<32x512xf32>
    %c0_34 = arith.constant 0 : index
    %c0_35 = arith.constant 0 : index
    %18 = vector.load %arg3[%c0_34, %c0_35] : memref<1x512xf32, #tpu.memory_space<vmem>>, vector<1x512xf32>
    %19 = vector.broadcast %18 : vector<1x512xf32> to vector<32x512xf32>
    %20 = arith.mulf %17, %19 : vector<32x512xf32>
    %c0_36 = arith.constant 0 : index
    %c0_37 = arith.constant 0 : index
    %21 = vector.load %arg4[%c0_36, %c0_37] : memref<1x512xf32, #tpu.memory_space<vmem>>, vector<1x512xf32>
    %22 = vector.broadcast %21 : vector<1x512xf32> to vector<32x512xf32>
    %23 = arith.addf %20, %22 : vector<32x512xf32>
    %cst_38 = arith.constant 0.000000e+00 : f32
    %24 = vector.broadcast %cst_38 : f32 to vector<32x512xf32>
    %25 = arith.maximumf %23, %24 : vector<32x512xf32>
    %26 = vector.extract_strided_slice %25 {offsets = [0, 0], sizes = [32, 256], strides = [1, 1]} : vector<32x512xf32> to vector<32x256xf32>
    %27 = vector.extract_strided_slice %25 {offsets = [0, 256], sizes = [32, 256], strides = [1, 1]} : vector<32x512xf32> to vector<32x256xf32>
    %28 = arith.maximumf %26, %27 : vector<32x256xf32>
    %29 = vector.shape_cast %28 : vector<32x256xf32> to vector<16x512xf32>
    %30 = vector.extract_strided_slice %29 {offsets = [0, 0], sizes = [16, 256], strides = [1, 1]} : vector<16x512xf32> to vector<16x256xf32>
    %31 = vector.extract_strided_slice %29 {offsets = [0, 256], sizes = [16, 256], strides = [1, 1]} : vector<16x512xf32> to vector<16x256xf32>
    %32 = arith.maximumf %30, %31 : vector<16x256xf32>
    %cst_39 = arith.constant 0.000000e+00 : f32
    %33 = vector.broadcast %cst_39 : f32 to vector<2x2x256xf32>
    %c0_40 = arith.constant 0 : index
    %c0_41 = arith.constant 0 : index
    %c0_42 = arith.constant 0 : index
    %34 = vector.load %arg15[%c0_40, %c0_41, %c0_42] : memref<2x12x256xf32, #tpu.memory_space<vmem>>, vector<2x2x256xf32>
    tpu.vector_store %arg15[%c0_40, %c0_41, %c0_42], %33 {strides = array<i32>} : memref<2x12x256xf32, #tpu.memory_space<vmem>>, vector<2x2x256xf32>,
    %c0_43 = arith.constant 0 : index
    %c10 = arith.constant 10 : index
    %c0_44 = arith.constant 0 : index
    %35 = vector.load %arg15[%c0_43, %c10, %c0_44] : memref<2x12x256xf32, #tpu.memory_space<vmem>>, vector<2x2x256xf32>
    tpu.vector_store %arg15[%c0_43, %c10, %c0_44], %33 {strides = array<i32>} : memref<2x12x256xf32, #tpu.memory_space<vmem>>, vector<2x2x256xf32>,
    %36 = vector.shape_cast %32 : vector<16x256xf32> to vector<2x8x256xf32>
    %c0_45 = arith.constant 0 : index
    %c2_46 = arith.constant 2 : index
    %c0_47 = arith.constant 0 : index
    %37 = vector.load %arg15[%c0_45, %c2_46, %c0_47] : memref<2x12x256xf32, #tpu.memory_space<vmem>>, vector<2x8x256xf32>
    tpu.vector_store %arg15[%c0_45, %c2_46, %c0_47], %36 {strides = array<i32>} : memref<2x12x256xf32, #tpu.memory_space<vmem>>, vector<2x8x256xf32>,
    %c0_48 = arith.constant 0 : index
    %c0_49 = arith.constant 0 : index
    %c0_50 = arith.constant 0 : index
    %38 = vector.load %arg15[%c0_48, %c0_49, %c0_50] : memref<2x12x256xf32, #tpu.memory_space<vmem>>, vector<2x8x256xf32>
    %39 = vector.shape_cast %38 : vector<2x8x256xf32> to vector<16x256xf32>
    %40 = arith.truncf %39 : vector<16x256xf32> to vector<16x256xbf16>
    %c0_51 = arith.constant 0 : index
    %c0_52 = arith.constant 0 : index
    %c0_53 = arith.constant 0 : index
    %41 = vector.load %arg5[%c0_51, %c0_52, %c0_53] : memref<5x256x512xbf16, #tpu.memory_space<vmem>>, vector<1x256x512xbf16>
    %42 = vector.shape_cast %41 : vector<1x256x512xbf16> to vector<256x512xbf16>
    %cst_54 = arith.constant dense<0.000000e+00> : vector<16x512xf32>
    %43 = tpu.matmul %40, %42, %cst_54 {dimension_numbers = #tpu.dot_dimension_numbers<[1], [0], [0], [1], [0, 0, 1, 1], [], []>} : vector<16x256xbf16>, vector<256x512xbf16>, vector<16x512xf32> -> vector<16x512xf32>
    %c0_55 = arith.constant 0 : index
    %c1_56 = arith.constant 1 : index
    %c0_57 = arith.constant 0 : index
    %44 = vector.load %arg15[%c0_55, %c1_56, %c0_57] : memref<2x12x256xf32, #tpu.memory_space<vmem>>, vector<2x8x256xf32>
    %45 = vector.shape_cast %44 : vector<2x8x256xf32> to vector<16x256xf32>
    %46 = arith.truncf %45 : vector<16x256xf32> to vector<16x256xbf16>
    %c1_58 = arith.constant 1 : index
    %c0_59 = arith.constant 0 : index
    %c0_60 = arith.constant 0 : index
    %47 = vector.load %arg5[%c1_58, %c0_59, %c0_60] : memref<5x256x512xbf16, #tpu.memory_space<vmem>>, vector<1x256x512xbf16>
    %48 = vector.shape_cast %47 : vector<1x256x512xbf16> to vector<256x512xbf16>
    %cst_61 = arith.constant dense<0.000000e+00> : vector<16x512xf32>
    %49 = tpu.matmul %46, %48, %cst_61 {dimension_numbers = #tpu.dot_dimension_numbers<[1], [0], [0], [1], [0, 0, 1, 1], [], []>} : vector<16x256xbf16>, vector<256x512xbf16>, vector<16x512xf32> -> vector<16x512xf32>
    %50 = arith.addf %43, %49 : vector<16x512xf32>
    %c0_62 = arith.constant 0 : index
    %c2_63 = arith.constant 2 : index
    %c0_64 = arith.constant 0 : index
    %51 = vector.load %arg15[%c0_62, %c2_63, %c0_64] : memref<2x12x256xf32, #tpu.memory_space<vmem>>, vector<2x8x256xf32>
    %52 = vector.shape_cast %51 : vector<2x8x256xf32> to vector<16x256xf32>
    %53 = arith.truncf %52 : vector<16x256xf32> to vector<16x256xbf16>
    %c2_65 = arith.constant 2 : index
    %c0_66 = arith.constant 0 : index
    %c0_67 = arith.constant 0 : index
    %54 = vector.load %arg5[%c2_65, %c0_66, %c0_67] : memref<5x256x512xbf16, #tpu.memory_space<vmem>>, vector<1x256x512xbf16>
    %55 = vector.shape_cast %54 : vector<1x256x512xbf16> to vector<256x512xbf16>
    %cst_68 = arith.constant dense<0.000000e+00> : vector<16x512xf32>
    %56 = tpu.matmul %53, %55, %cst_68 {dimension_numbers = #tpu.dot_dimension_numbers<[1], [0], [0], [1], [0, 0, 1, 1], [], []>} : vector<16x256xbf16>, vector<256x512xbf16>, vector<16x512xf32> -> vector<16x512xf32>
    %57 = arith.addf %50, %56 : vector<16x512xf32>
    %c0_69 = arith.constant 0 : index
    %c3 = arith.constant 3 : index
    %c0_70 = arith.constant 0 : index
    %58 = vector.load %arg15[%c0_69, %c3, %c0_70] : memref<2x12x256xf32, #tpu.memory_space<vmem>>, vector<2x8x256xf32>
    %59 = vector.shape_cast %58 : vector<2x8x256xf32> to vector<16x256xf32>
    %60 = arith.truncf %59 : vector<16x256xf32> to vector<16x256xbf16>
    %c3_71 = arith.constant 3 : index
    %c0_72 = arith.constant 0 : index
    %c0_73 = arith.constant 0 : index
    %61 = vector.load %arg5[%c3_71, %c0_72, %c0_73] : memref<5x256x512xbf16, #tpu.memory_space<vmem>>, vector<1x256x512xbf16>
    %62 = vector.shape_cast %61 : vector<1x256x512xbf16> to vector<256x512xbf16>
    %cst_74 = arith.constant dense<0.000000e+00> : vector<16x512xf32>
    %63 = tpu.matmul %60, %62, %cst_74 {dimension_numbers = #tpu.dot_dimension_numbers<[1], [0], [0], [1], [0, 0, 1, 1], [], []>} : vector<16x256xbf16>, vector<256x512xbf16>, vector<16x512xf32> -> vector<16x512xf32>
    %64 = arith.addf %57, %63 : vector<16x512xf32>
    %c0_75 = arith.constant 0 : index
    %c4 = arith.constant 4 : index
    %c0_76 = arith.constant 0 : index
    %65 = vector.load %arg15[%c0_75, %c4, %c0_76] : memref<2x12x256xf32, #tpu.memory_space<vmem>>, vector<2x8x256xf32>
    %66 = vector.shape_cast %65 : vector<2x8x256xf32> to vector<16x256xf32>
    %67 = arith.truncf %66 : vector<16x256xf32> to vector<16x256xbf16>
    %c4_77 = arith.constant 4 : index
    %c0_78 = arith.constant 0 : index
    %c0_79 = arith.constant 0 : index
    %68 = vector.load %arg5[%c4_77, %c0_78, %c0_79] : memref<5x256x512xbf16, #tpu.memory_space<vmem>>, vector<1x256x512xbf16>
    %69 = vector.shape_cast %68 : vector<1x256x512xbf16> to vector<256x512xbf16>
    %cst_80 = arith.constant dense<0.000000e+00> : vector<16x512xf32>
    %70 = tpu.matmul %67, %69, %cst_80 {dimension_numbers = #tpu.dot_dimension_numbers<[1], [0], [0], [1], [0, 0, 1, 1], [], []>} : vector<16x256xbf16>, vector<256x512xbf16>, vector<16x512xf32> -> vector<16x512xf32>
    %71 = arith.addf %64, %70 : vector<16x512xf32>
    %c0_81 = arith.constant 0 : index
    %c0_82 = arith.constant 0 : index
    %72 = vector.load %arg6[%c0_81, %c0_82] : memref<1x512xf32, #tpu.memory_space<vmem>>, vector<1x512xf32>
    %73 = vector.broadcast %72 : vector<1x512xf32> to vector<16x512xf32>
    %74 = arith.mulf %71, %73 : vector<16x512xf32>
    %c0_83 = arith.constant 0 : index
    %c0_84 = arith.constant 0 : index
    %75 = vector.load %arg7[%c0_83, %c0_84] : memref<1x512xf32, #tpu.memory_space<vmem>>, vector<1x512xf32>
    %76 = vector.broadcast %75 : vector<1x512xf32> to vector<16x512xf32>
    %77 = arith.addf %74, %76 : vector<16x512xf32>
    %cst_85 = arith.constant 0.000000e+00 : f32
    %78 = vector.broadcast %cst_85 : f32 to vector<16x512xf32>
    %79 = arith.maximumf %77, %78 : vector<16x512xf32>
    %80 = vector.extract_strided_slice %79 {offsets = [0, 0], sizes = [16, 256], strides = [1, 1]} : vector<16x512xf32> to vector<16x256xf32>
    %81 = vector.extract_strided_slice %79 {offsets = [0, 256], sizes = [16, 256], strides = [1, 1]} : vector<16x512xf32> to vector<16x256xf32>
    %82 = arith.maximumf %80, %81 : vector<16x256xf32>
    %83 = vector.shape_cast %82 : vector<16x256xf32> to vector<8x512xf32>
    %84 = vector.extract_strided_slice %83 {offsets = [0, 0], sizes = [8, 256], strides = [1, 1]} : vector<8x512xf32> to vector<8x256xf32>
    %85 = vector.extract_strided_slice %83 {offsets = [0, 256], sizes = [8, 256], strides = [1, 1]} : vector<8x512xf32> to vector<8x256xf32>
    %86 = arith.maximumf %84, %85 : vector<8x256xf32>
    %87 = vector.shape_cast %86 : vector<8x256xf32> to vector<2x1024xf32>
    %88 = arith.truncf %87 : vector<2x1024xf32> to vector<2x1024xbf16>
    %c0_86 = arith.constant 0 : index
    %c0_87 = arith.constant 0 : index
    %89 = vector.load %arg8[%c0_86, %c0_87] : memref<1024x128xbf16, #tpu.memory_space<vmem>>, vector<1024x128xbf16>
    %cst_88 = arith.constant dense<0.000000e+00> : vector<2x128xf32>
    %90 = tpu.matmul %88, %89, %cst_88 {dimension_numbers = #tpu.dot_dimension_numbers<[1], [0], [0], [1], [0, 0, 1, 1], [], []>} : vector<2x1024xbf16>, vector<1024x128xbf16>, vector<2x128xf32> -> vector<2x128xf32>
    %c0_89 = arith.constant 0 : index
    %c0_90 = arith.constant 0 : index
    %91 = vector.load %arg9[%c0_89, %c0_90] : memref<1x128xf32, #tpu.memory_space<vmem>>, vector<1x128xf32>
    %92 = vector.broadcast %91 : vector<1x128xf32> to vector<2x128xf32>
    %93 = arith.mulf %90, %92 : vector<2x128xf32>
    %c0_91 = arith.constant 0 : index
    %c0_92 = arith.constant 0 : index
    %94 = vector.load %arg10[%c0_91, %c0_92] : memref<1x128xf32, #tpu.memory_space<vmem>>, vector<1x128xf32>
    %95 = vector.broadcast %94 : vector<1x128xf32> to vector<2x128xf32>
    %96 = arith.addf %93, %95 : vector<2x128xf32>
    %cst_93 = arith.constant 0.000000e+00 : f32
    %97 = vector.broadcast %cst_93 : f32 to vector<2x128xf32>
    %98 = arith.maximumf %96, %97 : vector<2x128xf32>
    %99 = arith.truncf %98 : vector<2x128xf32> to vector<2x128xbf16>
    %c0_94 = arith.constant 0 : index
    %c0_95 = arith.constant 0 : index
    %100 = vector.load %arg11[%c0_94, %c0_95] : memref<128x128xbf16, #tpu.memory_space<vmem>>, vector<128x128xbf16>
    %cst_96 = arith.constant dense<0.000000e+00> : vector<2x128xf32>
    %101 = tpu.matmul %99, %100, %cst_96 {dimension_numbers = #tpu.dot_dimension_numbers<[1], [0], [0], [1], [0, 0, 1, 1], [], []>} : vector<2x128xbf16>, vector<128x128xbf16>, vector<2x128xf32> -> vector<2x128xf32>
    %c0_97 = arith.constant 0 : index
    %c0_98 = arith.constant 0 : index
    %102 = vector.load %arg12[%c0_97, %c0_98] : memref<1x128xf32, #tpu.memory_space<vmem>>, vector<1x128xf32>
    %103 = vector.broadcast %102 : vector<1x128xf32> to vector<2x128xf32>
    %104 = arith.addf %101, %103 : vector<2x128xf32>
    %c0_99 = arith.constant 0 : index
    %c0_100 = arith.constant 0 : index
    %105 = vector.load %arg13[%c0_99, %c0_100] : memref<2x128xf32, #tpu.memory_space<vmem>>, vector<2x128xf32>
    tpu.vector_store %arg13[%c0_99, %c0_100], %104 {strides = array<i32>} : memref<2x128xf32, #tpu.memory_space<vmem>>, vector<2x128xf32>,
    return
  }
  func.func @transform_0(%arg0: i32) -> (i32, i32, i32) {
    %c0_i32 = arith.constant 0 : i32
    %c0_i32_0 = arith.constant 0 : i32
    %c0_i32_1 = arith.constant 0 : i32
    return %arg0, %c0_i32, %c0_i32_0 : i32, i32, i32
  }
  func.func @transform_1(%arg0: i32) -> (i32, i32) {
    %c0_i32 = arith.constant 0 : i32
    %c0_i32_0 = arith.constant 0 : i32
    %c0_i32_1 = arith.constant 0 : i32
    return %c0_i32, %c0_i32_0 : i32, i32
  }
  func.func @transform_2(%arg0: i32) -> (i32, i32) {
    %c0_i32 = arith.constant 0 : i32
    %c0_i32_0 = arith.constant 0 : i32
    %c0_i32_1 = arith.constant 0 : i32
    return %c0_i32, %c0_i32_0 : i32, i32
  }
  func.func @transform_3(%arg0: i32) -> (i32, i32) {
    %c0_i32 = arith.constant 0 : i32
    %c0_i32_0 = arith.constant 0 : i32
    %c0_i32_1 = arith.constant 0 : i32
    return %c0_i32, %c0_i32_0 : i32, i32
  }
  func.func @transform_4(%arg0: i32) -> (i32, i32, i32) {
    %c0_i32 = arith.constant 0 : i32
    %c0_i32_0 = arith.constant 0 : i32
    %c0_i32_1 = arith.constant 0 : i32
    %c0_i32_2 = arith.constant 0 : i32
    return %c0_i32, %c0_i32_0, %c0_i32_1 : i32, i32, i32
  }
  func.func @transform_5(%arg0: i32) -> (i32, i32) {
    %c0_i32 = arith.constant 0 : i32
    %c0_i32_0 = arith.constant 0 : i32
    %c0_i32_1 = arith.constant 0 : i32
    return %c0_i32, %c0_i32_0 : i32, i32
  }
  func.func @transform_6(%arg0: i32) -> (i32, i32) {
    %c0_i32 = arith.constant 0 : i32
    %c0_i32_0 = arith.constant 0 : i32
    %c0_i32_1 = arith.constant 0 : i32
    return %c0_i32, %c0_i32_0 : i32, i32
  }
  func.func @transform_7(%arg0: i32) -> (i32, i32) {
    %c0_i32 = arith.constant 0 : i32
    %c0_i32_0 = arith.constant 0 : i32
    %c0_i32_1 = arith.constant 0 : i32
    return %c0_i32, %c0_i32_0 : i32, i32
  }
  func.func @transform_8(%arg0: i32) -> (i32, i32) {
    %c0_i32 = arith.constant 0 : i32
    %c0_i32_0 = arith.constant 0 : i32
    %c0_i32_1 = arith.constant 0 : i32
    return %c0_i32, %c0_i32_0 : i32, i32
  }
  func.func @transform_9(%arg0: i32) -> (i32, i32) {
    %c0_i32 = arith.constant 0 : i32
    %c0_i32_0 = arith.constant 0 : i32
    %c0_i32_1 = arith.constant 0 : i32
    return %c0_i32, %c0_i32_0 : i32, i32
  }
  func.func @transform_10(%arg0: i32) -> (i32, i32) {
    %c0_i32 = arith.constant 0 : i32
    %c0_i32_0 = arith.constant 0 : i32
    %c0_i32_1 = arith.constant 0 : i32
    return %c0_i32, %c0_i32_0 : i32, i32
  }
  func.func @transform_11(%arg0: i32) -> (i32, i32) {
    %c0_i32 = arith.constant 0 : i32
    %c0_i32_0 = arith.constant 0 : i32
    %c0_i32_1 = arith.constant 0 : i32
    return %c0_i32, %c0_i32_0 : i32, i32
  }
  func.func @transform_12(%arg0: i32) -> (i32, i32) {
    %c0_i32 = arith.constant 0 : i32
    %c0_i32_0 = arith.constant 0 : i32
    return %arg0, %c0_i32 : i32, i32
  }
}

</mosaic_0001>

<bundles_post_ra>
// kernel: forward.1
= control target key start
LH: loop header
LB: loop body
LE: loop exit
PB: predicated region body
PF: predicated region fallthrough
CT: control target
= control target key end

     0   :  { %17 = vsyncpa [#allocation5], 0  ;;  %s6997_s0 = inlined_call_operand.vmem [shape: f32[2,16,64], index: 0, kind: input, shape index: {}]   ;;  %s6998_s1 = inlined_call_operand.hbm [shape: bf16[320,512], index: 1, kind: input, shape index: {}]   ;;  %s6999_s2 = inlined_call_operand.hbm [shape: f32[1,512], index: 2, kind: input, shape index: {}]   ;;  %s7000_s3 = inlined_call_operand.hbm [shape: f32[1,512], index: 3, kind: input, shape index: {}]   ;;  %s7001_s4 = inlined_call_operand.hbm [shape: bf16[5,256,512], index: 4, kind: input, shape index: {}]   ;;  %s7002_s5 = inlined_call_operand.hbm [shape: f32[1,512], index: 5, kind: input, shape index: {}]   ;;  %s7003_s6 = inlined_call_operand.hbm [shape: f32[1,512], index: 6, kind: input, shape index: {}]   ;;  %s7004_s7 = inlined_call_operand.hbm [shape: bf16[1024,128], index: 7, kind: input, shape index: {}]   ;;  %s7005_s8 = inlined_call_operand.hbm [shape: f32[1,128], index: 8, kind: input, shape index: {}]   ;;  %s7006_s9 = inlined_call_operand.hbm [shape: f32[1,128], index: 9, kind: input, shape index: {}]   ;;  %s7007_s10 = inlined_call_operand.hbm [shape: bf16[128,128], index: 10, kind: input, shape index: {}]   ;;  %s7008_s11 = inlined_call_operand.hbm [shape: f32[1,128], index: 11, kind: input, shape index: {}]   ;;  %s7009_s12 = inlined_call_operand.hbm [shape: f32[2,128], index: 12, kind: output, shape index: {}]  }
   0x1   :  { %18 = vsyncpa [#allocation8], 0 }
   0x2   :  { %19 = vsyncpa [#allocation11], 0 }
   0x3   :  { %20 = vsyncpa [#allocation14], 0 }
   0x4   :  { %21 = vsyncpa [#allocation17], 0 }
   0x5   :  { %22 = vsyncpa [#allocation20], 0 }
   0x6   :  { %23 = vsyncpa [#allocation6], 0  ;;  %s6500_s21 = smov [#allocation7]   ;;  %s6222_s25 = scalar_lea.hbm %s6999_s2, 64 }
   0x7   :  { %s44_s22 = sshll.u32 %s6500_s21, 4  ;;  %p6223_p0 = scmp.ne.s32.totalorder %s6999_s2, %s6222_s25  ;;  %s45_s22 = int_to_ptr.vmem [resolvable:$true] %s44_s22 }
   0x8   :  { %p6226_p1 = scmp.lt.u32.totalorder %s6222_s25, %s6999_s2 }
   0xa   :  { %p6228_p2 = pnand %p6226_p1, %p6223_p0 }
   0xc   :  { %6231 = shalt.err (!%p6228_p2)
}
   0xd   :  { %s6232_s30 = scalar_lea.vmem %s45_s22, 64  ;;  %p6237_p4 = scmp.lt.s32.totalorder %s45_s22, %s45_s22 }
   0xe   :  { %p6233_p3 = scmp.ne.s32.totalorder %s45_s22, %s6232_s30  ;;  %p6238_p5 = scmp.lt.s32.totalorder %s6232_s30, %s6232_s30 }
  0x10   :  { %p6239_p6 = por %p6238_p5, %p6237_p4 }
  0x12   :  { %p6240_p7 = pnand %p6239_p6, %p6233_p3 }
  0x14   :  { %6243 = shalt.err (!%p6240_p7)
}
  0x15   :  { %47 = dma.hbm_to_vmem [thread:$0]  %s6999_s2, 64, %s45_s22, [#allocation8]  }
  0x16   :  { %s6501_s15 = smov [#allocation10]   ;;  %s6502_s17 = smov [#allocation13]  }
  0x17   :  { %s63_s16 = sshll.u32 %s6501_s15, 4  ;;  %s86_s18 = sshll.u32 %s6502_s17, 4  ;;  %s64_s16 = int_to_ptr.vmem [resolvable:$true] %s63_s16  ;;  %s87_s18 = int_to_ptr.vmem [resolvable:$true] %s86_s18 }
  0x18   :  { %s6244_s21 = scalar_lea.hbm %s7001_s4, 40960 }
  0x19   :  { %p6245_p8 = scmp.ne.s32.totalorder %s7001_s4, %s6244_s21  ;;  %p6248_p9 = scmp.lt.u32.totalorder %s6244_s21, %s7001_s4 }
  0x1b   :  { %p6250_p10 = pnand %p6248_p9, %p6245_p8 }
  0x1d   :  { %6253 = shalt.err (!%p6250_p10)
}
  0x1e   :  { %s6254_s2 = scalar_lea.vmem %s64_s16, 40960  ;;  %p6259_p12 = scmp.lt.s32.totalorder %s64_s16, %s64_s16 }
  0x1f   :  { %p6255_p11 = scmp.ne.s32.totalorder %s64_s16, %s6254_s2  ;;  %p6260_p13 = scmp.lt.s32.totalorder %s6254_s2, %s6254_s2 }
  0x21   :  { %p6261_p0 = por %p6260_p13, %p6259_p12 }
  0x23   :  { %p6262_p1 = pnand %p6261_p0, %p6255_p11 }
  0x25   :  { %6265 = shalt.err (!%p6262_p1)
}
  0x26   :  { %s6503_s22 = smov 256   ;;  %s6504_s27 = smov 16  }
  0x27   :  { %69 = dma.hbm_to_vmem [thread:$0]  %s7001_s4, 40960, %s64_s16, [#allocation11], %s6503_s22, %s6503_s22, %s6504_s27  }
  0x28   :  { %s6266_s14 = scalar_lea.hbm %s7003_s6, 64 }
  0x29   :  { %p6267_p2 = scmp.ne.s32.totalorder %s7003_s6, %s6266_s14  ;;  %p6270_p3 = scmp.lt.u32.totalorder %s6266_s14, %s7003_s6 }
  0x2b   :  { %p6272_p4 = pnand %p6270_p3, %p6267_p2 }
  0x2d   :  { %6275 = shalt.err (!%p6272_p4)
}
  0x2e   :  { %s6276_s21 = scalar_lea.vmem %s87_s18, 64  ;;  %p6281_p6 = scmp.lt.s32.totalorder %s87_s18, %s87_s18 }
  0x2f   :  { %p6277_p5 = scmp.ne.s32.totalorder %s87_s18, %s6276_s21  ;;  %p6282_p7 = scmp.lt.s32.totalorder %s6276_s21, %s6276_s21 }
  0x31   :  { %p6283_p8 = por %p6282_p7, %p6281_p6 }
  0x33   :  { %p6284_p9 = pnand %p6283_p8, %p6277_p5 }
  0x35   :  { %6287 = shalt.err (!%p6284_p9)
}
  0x36   :  { %89 = dma.hbm_to_vmem [thread:$0]  %s7003_s6, 64, %s87_s18, [#allocation14]  }
  0x37   :  { %s6505_s23 = smov [#allocation16]   ;;  %s6288_s2 = scalar_lea.hbm %s7005_s8, 16 }
  0x38   :  { %s108_s24 = sshll.u32 %s6505_s23, 4  ;;  %p6289_p10 = scmp.ne.s32.totalorder %s7005_s8, %s6288_s2  ;;  %s109_s24 = int_to_ptr.vmem [resolvable:$true] %s108_s24 }
  0x39   :  { %p6292_p11 = scmp.lt.u32.totalorder %s6288_s2, %s7005_s8 }
  0x3b   :  { %p6294_p12 = pnand %p6292_p11, %p6289_p10 }
  0x3d   :  { %6297 = shalt.err (!%p6294_p12)
}
  0x3e   :  { %s6298_s14 = scalar_lea.vmem %s109_s24, 16  ;;  %s6302_s6 = scalar_lea.vmem %s109_s24, 32 }
  0x3f   :  { %p6299_p13 = scmp.ne.s32.totalorder %s109_s24, %s6298_s14  ;;  %p6303_p0 = scmp.lt.s32.totalorder %s109_s24, %s109_s24 }
  0x40   :  { %p6304_p1 = scmp.lt.s32.totalorder %s6302_s6, %s6298_s14 }
  0x42   :  { %p6305_p2 = por %p6304_p1, %p6303_p0 }
  0x44   :  { %p6306_p3 = pnand %p6305_p2, %p6299_p13 }
  0x46   :  { %6309 = shalt.err (!%p6306_p3)
}
  0x47   :  { %111 = dma.hbm_to_vmem [thread:$0]  %s7005_s8, 16, %s109_s24, [#allocation17]  }
  0x48   :  { %s6506_s17 = smov [#allocation19]   ;;  %s6507_s20 = smov [#allocation4]  }
  0x49   :  { %s127_s19 = sshll.u32 %s6506_s17, 4  ;;  %s31_s21 = sshll.u32 %s6507_s20, 4  ;;  %s128_s19 = int_to_ptr.vmem [resolvable:$true] %s127_s19  ;;  %s6638_s21 = int_to_ptr.vmem [resolvable:$true] %s31_s21 }
  0x4a   :  { %s6310_s23 = scalar_lea.hbm %s7007_s10, 1024 }
  0x4b   :  { %p6311_p4 = scmp.ne.s32.totalorder %s7007_s10, %s6310_s23  ;;  %p6314_p5 = scmp.lt.u32.totalorder %s6310_s23, %s7007_s10 }
  0x4d   :  { %p6316_p6 = pnand %p6314_p5, %p6311_p4 }
  0x4f   :  { %6319 = shalt.err (!%p6316_p6)
}
  0x50   :  { %s6320_s8 = scalar_lea.vmem %s128_s19, 1024  ;;  %p6325_p8 = scmp.lt.s32.totalorder %s128_s19, %s128_s19 }
  0x51   :  { %p6321_p7 = scmp.ne.s32.totalorder %s128_s19, %s6320_s8  ;;  %p6326_p9 = scmp.lt.s32.totalorder %s6320_s8, %s6320_s8 }
  0x53   :  { %p6327_p10 = por %p6326_p9, %p6325_p8 }
  0x55   :  { %p6328_p11 = pnand %p6327_p10, %p6321_p7 }
  0x57   :  { %6331 = shalt.err (!%p6328_p11)
}
  0x58   :  { %s6508_s24 = smov 64   ;;  %s6509_s29 = smov 4  }
  0x59   :  { %133 = dma.hbm_to_vmem [thread:$0]  %s7007_s10, 1024, %s128_s19, [#allocation20], %s6508_s24, %s6508_s24, %s6509_s29  }
  0x5a   :  { %s6332_s18 = scalar_lea.hbm %s6998_s1, 10240 }
  0x5b   :  { %p6333_p12 = scmp.ne.s32.totalorder %s6998_s1, %s6332_s18  ;;  %p6336_p13 = scmp.lt.u32.totalorder %s6332_s18, %s6998_s1 }
  0x5d   :  { %p6338_p0 = pnand %p6336_p13, %p6333_p12 }
  0x5f   :  { %6341 = shalt.err (!%p6338_p0)
}
  0x60   :  { %s6342_s16 = scalar_lea.vmem %s6638_s21, 10240  ;;  %p6347_p2 = scmp.lt.s32.totalorder %s6638_s21, %s6638_s21 }
  0x61   :  { %p6343_p1 = scmp.ne.s32.totalorder %s6638_s21, %s6342_s16  ;;  %p6348_p3 = scmp.lt.s32.totalorder %s6342_s16, %s6342_s16 }
  0x63   :  { %p6349_p4 = por %p6348_p3, %p6347_p2 }
  0x65   :  { %p6350_p5 = pnand %p6349_p4, %p6343_p1 }
  0x67   :  { %6353 = shalt.err (!%p6350_p5)
}
  0x68   :  { %37 = dma.hbm_to_vmem [thread:$0]  %s6998_s1, 10240, %s6638_s21, [#allocation5], %s6503_s22, %s6503_s22, %s6504_s27  }
  0x69   :  { %s6510_s23 = smov [#allocation9]   ;;  %s6511_s26 = smov [#allocation12]  }
  0x6a   :  { %s54_s25 = sshll.u32 %s6510_s23, 4  ;;  %s76_s2 = sshll.u32 %s6511_s26, 4  ;;  %s55_s25 = int_to_ptr.vmem [resolvable:$true] %s54_s25  ;;  %s77_s2 = int_to_ptr.vmem [resolvable:$true] %s76_s2 }
  0x6b   :  { %s6354_s30 = scalar_lea.hbm %s7000_s3, 64 }
  0x6c   :  { %p6355_p6 = scmp.ne.s32.totalorder %s7000_s3, %s6354_s30  ;;  %p6358_p7 = scmp.lt.u32.totalorder %s6354_s30, %s7000_s3 }
  0x6e   :  { %p6360_p8 = pnand %p6358_p7, %p6355_p6 }
  0x70   :  { %6363 = shalt.err (!%p6360_p8)
}
  0x71   :  { %s6364_s1 = scalar_lea.vmem %s55_s25, 64  ;;  %p6369_p10 = scmp.lt.s32.totalorder %s55_s25, %s55_s25 }
  0x72   :  { %p6365_p9 = scmp.ne.s32.totalorder %s55_s25, %s6364_s1  ;;  %p6370_p11 = scmp.lt.s32.totalorder %s6364_s1, %s6364_s1 }
  0x74   :  { %p6371_p12 = por %p6370_p11, %p6369_p10 }
  0x76   :  { %p6372_p13 = pnand %p6371_p12, %p6365_p9 }
  0x78   :  { %6375 = shalt.err (!%p6372_p13)
}
  0x79   :  { %57 = dma.hbm_to_vmem [thread:$0]  %s7000_s3, 64, %s55_s25, [#allocation8]  }
  0x7a   :  { %s6376_s17 = scalar_lea.hbm %s7002_s5, 64 }
  0x7b   :  { %p6377_p0 = scmp.ne.s32.totalorder %s7002_s5, %s6376_s17  ;;  %p6380_p1 = scmp.lt.u32.totalorder %s6376_s17, %s7002_s5 }
  0x7d   :  { %p6382_p2 = pnand %p6380_p1, %p6377_p0 }
  0x7f   :  { %6385 = shalt.err (!%p6382_p2)
}
  0x80   :  { %s6386_s19 = scalar_lea.vmem %s77_s2, 64  ;;  %p6391_p4 = scmp.lt.s32.totalorder %s77_s2, %s77_s2 }
  0x81   :  { %p6387_p3 = scmp.ne.s32.totalorder %s77_s2, %s6386_s19  ;;  %p6392_p5 = scmp.lt.s32.totalorder %s6386_s19, %s6386_s19 }
  0x83   :  { %p6393_p6 = por %p6392_p5, %p6391_p4 }
  0x85   :  { %p6394_p7 = pnand %p6393_p6, %p6387_p3 }
  0x87   :  { %6397 = shalt.err (!%p6394_p7)
}
  0x88   :  { %79 = dma.hbm_to_vmem [thread:$0]  %s7002_s5, 64, %s77_s2, [#allocation11]  }
  0x89   :  { %s6512_s25 = smov [#allocation15]   ;;  %s6513_s28 = smov [#allocation18]  }
  0x8a   :  { %s95_s26 = sshll.u32 %s6512_s25, 4  ;;  %s118_s8 = sshll.u32 %s6513_s28, 4  ;;  %s96_s26 = int_to_ptr.vmem [resolvable:$true] %s95_s26  ;;  %s119_s8 = int_to_ptr.vmem [resolvable:$true] %s118_s8 }
  0x8b   :  { %s6398_s14 = scalar_lea.hbm %s7004_s7, 8192 }
  0x8c   :  { %p6399_p8 = scmp.ne.s32.totalorder %s7004_s7, %s6398_s14  ;;  %p6402_p9 = scmp.lt.u32.totalorder %s6398_s14, %s7004_s7 }
  0x8e   :  { %p6404_p10 = pnand %p6402_p9, %p6399_p8 }
  0x90   :  { %6407 = shalt.err (!%p6404_p10)
}
  0x91   :  { %s6408_s5 = scalar_lea.vmem %s96_s26, 8192  ;;  %p6413_p12 = scmp.lt.s32.totalorder %s96_s26, %s96_s26 }
  0x92   :  { %p6409_p11 = scmp.ne.s32.totalorder %s96_s26, %s6408_s5  ;;  %p6414_p13 = scmp.lt.s32.totalorder %s6408_s5, %s6408_s5 }
  0x94   :  { %p6415_p0 = por %p6414_p13, %p6413_p12 }
  0x96   :  { %p6416_p1 = pnand %p6415_p0, %p6409_p11 }
  0x98   :  { %6419 = shalt.err (!%p6416_p1)
}
  0x99   :  { %101 = dma.hbm_to_vmem [thread:$0]  %s7004_s7, 8192, %s96_s26, [#allocation14], %s6508_s24, %s6508_s24, %s6509_s29  }
  0x9a   :  { %s6420_s17 = scalar_lea.hbm %s7006_s9, 16 }
  0x9b   :  { %p6421_p2 = scmp.ne.s32.totalorder %s7006_s9, %s6420_s17  ;;  %p6424_p3 = scmp.lt.u32.totalorder %s6420_s17, %s7006_s9 }
  0x9d   :  { %p6426_p4 = pnand %p6424_p3, %p6421_p2 }
  0x9f   :  { %6429 = shalt.err (!%p6426_p4)
}
  0xa0   :  { %s6430_s19 = scalar_lea.vmem %s119_s8, 16  ;;  %s6434_s3 = scalar_lea.vmem %s119_s8, 32 }
  0xa1   :  { %p6431_p5 = scmp.ne.s32.totalorder %s119_s8, %s6430_s19  ;;  %p6435_p6 = scmp.lt.s32.totalorder %s119_s8, %s119_s8 }
  0xa2   :  { %p6436_p7 = scmp.lt.s32.totalorder %s6434_s3, %s6430_s19 }
  0xa4   :  { %p6437_p8 = por %p6436_p7, %p6435_p6 }
  0xa6   :  { %p6438_p9 = pnand %p6437_p8, %p6431_p5 }
  0xa8   :  { %6441 = shalt.err (!%p6438_p9)
}
  0xa9   :  { %121 = dma.hbm_to_vmem [thread:$0]  %s7006_s9, 16, %s119_s8, [#allocation17]  }
  0xaa   :  { %s6514_s23 = smov [#allocation21]   ;;  %s6442_s30 = scalar_lea.hbm %s7008_s11, 16 }
  0xab   :  { %s140_s25 = sshll.u32 %s6514_s23, 4  ;;  %p6443_p10 = scmp.ne.s32.totalorder %s7008_s11, %s6442_s30  ;;  %s141_s25 = int_to_ptr.vmem [resolvable:$true] %s140_s25 }
  0xac   :  { %p6446_p11 = scmp.lt.u32.totalorder %s6442_s30, %s7008_s11 }
  0xae   :  { %p6448_p12 = pnand %p6446_p11, %p6443_p10 }
  0xb0   :  { %6451 = shalt.err (!%p6448_p12)
}
  0xb1   :  { %s6452_s1 = scalar_lea.vmem %s141_s25, 16  ;;  %s6456_s9 = scalar_lea.vmem %s141_s25, 32 }
  0xb2   :  { %p6453_p13 = scmp.ne.s32.totalorder %s141_s25, %s6452_s1  ;;  %p6457_p0 = scmp.lt.s32.totalorder %s141_s25, %s141_s25 }
  0xb3   :  { %p6458_p1 = scmp.lt.s32.totalorder %s6456_s9, %s6452_s1 }
  0xb5   :  { %p6459_p2 = por %p6458_p1, %p6457_p0 }
  0xb7   :  { %p6460_p3 = pnand %p6459_p2, %p6453_p13 }
  0xb9   :  { %6463 = shalt.err (!%p6460_p3)
}
  0xba   :  { %143 = dma.hbm_to_vmem [thread:$0]  %s7008_s11, 16, %s141_s25, [#allocation20]  }
  0xbb   :  { %6486 = dma.done.wait [#allocation5], 10240  }
  0xbc   :  { %6487 = vsyncadd [#allocation5], 4294957056 }
  0xbd   :  { %6488 = dma.done.wait [#allocation8], 128  }
  0xbe   :  { %6489 = vsyncadd [#allocation8], 4294967168 }
  0xbf   :  { %6490 = dma.done.wait [#allocation11], 41024  }
  0xc0   :  { %6491 = vsyncadd [#allocation11], 4294926272 }
  0xc1   :  { %6492 = dma.done.wait [#allocation14], 8256  }
  0xc2   :  { %6493 = vsyncadd [#allocation14], 4294959040 }
  0xc3   :  { %6494 = dma.done.wait [#allocation17], 32  }
  0xc4   :  { %6495 = vsyncadd [#allocation17], 4294967264 }
  0xc5   :  { %6496 = dma.done.wait [#allocation20], 1040  }
  0xc6   :  { %6497 = vsyncadd [#allocation20], 4294966256  ;;  %vm180_vm0 = vcmask 517120   ;;  %v6515_v0 = vmov 0   ;;  %v6516_v1 = vmov 0.0   ;;  %vm187_vm1 = vcmask 523270  }
  0xc7   :  { %881 = vmatprep.mubr.bf16.mxu1 %v6515_v0  ;;  %181 = vst.msk [vmem:[#allocation2 + $0x10] sm:$0x3] %vm180_vm0, %v6516_v1  ;;  %178 = vst [vmem:[#allocation2] sm:$0x3] %v6516_v1  ;;  %v258_v2 = vld [vmem:[%s6997_s0 + $0x1] sm:$0xff]  ;;  %vm213_vm2 = vcmask 523264  }
  0xc8   :  { %179 = vst [vmem:[#allocation2 + $0x8] sm:$0x3] %v6516_v1  ;;  %182 = vst [vmem:[#allocation2 + $0x30] sm:$0x3] %v6516_v1  ;;  %v6767_v3 = vld [vmem:[%s6997_s0] sm:$0xff]  ;;  %266 = vrot.lane.b32.xlu0 %v258_v2, %s6508_s24  ;;  %vm225_vm3 = vcmask 1040384  }
  0xc9   :  { %183 = vst [vmem:[#allocation2 + $0x38] sm:$0x3] %v6516_v1  ;;  %184 = vst.msk [vmem:[#allocation2 + $0x40] sm:$0x3] %vm180_vm0, %v6516_v1  ;;  %v226_v4 = vrot.slane %v6767_v3, 7  ;;  %vm211_vm4 = vcmask 523266  }
  0xca   :  { %185 = vst [vmem:[#allocation2 + $0x18] sm:$0xc0] %v6516_v1  ;;  %186 = vst [vmem:[#allocation2 + $0x20] sm:$0xc0] %v6516_v1  ;;  %v218_v5 = vld [vmem:[%s6997_s0 + $0x8] sm:$0x7f] }
  0xcb   :  { %189 = vst [vmem:[#allocation2 + $0x48] sm:$0xc0] %v6516_v1  ;;  %190 = vst [vmem:[#allocation2 + $0x50] sm:$0xc0] %v6516_v1  ;;  %v259_v6 = vld [vmem:[%s6997_s0 + $0x9] sm:$0x7f]  ;;  %232 = vrot.lane.b32.xlu1 %v226_v4, %s6508_s24 }
  0xcc   :  { %1220 = vst [vmem:[#allocation3] sm:$0x3] %v6516_v1  ;;  %1221 = vst [vmem:[#allocation3 + $0x8] sm:$0x3] %v6516_v1  ;;  %v227_v7 = vrot.slane %v218_v5, 7  ;;  %v6782_v8 = vld [vmem:[%s6997_s0 + $0x10] sm:$0xff]  ;;  %268 = vrot.lane.b32.xlu0 %v259_v6, %s6508_s24 }
  0xcd   :  { %1222 = vst [vmem:[#allocation3 + $0x20] sm:$0x3] %v6516_v1  ;;  %1223 = vst [vmem:[#allocation3 + $0x28] sm:$0x3] %v6516_v1  ;;  %v201_v9 = vrot.slane %v6767_v3, 6  ;;  %v204_v14 = vrot.slane %v6782_v8, 6 }
  0xce   :  { %1224 = vst [vmem:[#allocation3 + $0x10] sm:$0xc] %v6516_v1  ;;  %1225 = vst [vmem:[#allocation3 + $0x18] sm:$0xc] %v6516_v1  ;;  %v5550_v10 = vld [vmem:[#allocation4 + $0x204] ss:$16 sps:$4 sm:$0xff]   ;;  %v228_v11 = vsel %vm225_vm3, %v226_v4, %v227_v7 }
  0xcf   :  { %1226 = vst [vmem:[#allocation3 + $0x30] sm:$0xc] %v6516_v1  ;;  %1227 = vst [vmem:[#allocation3 + $0x38] sm:$0xc] %v6516_v1  ;;  %v5552_v12 = vld [vmem:[#allocation4 + $0x200] ss:$16 sps:$4 sm:$0xff]   ;;  %849 = vmatprep.subr.bf16.mxu1 %v5550_v10  ;;  %234 = vrot.lane.b32.xlu1 %v228_v11, %s6508_s24 }
  0xd0   :  { %188 = vst.msk [vmem:[#allocation2 + $0x28] sm:$0xc0] %vm187_vm1, %v6516_v1  ;;  %191 = vst.msk [vmem:[#allocation2 + $0x58] sm:$0xc0] %vm187_vm1, %v6516_v1  ;;  %v5553_v13 = vld [vmem:[#allocation4 + $0x224] ss:$16 sps:$4 sm:$0xff]   ;;  %850 = vmatpush1.bf16.msra.mxu1 %v5552_v12 }
  0xd1   :  { %254 = vst.msk [vmem:[#allocation2 + $0x8] sm:$0xff] %vm213_vm2, %v6767_v3  ;;  %256 = vst.msk [vmem:[#allocation2 + $0x38] sm:$0xff] %vm213_vm2, %v6782_v8  ;;  %v220_v15 = vld [vmem:[%s6997_s0 + $0x18] sm:$0x7f]  ;;  %v5555_v17 = vld [vmem:[#allocation4 + $0x220] ss:$16 sps:$4 sm:$0xff]   ;;  %851 = vmatprep.subr.bf16.mxu1 %v5553_v13 }
  0xd2   :  { %212 = vst.msk [vmem:[#allocation2] sm:$0xfc] %vm211_vm4, %v201_v9  ;;  %v260_v16 = vld [vmem:[%s6997_s0 + $0x11] sm:$0xff]  ;;  %vm288_vm5 = vcmask 521216   ;;  %215 = vst.msk [vmem:[#allocation2 + $0x30] sm:$0xfc] %vm211_vm4, %v204_v14 }
  0xd3   :  { %v261_v18 = vld [vmem:[%s6997_s0 + $0x19] sm:$0x7f]  ;;  %v5556_v19 = vld [vmem:[#allocation4 + $0x244] ss:$16 sps:$4 sm:$0xff]   ;;  %v229_v20 = vrot.slane %v6782_v8, 7  ;;  %v230_v21 = vrot.slane %v220_v15, 7  ;;  %270 = vrot.lane.b32.xlu0 %v260_v16, %s6508_s24 }
  0xd4   :  { %v283_v22 = vld [vmem:[%s6997_s0 + $0x2] sm:$0xff]  ;;  %v284_v23 = vld [vmem:[%s6997_s0 + $0xa] sm:$0x3f]  ;;  %852 = vmatpush1.bf16.msra.mxu1 %v5555_v17  ;;  %272 = vrot.lane.b32.xlu1 %v261_v18, %s6508_s24  ;;  %vm200_vm6 = vcmask 1041408   ;;  %v285_v12 = vld [vmem:[%s6997_s0 + $0x12] sm:$0xff]  ;;  %vm246_vm7 = vcmask 1048064  }
  0xd5   :  { %v5558_v24 = vld [vmem:[#allocation4 + $0x240] ss:$16 sps:$4 sm:$0xff]   ;;  %v5559_v25 = vld [vmem:[#allocation4 + $0x264] ss:$16 sps:$4 sm:$0xff]   ;;  %287 = vst.msk [vmem:[#allocation2 + $0x10] sm:$0xff] %vm213_vm2, %v283_v22  ;;  %853 = vmatprep.subr.bf16.mxu1 %v5556_v19  ;;  %v231_v28 = vsel %vm225_vm3, %v229_v20, %v230_v21  ;;  %v251_v4 = vld [vmem:[%s6997_s0 + $0x8] sm:$0xff] }
  0xd6   :  { %289 = vst.msk [vmem:[#allocation2 + $0x28] sm:$0x3f] %vm288_vm5, %v284_v23  ;;  %v5565_v26 = vld [vmem:[#allocation4 + $0x4] ss:$16 sps:$4 sm:$0xff]   ;;  %v5567_v27 = vld [vmem:[#allocation4] ss:$16 sps:$4 sm:$0xff]  }
  0xd7   :  { %796 = vmatprep.subr.bf16.mxu0 %v5565_v26  ;;  %236 = vrot.lane.b32.xlu0 %v229_v20, %s6508_s24  ;;  %v5571_v29 = vld [vmem:[#allocation4 + $0x24] ss:$16 sps:$4 sm:$0xff]   ;;  %v5573_v30 = vld [vmem:[#allocation4 + $0x20] ss:$16 sps:$4 sm:$0xff]   ;;  %v5564_v32 = vld [vmem:[#allocation4 + $0xc] ss:$16 sps:$4 sm:$0xff]  }
  0xd8   :  { %797 = vmatpush1.bf16.msra.mxu0 %v5567_v27  ;;  %854 = vmatpush1.bf16.msra.mxu1 %v5558_v24  ;;  %v5561_v31 = vld [vmem:[#allocation4 + $0x260] ss:$16 sps:$4 sm:$0xff]   ;;  %v5577_v35 = vld [vmem:[#allocation4 + $0x44] ss:$16 sps:$4 sm:$0xff]   ;;  %v5562_v38 = vld [vmem:[#allocation4 + $0x8] ss:$16 sps:$4 sm:$0xff]  }
  0xd9   :  { %238 = vrot.lane.b32.xlu1 %v231_v28, %s6508_s24  ;;  %855 = vmatprep.subr.bf16.mxu1 %v5559_v25  ;;  %v5579_v37 = vld [vmem:[#allocation4 + $0x40] ss:$16 sps:$4 sm:$0xff]   ;;  %v5570_v39 = vld [vmem:[#allocation4 + $0x2c] ss:$16 sps:$4 sm:$0xff]   ;;  %v5583_v40 = vld [vmem:[#allocation4 + $0x64] ss:$16 sps:$4 sm:$0xff]  }
  0xda   :  { %798 = vmatprep.subr.bf16.mxu0 %v5571_v29  ;;  %v5585_v41 = vld [vmem:[#allocation4 + $0x60] ss:$16 sps:$4 sm:$0xff]   ;;  %v5568_v42 = vld [vmem:[#allocation4 + $0x28] ss:$16 sps:$4 sm:$0xff]   ;;  %v5589_v43 = vld [vmem:[#allocation4 + $0x84] ss:$16 sps:$4 sm:$0xff]  }
  0xdb   :  { %v5576_v44 = vld [vmem:[#allocation4 + $0x4c] ss:$16 sps:$4 sm:$0xff]   ;;  %v5591_v45 = vld [vmem:[#allocation4 + $0x80] ss:$16 sps:$4 sm:$0xff]   ;;  %v5574_v46 = vld [vmem:[#allocation4 + $0x48] ss:$16 sps:$4 sm:$0xff]  }
  0xdc   :  { %v294_v33 = vld [vmem:[#allocation2 + $0x10] sm:$0xff]  ;;  %799 = vmatpush1.bf16.msra.mxu0 %v5573_v30  ;;  %856 = vmatpush1.bf16.msra.mxu1 %v5561_v31  ;;  %v5582_v48 = vld [vmem:[#allocation4 + $0x6c] ss:$16 sps:$4 sm:$0xff]   ;;  %v5580_v50 = vld [vmem:[#allocation4 + $0x68] ss:$16 sps:$4 sm:$0xff]   ;;  %255 = vst.msk [vmem:[#allocation2 + $0x20] sm:$0xff] %vm213_vm2, %v251_v4 }
  0xdd   :  { %v297_v34 = vld [vmem:[#allocation2 + $0x28] sm:$0xff]  ;;  %800 = vmatprep.subr.bf16.mxu0 %v5577_v35  ;;  %902 = vmatprep.subr.bf16.mxu1 %v5564_v32  ;;  %v5595_v47 = vld [vmem:[#allocation4 + $0xa4] ss:$16 sps:$4 sm:$0xff]   ;;  %v5597_v49 = vld [vmem:[#allocation4 + $0xa0] ss:$16 sps:$4 sm:$0xff]   ;;  %290 = vst.msk [vmem:[#allocation2 + $0x40] sm:$0xff] %vm213_vm2, %v285_v12 }
  0xde   :  { %v6821_v36 = vpack.c.bf16 %v297_v34, %v294_v33  ;;  %v5601_v51 = vld [vmem:[#allocation4 + $0xc4] ss:$16 sps:$4 sm:$0xff]   ;;  %v5588_v52 = vld [vmem:[#allocation4 + $0x8c] ss:$16 sps:$4 sm:$0xff]   ;;  %v5603_v53 = vld [vmem:[#allocation4 + $0xc0] ss:$16 sps:$4 sm:$0xff]  }
  0xdf   :  { %v5586_v54 = vld [vmem:[#allocation4 + $0x88] ss:$16 sps:$4 sm:$0xff]   ;;  %v5607_v55 = vld [vmem:[#allocation4 + $0xe4] ss:$16 sps:$4 sm:$0xff]   ;;  %v5594_v56 = vld [vmem:[#allocation4 + $0xac] ss:$16 sps:$4 sm:$0xff]  }
  0xe0   :  { %4962 = vmatmul.mubr.msk.bf16.vlgmr.msra.gmra.mrb[0].mxu1 %vm213_vm2, %v6821_v36  ;;  %801 = vmatpush1.bf16.msra.mxu0 %v5579_v37  ;;  %v5609_v57 = vld [vmem:[#allocation4 + $0xe0] ss:$16 sps:$4 sm:$0xff]   ;;  %v5592_v58 = vld [vmem:[#allocation4 + $0xa8] ss:$16 sps:$4 sm:$0xff]   ;;  %v5613_v59 = vld [vmem:[#allocation4 + $0x104] ss:$16 sps:$4 sm:$0xff]  }
  0xe1   :  { %903 = vmatpush1.bf16.msra.mxu1 %v5562_v38  ;;  %802 = vmatprep.subr.bf16.mxu0 %v5583_v40  ;;  %v5600_v60 = vld [vmem:[#allocation4 + $0xcc] ss:$16 sps:$4 sm:$0xff]   ;;  %v5615_v61 = vld [vmem:[#allocation4 + $0x100] ss:$16 sps:$4 sm:$0xff]   ;;  %v5598_v62 = vld [vmem:[#allocation4 + $0xc8] ss:$16 sps:$4 sm:$0xff]  }
  0xe2   :  { %904 = vmatprep.subr.bf16.mxu1 %v5570_v39  ;;  %891 = vmatprep.mubr.bf16.mxu1 %v6515_v0  ;;  %v5619_v63 = vld [vmem:[#allocation4 + $0x124] ss:$16 sps:$4 sm:$0xff]   ;;  %v5606_v2 = vld [vmem:[#allocation4 + $0xec] ss:$16 sps:$4 sm:$0xff]   ;;  %v5604_v5 = vld [vmem:[#allocation4 + $0xe8] ss:$16 sps:$4 sm:$0xff]  }
  0xe3   :  { %v5621_v6 = vld [vmem:[#allocation4 + $0x120] ss:$16 sps:$4 sm:$0xff]   ;;  %v5612_v7 = vld [vmem:[#allocation4 + $0x10c] ss:$16 sps:$4 sm:$0xff]   ;;  %v5625_v10 = vld [vmem:[#allocation4 + $0x144] ss:$16 sps:$4 sm:$0xff]  }
  0xe4   :  { %803 = vmatpush1.bf16.msra.mxu0 %v5585_v41  ;;  %v193_v11 = vld [vmem:[%s6997_s0 + $0x8] sm:$0x3f]  ;;  %v286_v13 = vld [vmem:[%s6997_s0 + $0x1a] sm:$0x3f]  ;;  %v5627_v16 = vld [vmem:[#allocation4 + $0x140] ss:$16 sps:$4 sm:$0xff]  }
  0xe5   :  { %905 = vmatpush1.bf16.msra.mxu1 %v5568_v42  ;;  %804 = vmatprep.subr.bf16.mxu0 %v5589_v43  ;;  %v202_v15 = vrot.slane %v193_v11, 6  ;;  %291 = vst.msk [vmem:[#allocation2 + $0x58] sm:$0x3f] %vm288_vm5, %v286_v13  ;;  %v5610_v17 = vld [vmem:[#allocation4 + $0x108] ss:$16 sps:$4 sm:$0xff]   ;;  %v300_v26 = vld [vmem:[#allocation2 + $0x40] sm:$0xff] }
  0xe6   :  { %906 = vmatprep.subr.bf16.mxu1 %v5576_v44  ;;  %v5631_v18 = vld [vmem:[#allocation4 + $0x164] ss:$16 sps:$4 sm:$0xff]   ;;  %v253_v20 = vld [vmem:[%s6997_s0 + $0x18] sm:$0xff]  ;;  %v5633_v23 = vld [vmem:[#allocation4 + $0x160] ss:$16 sps:$4 sm:$0xff]   ;;  %vm244_vm8 = vcmask 1048065  }
  0xe7   :  { %v203_v19 = vsel %vm200_vm6, %v201_v9, %v202_v15  ;;  %v5618_v21 = vld [vmem:[#allocation4 + $0x12c] ss:$16 sps:$4 sm:$0xff]   ;;  %257 = vst.msk [vmem:[#allocation2 + $0x50] sm:$0xff] %vm213_vm2, %v253_v20  ;;  %v5616_v22 = vld [vmem:[#allocation4 + $0x128] ss:$16 sps:$4 sm:$0xff]   ;;  %vm279_vm9 = vcmask 1047040  }
  0xe8   :  { %805 = vmatpush1.bf16.msra.mxu0 %v5591_v45  ;;  %214 = vst.msk [vmem:[#allocation2 + $0x18] sm:$0xff] %vm213_vm2, %v203_v19  ;;  %v195_v24 = vld [vmem:[%s6997_s0 + $0x18] sm:$0x3f]  ;;  %v5637_v3 = vld [vmem:[#allocation4 + $0x184] ss:$16 sps:$4 sm:$0xff]   ;;  %vm1390_vm10 = vcmask 1046528  }
  0xe9   :  { %907 = vmatpush1.bf16.msra.mxu1 %v5574_v46  ;;  %806 = vmatprep.subr.bf16.mxu0 %v5595_v47  ;;  %v205_v9 = vrot.slane %v195_v24, 6  ;;  %v5624_v25 = vld [vmem:[#allocation4 + $0x14c] ss:$16 sps:$4 sm:$0xff]   ;;  %v5639_v30 = vld [vmem:[#allocation4 + $0x180] ss:$16 sps:$4 sm:$0xff]   ;;  %vm2302_vm11 = vcmask 1045504  }
  0xea   :  { %908 = vmatprep.subr.bf16.mxu1 %v5582_v48  ;;  %v5622_v31 = vld [vmem:[#allocation4 + $0x148] ss:$16 sps:$4 sm:$0xff]   ;;  %v5643_v32 = vld [vmem:[#allocation4 + $0x1a4] ss:$16 sps:$4 sm:$0xff]   ;;  %v5630_v33 = vld [vmem:[#allocation4 + $0x16c] ss:$16 sps:$4 sm:$0xff]  }
  0xeb   :  { %v206_v29 = vsel %vm200_vm6, %v204_v14, %v205_v9  ;;  %v5645_v34 = vld [vmem:[#allocation4 + $0x1a0] ss:$16 sps:$4 sm:$0xff]   ;;  %v5628_v35 = vld [vmem:[#allocation4 + $0x168] ss:$16 sps:$4 sm:$0xff]   ;;  %v5649_v37 = vld [vmem:[#allocation4 + $0x1c4] ss:$16 sps:$4 sm:$0xff]  }
  0xec   :  { %807 = vmatpush1.bf16.msra.mxu0 %v5597_v49  ;;  %v303_v27 = vld [vmem:[#allocation2 + $0x58] sm:$0xff]  ;;  %216 = vst.msk [vmem:[#allocation2 + $0x48] sm:$0xff] %vm213_vm2, %v206_v29  ;;  %v5651_v8 = vld [vmem:[#allocation4 + $0x1c0] ss:$16 sps:$4 sm:$0xff]   ;;  %v5655_v39 = vld [vmem:[#allocation4 + $0x1e4] ss:$16 sps:$4 sm:$0xff]  }
  0xed   :  { %909 = vmatpush1.bf16.msra.mxu1 %v5580_v50  ;;  %808 = vmatprep.subr.bf16.mxu0 %v5601_v51  ;;  %v6852_v28 = vpack.c.bf16 %v303_v27, %v300_v26  ;;  %v5636_v38 = vld [vmem:[#allocation4 + $0x18c] ss:$16 sps:$4 sm:$0xff]   ;;  %v5634_v14 = vld [vmem:[#allocation4 + $0x188] ss:$16 sps:$4 sm:$0xff]   ;;  %v5657_v41 = vld [vmem:[#allocation4 + $0x1e0] ss:$16 sps:$4 sm:$0xff]  }
  0xee   :  { %910 = vmatprep.subr.bf16.mxu1 %v5588_v52  ;;  %v5642_v40 = vld [vmem:[#allocation4 + $0x1ac] ss:$16 sps:$4 sm:$0xff]   ;;  %v5640_v42 = vld [vmem:[#allocation4 + $0x1a8] ss:$16 sps:$4 sm:$0xff]   ;;  %v5673_v19 = vld [vmem:[#allocation10 + $0x208] ss:$16 sps:$4 sm:$0xff]  }
  0xef   :  { %4963 = vmatmul.mubr.msk.bf16.gmra.mrb[4].mxu1 %vm213_vm2, %v6852_v28  ;;  %v5648_v43 = vld [vmem:[#allocation4 + $0x1cc] ss:$16 sps:$4 sm:$0xff]   ;;  %v5646_v44 = vld [vmem:[#allocation4 + $0x1c8] ss:$16 sps:$4 sm:$0xff]   ;;  %v5675_v20 = vld [vmem:[#allocation10 + $0x20c] ss:$16 sps:$4 sm:$0xff]  }
  0xf0   :  { %809 = vmatpush1.bf16.msra.mxu0 %v5603_v53  ;;  %v5654_v45 = vld [vmem:[#allocation4 + $0x1ec] ss:$16 sps:$4 sm:$0xff]   ;;  %v5652_v46 = vld [vmem:[#allocation4 + $0x1e8] ss:$16 sps:$4 sm:$0xff]   ;;  %v5679_v24 = vld [vmem:[#allocation10 + $0x228] ss:$16 sps:$4 sm:$0xff]  }
  0xf1   :  { %911 = vmatpush1.bf16.msra.mxu1 %v5586_v54  ;;  %810 = vmatprep.subr.bf16.mxu0 %v5607_v55  ;;  %v5660_v47 = vld [vmem:[#allocation4 + $0x20c] ss:$16 sps:$4 sm:$0xff]   ;;  %v5687_v9 = vld [vmem:[#allocation10 + $0x24c] ss:$16 sps:$4 sm:$0xff]   ;;  %v5688_v27 = vld [vmem:[#allocation10 + $0x260] ss:$16 sps:$4 sm:$0xff]  }
  0xf2   :  { %912 = vmatprep.subr.bf16.mxu1 %v5594_v56  ;;  %v5669_v12 = vld [vmem:[#allocation4 + $0x26c] ss:$16 sps:$4 sm:$0xff]   ;;  %v5693_v26 = vld [vmem:[#allocation10 + $0x26c] ss:$16 sps:$4 sm:$0xff]   ;;  %vm2816_vm12 = vcmask 1044480   ;;  %vm3330_vm13 = vcmask 1043456  }
  0xf3   :  { %v5696_v29 = vld [vmem:[#allocation10 + $0x284] ss:$16 sps:$4 sm:$0xff]   ;;  %vm6520_vm14 = vmmov 0   ;;  %s6521_s0 = smov [#allocation22]  }
  0xf4   :  { %811 = vmatpush1.bf16.msra.mxu0 %v5609_v57  ;;  %v5658_v57 = vld [vmem:[#allocation4 + $0x208] ss:$16 sps:$4 sm:$0xff]   ;;  %s4868_s27 = sshll.u32 %s6521_s0, 4  ;;  %s4869_s27 = int_to_ptr.vmem [resolvable:$true] %s4868_s27 }
  0xf5   :  { %913 = vmatpush1.bf16.msra.mxu1 %v5592_v58  ;;  %812 = vmatprep.subr.bf16.mxu0 %v5613_v59  ;;  %s6464_s21 = scalar_lea.vmem %s4869_s27, 32  ;;  %p6469_p5 = scmp.lt.s32.totalorder %s4869_s27, %s4869_s27 }
  0xf6   :  { %914 = vmatprep.subr.bf16.mxu1 %v5600_v60  ;;  %v5663_v60 = vld [vmem:[#allocation4 + $0x22c] ss:$16 sps:$4 sm:$0xff]   ;;  %p6465_p4 = scmp.ne.s32.totalorder %s4869_s27, %s6464_s21  ;;  %p6470_p6 = scmp.lt.s32.totalorder %s6464_s21, %s6464_s21 }
  0xf8   :  { %813 = vmatpush1.bf16.msra.mxu0 %v5615_v61  ;;  %p6471_p7 = por %p6470_p6, %p6469_p5 }
  0xf9   :  { %915 = vmatpush1.bf16.msra.mxu1 %v5598_v62  ;;  %814 = vmatprep.subr.bf16.mxu0 %v5619_v63 }
  0xfa   :  { %916 = vmatprep.subr.bf16.mxu1 %v5606_v2  ;;  %v5661_v2 = vld [vmem:[#allocation4 + $0x228] ss:$16 sps:$4 sm:$0xff]   ;;  %p6472_p8 = pnand %p6471_p7, %p6465_p4 }
  0xfc   :  { %815 = vmatpush1.bf16.msra.mxu0 %v5621_v6 }
  0xfd   :  { %917 = vmatpush1.bf16.msra.mxu1 %v5604_v5  ;;  %816 = vmatprep.subr.bf16.mxu0 %v5625_v10  ;;  %v5666_v5 = vld [vmem:[#allocation4 + $0x24c] ss:$16 sps:$4 sm:$0xff]   ;;  %v5664_v10 = vld [vmem:[#allocation4 + $0x248] ss:$16 sps:$4 sm:$0xff]  }
  0xfe   :  { %918 = vmatprep.subr.bf16.mxu1 %v5612_v7 }
 0x100   :  { %817 = vmatpush1.bf16.msra.mxu0 %v5627_v16  ;;  %v5667_v16 = vld [vmem:[#allocation4 + $0x268] ss:$16 sps:$4 sm:$0xff]  }
 0x101   :  { %919 = vmatpush1.bf16.msra.mxu1 %v5610_v17  ;;  %818 = vmatprep.subr.bf16.mxu0 %v5631_v18  ;;  %v5670_v17 = vld [vmem:[#allocation10 + $0x200] ss:$16 sps:$4 sm:$0xff]   ;;  %v5672_v18 = vld [vmem:[#allocation10 + $0x204] ss:$16 sps:$4 sm:$0xff]  }
 0x102   :  { %920 = vmatprep.subr.bf16.mxu1 %v5618_v21  ;;  %v5678_v21 = vld [vmem:[#allocation10 + $0x224] ss:$16 sps:$4 sm:$0xff]  }
 0x104   :  { %819 = vmatpush1.bf16.msra.mxu0 %v5633_v23  ;;  %v5676_v23 = vld [vmem:[#allocation10 + $0x220] ss:$16 sps:$4 sm:$0xff]  }
 0x105   :  { %921 = vmatpush1.bf16.msra.mxu1 %v5616_v22  ;;  %820 = vmatprep.subr.bf16.mxu0 %v5637_v3  ;;  %v5681_v22 = vld [vmem:[#allocation10 + $0x22c] ss:$16 sps:$4 sm:$0xff]   ;;  %v5684_v3 = vld [vmem:[#allocation10 + $0x244] ss:$16 sps:$4 sm:$0xff]  }
 0x106   :  { %922 = vmatprep.subr.bf16.mxu1 %v5624_v25  ;;  %v5682_v25 = vld [vmem:[#allocation10 + $0x240] ss:$16 sps:$4 sm:$0xff]  }
 0x108   :  { %821 = vmatpush1.bf16.msra.mxu0 %v5639_v30  ;;  %v5699_v30 = vld [vmem:[#allocation10 + $0x28c] ss:$16 sps:$4 sm:$0xff]  }
 0x109   :  { %923 = vmatpush1.bf16.msra.mxu1 %v5622_v31  ;;  %822 = vmatprep.subr.bf16.mxu0 %v5643_v32  ;;  %v5694_v31 = vld [vmem:[#allocation10 + $0x280] ss:$16 sps:$4 sm:$0xff]   ;;  %v5697_v32 = vld [vmem:[#allocation10 + $0x288] ss:$16 sps:$4 sm:$0xff]  }
 0x10a   :  { %924 = vmatprep.subr.bf16.mxu1 %v5630_v33 }
 0x10c   :  { %823 = vmatpush1.bf16.msra.mxu0 %v5645_v34  ;;  %v5702_v34 = vld [vmem:[#allocation10 + $0x2a4] ss:$16 sps:$4 sm:$0xff]  }
 0x10d   :  { %925 = vmatpush1.bf16.msra.mxu1 %v5628_v35  ;;  %824 = vmatprep.subr.bf16.mxu0 %v5649_v37  ;;  %v5705_v35 = vld [vmem:[#allocation10 + $0x2ac] ss:$16 sps:$4 sm:$0xff]  }
 0x10e   :  { %926 = vmatprep.subr.bf16.mxu1 %v5636_v38  ;;  %v5700_v38 = vld [vmem:[#allocation10 + $0x2a0] ss:$16 sps:$4 sm:$0xff]  }
 0x110   :  { %825 = vmatpush1.bf16.msra.mxu0 %v5651_v8  ;;  %v5703_v8 = vld [vmem:[#allocation10 + $0x2a8] ss:$16 sps:$4 sm:$0xff]  }
 0x111   :  { %927 = vmatpush1.bf16.msra.mxu1 %v5634_v14  ;;  %826 = vmatprep.subr.bf16.mxu0 %v5655_v39 }
 0x112   :  { %928 = vmatprep.subr.bf16.mxu1 %v5642_v40  ;;  %v5708_v40 = vld [vmem:[#allocation10 + $0x2c4] ss:$16 sps:$4 sm:$0xff]  }
 0x114   :  { %827 = vmatpush1.bf16.msra.mxu0 %v5657_v41  ;;  %v5711_v41 = vld [vmem:[#allocation10 + $0x2cc] ss:$16 sps:$4 sm:$0xff]  }
 0x115   :  { %929 = vmatpush1.bf16.msra.mxu1 %v5640_v42  ;;  %1794 = vmatprep.subr.bf16.mxu0 %v5672_v18  ;;  %v5706_v42 = vld [vmem:[#allocation10 + $0x2c0] ss:$16 sps:$4 sm:$0xff]   ;;  %v5762_v18 = vld [vmem:[#allocation10 + $0x3e4] ss:$16 sps:$4 sm:$0xff]  }
 0x116   :  { %930 = vmatprep.subr.bf16.mxu1 %v5648_v43  ;;  %v5709_v43 = vld [vmem:[#allocation10 + $0x2c8] ss:$16 sps:$4 sm:$0xff]  }
 0x119   :  { %931 = vmatpush1.bf16.msra.mxu1 %v5646_v44  ;;  %v5714_v44 = vld [vmem:[#allocation10 + $0x2e4] ss:$16 sps:$4 sm:$0xff]  }
 0x11a   :  { %932 = vmatprep.subr.bf16.mxu1 %v5654_v45  ;;  %v5717_v45 = vld [vmem:[#allocation10 + $0x2ec] ss:$16 sps:$4 sm:$0xff]  }
 0x11d   :  { %933 = vmatpush1.bf16.msra.mxu1 %v5652_v46  ;;  %v5712_v46 = vld [vmem:[#allocation10 + $0x2e0] ss:$16 sps:$4 sm:$0xff]  }
 0x11e   :  { %955 = vmatprep.subr.bf16.mxu1 %v5660_v47  ;;  %v5715_v47 = vld [vmem:[#allocation10 + $0x2e8] ss:$16 sps:$4 sm:$0xff]  }
 0x13a   :  { %v267_v48 = vpop.permute.xlu0 %266 }
 0x13b   :  { %278 = vst.msk [vmem:[#allocation2 + $0x8] sm:$0xff] %vm246_vm7, %v267_v48  ;;  %v5720_v48 = vld [vmem:[#allocation10 + $0x304] ss:$16 sps:$4 sm:$0xff]  }
 0x13d   :  { %v233_v49 = vpop.permute.xlu1 %232 }
 0x13e   :  { %245 = vst.msk [vmem:[#allocation2] sm:$0xfe] %vm244_vm8, %v233_v49  ;;  %v269_v50 = vpop.permute.xlu0 %268  ;;  %v5723_v49 = vld [vmem:[#allocation10 + $0x30c] ss:$16 sps:$4 sm:$0xff]  }
 0x13f   :  { %280 = vst.msk [vmem:[#allocation2 + $0x20] sm:$0x7f] %vm279_vm9, %v269_v50  ;;  %v5718_v50 = vld [vmem:[#allocation10 + $0x300] ss:$16 sps:$4 sm:$0xff]  }
 0x141   :  { %v235_v51 = vpop.permute.xlu1 %234 }
 0x142   :  { %247 = vst.msk [vmem:[#allocation2 + $0x18] sm:$0xff] %vm246_vm7, %v235_v51  ;;  %v293_v54 = vld [vmem:[#allocation2 + $0x8] sm:$0xff]  ;;  %v5721_v51 = vld [vmem:[#allocation10 + $0x308] ss:$16 sps:$4 sm:$0xff]  }
 0x145   :  { %v271_v52 = vpop.permute.xlu0 %270  ;;  %v292_v58 = vld [vmem:[#allocation2] sm:$0xff] }
 0x146   :  { %281 = vst.msk [vmem:[#allocation2 + $0x38] sm:$0xff] %vm246_vm7, %v271_v52  ;;  %v273_v53 = vpop.permute.xlu1 %272  ;;  %v296_v56 = vld [vmem:[#allocation2 + $0x20] sm:$0xff]  ;;  %v5726_v52 = vld [vmem:[#allocation10 + $0x324] ss:$16 sps:$4 sm:$0xff]  }
 0x147   :  { %282 = vst.msk [vmem:[#allocation2 + $0x50] sm:$0x7f] %vm279_vm9, %v273_v53  ;;  %v305_v59 = vpack.c.bf16 %v296_v56, %v293_v54  ;;  %v5729_v53 = vld [vmem:[#allocation10 + $0x32c] ss:$16 sps:$4 sm:$0xff]   ;;  %v5724_v54 = vld [vmem:[#allocation10 + $0x320] ss:$16 sps:$4 sm:$0xff]  }
 0x148   :  { %v5732_v56 = vld [vmem:[#allocation10 + $0x344] ss:$16 sps:$4 sm:$0xff]  }
 0x149   :  { %v237_v55 = vpop.permute.xlu0 %236  ;;  %v295_v62 = vld [vmem:[#allocation2 + $0x18] sm:$0xff]  ;;  %828 = vmatprep.mubr.bf16.mxu0 %v305_v59  ;;  %934 = vmatprep.mubr.bf16.mxu1 %v305_v59  ;;  %v5733_v59 = vld [vmem:[#allocation10 + $0x348] ss:$16 sps:$4 sm:$0xff]  }
 0x14a   :  { %248 = vst.msk [vmem:[#allocation2 + $0x30] sm:$0xfe] %vm244_vm8, %v237_v55  ;;  %v304_v63 = vpack.c.bf16 %v295_v62, %v292_v58  ;;  %v5727_v55 = vld [vmem:[#allocation10 + $0x328] ss:$16 sps:$4 sm:$0xff]   ;;  %v5730_v58 = vld [vmem:[#allocation10 + $0x340] ss:$16 sps:$4 sm:$0xff]  }
 0x14b   :  { %v239_v61 = vpop.permute.xlu1 %238  ;;  %v5736_v62 = vld [vmem:[#allocation10 + $0x360] ss:$16 sps:$4 sm:$0xff]  }
 0x14c   :  { %249 = vst.msk [vmem:[#allocation2 + $0x48] sm:$0xff] %vm246_vm7, %v239_v61  ;;  %829 = vmatmul.mubr.bf16.vlgmr.msra.gmra.mrb[0].mxu0 %v304_v63  ;;  %935 = vmatmul.mubr.bf16.vlgmr.msra.gmra.mrb[8].mxu1 %v304_v63  ;;  %v5741_v61 = vld [vmem:[#allocation10 + $0x36c] ss:$16 sps:$4 sm:$0xff]   ;;  %v5739_v63 = vld [vmem:[#allocation10 + $0x368] ss:$16 sps:$4 sm:$0xff]  }
 0x14d   :  { %v299_v4 = vld [vmem:[#allocation2 + $0x38] sm:$0xff]  ;;  %956 = vmatpush1.bf16.msra.mxu1 %v5658_v57  ;;  %1795 = vmatpush1.bf16.msra.mxu0 %v5670_v17  ;;  %v5735_v57 = vld [vmem:[#allocation10 + $0x34c] ss:$16 sps:$4 sm:$0xff]   ;;  %v5757_v17 = vld [vmem:[#allocation10 + $0x3c8] ss:$16 sps:$4 sm:$0xff]  }
 0x14e   :  { %v302_v6 = vld [vmem:[#allocation2 + $0x50] sm:$0xff]  ;;  %957 = vmatprep.subr.bf16.mxu1 %v5663_v60  ;;  %1796 = vmatprep.subr.bf16.mxu0 %v5678_v21  ;;  %v5738_v60 = vld [vmem:[#allocation10 + $0x364] ss:$16 sps:$4 sm:$0xff]  }
 0x14f   :  { %v308_v7 = vpack.c.bf16 %v302_v6, %v299_v4  ;;  %v5747_v4 = vld [vmem:[#allocation10 + $0x38c] ss:$16 sps:$4 sm:$0xff]   ;;  %v5745_v6 = vld [vmem:[#allocation10 + $0x388] ss:$16 sps:$4 sm:$0xff]  }
 0x151   :  { %v298_v11 = vld [vmem:[#allocation2 + $0x30] sm:$0xff]  ;;  %838 = vmatprep.mubr.bf16.mxu0 %v308_v7  ;;  %944 = vmatprep.mubr.bf16.mxu1 %v308_v7  ;;  %v5750_v7 = vld [vmem:[#allocation10 + $0x3a4] ss:$16 sps:$4 sm:$0xff]  }
 0x152   :  { %958 = vmatpush1.bf16.msra.mxu1 %v5661_v2  ;;  %1797 = vmatpush1.bf16.msra.mxu0 %v5676_v23  ;;  %v5744_v2 = vld [vmem:[#allocation10 + $0x384] ss:$16 sps:$4 sm:$0xff]   ;;  %v5760_v23 = vld [vmem:[#allocation10 + $0x3e0] ss:$16 sps:$4 sm:$0xff]  }
 0x153   :  { %v301_v13 = vld [vmem:[#allocation2 + $0x48] sm:$0xff]  ;;  %959 = vmatprep.subr.bf16.mxu1 %v5666_v5  ;;  %1798 = vmatprep.subr.bf16.mxu0 %v5684_v3 }
 0x154   :  { %v307_v15 = vpack.c.bf16 %v301_v13, %v298_v11  ;;  %v5742_v5 = vld [vmem:[#allocation10 + $0x380] ss:$16 sps:$4 sm:$0xff]   ;;  %v5756_v13 = vld [vmem:[#allocation10 + $0x3c4] ss:$16 sps:$4 sm:$0xff]  }
 0x155   :  { %v5748_v11 = vld [vmem:[#allocation10 + $0x3a0] ss:$16 sps:$4 sm:$0xff]  }
 0x156   :  { %839 = vmatmul.mubr.bf16.gmra.mrb[4].mxu0 %v307_v15  ;;  %945 = vmatmul.mubr.bf16.gmra.mrb[12].mxu1 %v307_v15  ;;  %v5759_v15 = vld [vmem:[#allocation10 + $0x3cc] ss:$16 sps:$4 sm:$0xff]  }
 0x157   :  { %960 = vmatpush1.bf16.msra.mxu1 %v5664_v10  ;;  %987 = vmatprep.mubr.bf16.mxu1 %v6515_v0  ;;  %v5753_v10 = vld [vmem:[#allocation10 + $0x3ac] ss:$16 sps:$4 sm:$0xff]  }
 0x158   :  { %961 = vmatprep.subr.bf16.mxu1 %v5669_v12  ;;  %1799 = vmatpush1.bf16.msra.mxu0 %v5682_v25  ;;  %v5751_v12 = vld [vmem:[#allocation10 + $0x3a8] ss:$16 sps:$4 sm:$0xff]   ;;  %v5771_v25 = vld [vmem:[#allocation10 + $0xc] ss:$16 sps:$4 sm:$0xff]  }
 0x15b   :  { %962 = vmatpush1.bf16.msra.mxu1 %v5667_v16  ;;  %v5754_v16 = vld [vmem:[#allocation10 + $0x3c0] ss:$16 sps:$4 sm:$0xff]  }
 0x15c   :  { %1837 = vmatprep.subr.bf16.mxu1 %v5675_v20 }
 0x15e   :  { %4964 = vmatmul.mubr.msk.bf16.vlgmr.msra.gmra.mrb[8].mxu1 %vm213_vm2, %v6821_v36  ;;  %v5685_v36 = vld [vmem:[#allocation10 + $0x248] ss:$16 sps:$4 sm:$0xff]  }
 0x15f   :  { %997 = vmatprep.mubr.bf16.mxu1 %v6515_v0  ;;  %1838 = vmatpush1.bf16.msra.mxu1 %v5673_v19  ;;  %v5690_v0 = vld [vmem:[#allocation10 + $0x264] ss:$16 sps:$4 sm:$0xff]   ;;  %v5765_v19 = vld [vmem:[#allocation10 + $0x3ec] ss:$16 sps:$4 sm:$0xff]  }
 0x160   :  { %1839 = vmatprep.subr.bf16.mxu1 %v5681_v22  ;;  %1800 = vmatprep.subr.bf16.mxu0 %v5690_v0 }
 0x161   :  { %1801 = vmatpush1.bf16.msra.mxu0 %v5688_v27 }
 0x162   :  { %1802 = vmatprep.subr.bf16.mxu0 %v5696_v29 }
 0x163   :  { %1840 = vmatpush1.bf16.msra.mxu1 %v5679_v24  ;;  %v5763_v24 = vld [vmem:[#allocation10 + $0x3e8] ss:$16 sps:$4 sm:$0xff]  }
 0x164   :  { %1841 = vmatprep.subr.bf16.mxu1 %v5687_v9  ;;  %v5768_v9 = vld [vmem:[#allocation10 + $0x4] ss:$16 sps:$4 sm:$0xff]  }
 0x165   :  { %1803 = vmatpush1.bf16.msra.mxu0 %v5694_v31 }
 0x166   :  { %4965 = vmatmul.mubr.msk.bf16.gmra.mrb[12].mxu1 %vm213_vm2, %v6852_v28  ;;  %v5691_v28 = vld [vmem:[#allocation10 + $0x268] ss:$16 sps:$4 sm:$0xff]   ;;  %1804 = vmatprep.subr.bf16.mxu0 %v5702_v34 }
 0x167   :  { %1842 = vmatpush1.bf16.msra.mxu1 %v5685_v36  ;;  %v1010_v36 = vlaneseq }
 0x168   :  { %1843 = vmatprep.subr.bf16.mxu1 %v5693_v26 }
 0x169   :  { %1805 = vmatpush1.bf16.msra.mxu0 %v5700_v38  ;;  %v6880_v26 = vshrl.u32 %v1010_v36, 7  ;;  %v1008_v38 = vld [vmem:[#allocation7] sm:$0xf] }
 0x16a   :  { %1806 = vmatprep.subr.bf16.mxu0 %v5708_v40 }
 0x16b   :  { %1844 = vmatpush1.bf16.msra.mxu1 %v5691_v28  ;;  %v6886_v34 = vsub.s32 0, %v6880_v26 }
 0x16c   :  { %1845 = vmatprep.subr.bf16.mxu1 %v5699_v30 }
 0x16d   :  { %1807 = vmatpush1.bf16.msra.mxu0 %v5706_v42  ;;  %v1013_v40 = vrot.slane %v1008_v38, %v6886_v34 }
 0x16e   :  { %1808 = vmatprep.subr.bf16.mxu0 %v5714_v44 }
 0x16f   :  { %1846 = vmatpush1.bf16.msra.mxu1 %v5697_v32 }
 0x170   :  { %1847 = vmatprep.subr.bf16.mxu1 %v5705_v35 }
 0x171   :  { %1809 = vmatpush1.bf16.msra.mxu0 %v5712_v46 }
 0x172   :  { %1810 = vmatprep.subr.bf16.mxu0 %v5720_v48 }
 0x173   :  { %1848 = vmatpush1.bf16.msra.mxu1 %v5703_v8  ;;  %v6890_v8 = vsub.s32 1, %v6880_v26 }
 0x174   :  { %1849 = vmatprep.subr.bf16.mxu1 %v5711_v41 }
 0x175   :  { %1811 = vmatpush1.bf16.msra.mxu0 %v5718_v50 }
 0x176   :  { %1812 = vmatprep.subr.bf16.mxu0 %v5726_v52 }
 0x177   :  { %1850 = vmatpush1.bf16.msra.mxu1 %v5709_v43 }
 0x178   :  { %1851 = vmatprep.subr.bf16.mxu1 %v5717_v45  ;;  %v1017_v45 = vrot.slane %v1008_v38, %v6890_v8 }
 0x179   :  { %1813 = vmatpush1.bf16.msra.mxu0 %v5724_v54 }
 0x17a   :  { %1814 = vmatprep.subr.bf16.mxu0 %v5732_v56 }
 0x17b   :  { %1852 = vmatpush1.bf16.msra.mxu1 %v5715_v47 }
 0x17c   :  { %1853 = vmatprep.subr.bf16.mxu1 %v5723_v49 }
 0x17d   :  { %1815 = vmatpush1.bf16.msra.mxu0 %v5730_v58 }
 0x17e   :  { %1816 = vmatprep.subr.bf16.mxu0 %v5738_v60 }
 0x17f   :  { %1854 = vmatpush1.bf16.msra.mxu1 %v5721_v51 }
 0x180   :  { %1855 = vmatprep.subr.bf16.mxu1 %v5729_v53 }
 0x181   :  { %1817 = vmatpush1.bf16.msra.mxu0 %v5736_v62 }
 0x182   :  { %1818 = vmatprep.subr.bf16.mxu0 %v5744_v2 }
 0x183   :  { %1856 = vmatpush1.bf16.msra.mxu1 %v5727_v55 }
 0x184   :  { %1857 = vmatprep.subr.bf16.mxu1 %v5735_v57 }
 0x185   :  { %1819 = vmatpush1.bf16.msra.mxu0 %v5742_v5 }
 0x186   :  { %1820 = vmatprep.subr.bf16.mxu0 %v5750_v7 }
 0x187   :  { %1858 = vmatpush1.bf16.msra.mxu1 %v5733_v59 }
 0x188   :  { %1859 = vmatprep.subr.bf16.mxu1 %v5741_v61 }
 0x189   :  { %1821 = vmatpush1.bf16.msra.mxu0 %v5748_v11 }
 0x18a   :  { %1822 = vmatprep.subr.bf16.mxu0 %v5756_v13 }
 0x18b   :  { %1860 = vmatpush1.bf16.msra.mxu1 %v5739_v63 }
 0x18c   :  { %1861 = vmatprep.subr.bf16.mxu1 %v5747_v4 }
 0x18d   :  { %1823 = vmatpush1.bf16.msra.mxu0 %v5754_v16 }
 0x18e   :  { %1824 = vmatprep.subr.bf16.mxu0 %v5762_v18 }
 0x18f   :  { %1862 = vmatpush1.bf16.msra.mxu1 %v5745_v6 }
 0x190   :  { %1863 = vmatprep.subr.bf16.mxu1 %v5753_v10 }
 0x191   :  { %1825 = vmatpush1.bf16.msra.mxu0 %v5760_v23 }
 0x192   :  { %2200 = vmatprep.subr.bf16.mxu0 %v5768_v9 }
 0x193   :  { %1864 = vmatpush1.bf16.msra.mxu1 %v5751_v12 }
 0x194   :  { %1865 = vmatprep.subr.bf16.mxu1 %v5759_v15 }
 0x197   :  { %1866 = vmatpush1.bf16.msra.mxu1 %v5757_v17  ;;  %v6518_v17 = vmov 1983009808  }
 0x198   :  { %1867 = vmatprep.subr.bf16.mxu1 %v5765_v19  ;;  %v1239_v18 = vunpack.c.l.s4 %v6518_v17 }
 0x19b   :  { %1868 = vmatpush1.bf16.msra.mxu1 %v5763_v24 }
 0x19c   :  { %2243 = vmatprep.subr.bf16.mxu1 %v5771_v25 }
 0x1b3   :  { %v6872_v33 = vpop.f32.mrb[0].mxu1 }
 0x1b4   :  { %v6874_v37 = vpop.f32.mrb[1].mxu1 }
 0x1b5   :  { %v6876_v14 = vpop.f32.mrb[2].mxu1 }
 0x1b6   :  { %v6878_v39 = vpop.f32.mrb[3].mxu1 }
 0x1c2   :  { %v893_v20 = vpop.f32.mrb[4].mxu1 }
 0x1c3   :  { %v895_v21 = vpop.f32.mrb[5].mxu1 }
 0x1c4   :  { %v897_v22 = vpop.f32.mrb[6].mxu1 }
 0x1c5   :  { %v899_v3 = vpop.f32.mrb[7].mxu1 }
 0x21f   :  { %v830_v0 = vpop.f32.mrb[0].mxu0 }
 0x220   :  { %v884_v27 = vadd.f32 %v6872_v33, %v830_v0  ;;  %v832_v28 = vpop.f32.mrb[1].mxu0  ;;  %v1046_v33 = vld [vmem:[#allocation9] sm:$0xf] }
 0x221   :  { %v886_v29 = vadd.f32 %v6874_v37, %v832_v28  ;;  %v834_v30 = vpop.f32.mrb[2].mxu0  ;;  %v6894_v37 = vsub.s32 2, %v6880_v26  ;;  %v1051_v51 = vrot.slane %v1046_v33, %v6886_v34  ;;  %v1055_v53 = vrot.slane %v1046_v33, %v6890_v8 }
 0x222   :  { %v888_v31 = vadd.f32 %v6876_v14, %v834_v30  ;;  %v836_v32 = vpop.f32.mrb[3].mxu0  ;;  %v6517_v14 = vmov 1966171168   ;;  %v1030_v50 = vmul.f32 %v1013_v40, %v884_v27 }
 0x223   :  { %v890_v35 = vadd.f32 %v6878_v39, %v836_v32  ;;  %v1133_v44 = vunpack.c.l.s4 %v6517_v14  ;;  %v6898_v39 = vsub.s32 3, %v6880_v26  ;;  %v1021_v54 = vrot.slane %v1008_v38, %v6894_v37 }
 0x224   :  { %v1031_v56 = vmul.f32 %v1017_v45, %v886_v29  ;;  %v1034_v57 = vmul.f32 %v1013_v40, %v888_v31  ;;  %v1059_v59 = vrot.slane %v1046_v33, %v6894_v37  ;;  %v1068_v60 = vadd.f32 %v1051_v51, %v1030_v50 }
 0x225   :  { %v1134_v55 = vunpack.c.0.s8 %v1133_v44  ;;  %v6904_v58 = vrot.slane %v1008_v38, %v6898_v39  ;;  %v1035_v61 = vmul.f32 %v1017_v45, %v890_v35  ;;  %v6908_v63 = vrot.slane %v1046_v33, %v6898_v39 }
 0x226   :  { %v1069_v10 = vadd.f32 %v1055_v53, %v1031_v56  ;;  %v1072_v11 = vadd.f32 %v1051_v51, %v1034_v57 }
 0x227   :  { %v6911_v7 = vsub.s32 %v1134_v55, %v6880_v26 }
 0x228   :  { %v1085_v0 = vmax.f32 %v1069_v10, 0.0  ;;  %v1088_v27 = vmax.f32 %v1072_v11, 0.0 }
 0x229   :  { %v840_v41 = vpop.f32.mrb[4].mxu0 }
 0x22a   :  { %v894_v42 = vadd.f32 %v893_v20, %v840_v41  ;;  %v842_v43 = vpop.f32.mrb[5].mxu0  ;;  %v1240_v41 = vunpack.c.0.s8 %v1239_v18 }
 0x22b   :  { %v896_v46 = vadd.f32 %v895_v21, %v842_v43  ;;  %v844_v47 = vpop.f32.mrb[6].mxu0  ;;  %v1084_v21 = vmax.f32 %v1068_v60, 0.0 }
 0x22c   :  { %v898_v48 = vadd.f32 %v897_v22, %v844_v47  ;;  %v846_v49 = vpop.f32.mrb[7].mxu0  ;;  %v1038_v2 = vmul.f32 %v1013_v40, %v894_v42  ;;  %v1073_v22 = vadd.f32 %v1055_v53, %v1035_v61 }
 0x22d   :  { %v900_v52 = vadd.f32 %v899_v3, %v846_v49  ;;  %v1039_v4 = vmul.f32 %v1017_v45, %v896_v46 }
 0x22e   :  { %v1042_v15 = vmul.f32 %v1013_v40, %v898_v48  ;;  %v1076_v3 = vadd.f32 %v1051_v51, %v1038_v2  ;;  %v1089_v38 = vmax.f32 %v1073_v22, 0.0 }
 0x22f   :  { %v1077_v9 = vadd.f32 %v1055_v53, %v1039_v4  ;;  %v1043_v31 = vmul.f32 %v1017_v45, %v900_v52 }
 0x230   :  { %v1080_v30 = vadd.f32 %v1051_v51, %v1042_v15  ;;  %v1092_v43 = vmax.f32 %v1076_v3, 0.0 }
 0x231   :  { %v989_v62 = vpop.f32.mrb[8].mxu1  ;;  %v1093_v14 = vmax.f32 %v1077_v9, 0.0  ;;  %v1081_v45 = vadd.f32 %v1055_v53, %v1043_v31 }
 0x232   :  { %v1032_v5 = vmul.f32 %v1021_v54, %v989_v62  ;;  %v991_v6 = vpop.f32.mrb[9].mxu1  ;;  %v1096_v51 = vmax.f32 %v1080_v30, 0.0 }
 0x233   :  { %v1033_v12 = vmul.f32 %v6904_v58, %v991_v6  ;;  %v993_v13 = vpop.f32.mrb[10].mxu1 }
 0x234   :  { %v1070_v16 = vadd.f32 %v1059_v59, %v1032_v5  ;;  %v1036_v19 = vmul.f32 %v1021_v54, %v993_v13  ;;  %v995_v20 = vpop.f32.mrb[11].mxu1 }
 0x235   :  { %v1071_v23 = vadd.f32 %v6908_v63, %v1033_v12  ;;  %v1037_v24 = vmul.f32 %v6904_v58, %v995_v20  ;;  %v6926_v20 = vsub.s32 %v1240_v41, %v6880_v26 }
 0x236   :  { %v1086_v25 = vmax.f32 %v1070_v16, 0.0  ;;  %v1074_v36 = vadd.f32 %v1059_v59, %v1036_v19 }
 0x237   :  { %v1087_v28 = vmax.f32 %v1071_v23, 0.0  ;;  %v1075_v29 = vadd.f32 %v6908_v63, %v1037_v24 }
 0x238   :  { %v1100_v32 = vmax.f32 %v1084_v21, %v1086_v25  ;;  %v1090_v35 = vmax.f32 %v1074_v36, 0.0 }
 0x239   :  { %v1101_v40 = vmax.f32 %v1085_v0, %v1087_v28  ;;  %v1091_v33 = vmax.f32 %v1075_v29, 0.0  ;;  %v999_v42 = vpop.f32.mrb[12].mxu1 }
 0x23a   :  { %v1102_v44 = vmax.f32 %v1088_v27, %v1090_v35  ;;  %v1040_v46 = vmul.f32 %v1021_v54, %v999_v42  ;;  %v1001_v47 = vpop.f32.mrb[13].mxu1 }
 0x23b   :  { %v1116_v48 = vcombine.low %v1100_v32, %v1101_v40  ;;  %v1117_v49 = vcombine.high %v1100_v32, %v1101_v40  ;;  %v1103_v50 = vmax.f32 %v1089_v38, %v1091_v33  ;;  %v1041_v55 = vmul.f32 %v6904_v58, %v1001_v47  ;;  %v1003_v56 = vpop.f32.mrb[14].mxu1 }
 0x23c   :  { %v1078_v52 = vadd.f32 %v1059_v59, %v1040_v46  ;;  %v1044_v57 = vmul.f32 %v1021_v54, %v1003_v56  ;;  %v1005_v60 = vpop.f32.mrb[15].mxu1 }
 0x23d   :  { %v1138_v61 = vrot.slane %v1116_v48, %v6911_v7  ;;  %v1145_v62 = vrot.slane %v1117_v49, %v6911_v7  ;;  %v1118_v2 = vcombine.low %v1102_v44, %v1103_v50  ;;  %v1119_v4 = vcombine.high %v1102_v44, %v1103_v50 }
 0x23e   :  { %v1094_v5 = vmax.f32 %v1078_v52, 0.0  ;;  %v1079_v6 = vadd.f32 %v6908_v63, %v1041_v55  ;;  %v1082_v10 = vadd.f32 %v1059_v59, %v1044_v57  ;;  %v1045_v11 = vmul.f32 %v6904_v58, %v1005_v60 }
 0x23f   :  { %v1196_v12 = vrot.slane %v1138_v61, 4  ;;  %v1197_v13 = vrot.slane %v1145_v62, 4  ;;  %v1152_v15 = vrot.slane %v1118_v2, %v6911_v7  ;;  %v1159_v53 = vrot.slane %v1119_v4, %v6911_v7 }
 0x240   :  { %v1104_v54 = vmax.f32 %v1092_v43, %v1094_v5  ;;  %v1095_v16 = vmax.f32 %v1079_v6, 0.0  ;;  %v1098_v17 = vmax.f32 %v1082_v10, 0.0  ;;  %v1083_v18 = vadd.f32 %v6908_v63, %v1045_v11 }
 0x241   :  { %v1212_v19 = vmax.f32 %v1138_v61, %v1196_v12  ;;  %v1198_v21 = vrot.slane %v1152_v15, 4  ;;  %v1199_v22 = vrot.slane %v1159_v53, 4  ;;  %v1097_v59 = vmax.f32 %v1081_v45, 0.0 }
 0x242   :  { %v1105_v23 = vmax.f32 %v1093_v14, %v1095_v16  ;;  %v1106_v58 = vmax.f32 %v1096_v51, %v1098_v17  ;;  %v1099_v24 = vmax.f32 %v1083_v18, 0.0  ;;  %v1213_v3 = vmax.f32 %v1145_v62, %v1197_v13 }
 0x243   :  { %v1236_v9 = vcombine.low %v1212_v19, %v1212_v19  ;;  %v1214_v25 = vmax.f32 %v1152_v15, %v1198_v21  ;;  %v1215_v36 = vmax.f32 %v1159_v53, %v1199_v22 }
 0x244   :  { %v1120_v0 = vcombine.low %v1104_v54, %v1105_v23  ;;  %v1121_v27 = vcombine.high %v1104_v54, %v1105_v23  ;;  %v1107_v28 = vmax.f32 %v1097_v59, %v1099_v24 }
 0x245   :  { %v1237_v29 = vcombine.low %v1213_v3, %v1214_v25  ;;  %v1260_v63 = vrot.slane %v1215_v36, %v6926_v20  ;;  %4966 = vst.sshfl [vmem:[#allocation3 + $0x10] sm:$0x3 pattern:$0x76325410] %v1215_v36  ;;  %v1244_v38 = vrot.slane %v1236_v9, %v6926_v20  ;;  %v5766_v9 = vld [vmem:[#allocation10] ss:$16 sps:$4 sm:$0xff]  }
 0x246   :  { %v1166_v30 = vrot.slane %v1120_v0, %v6911_v7  ;;  %v1173_v31 = vrot.slane %v1121_v27, %v6911_v7  ;;  %v1122_v32 = vcombine.low %v1106_v58, %v1107_v28  ;;  %v1123_v35 = vcombine.high %v1106_v58, %v1107_v28  ;;  %v5769_v25 = vld [vmem:[#allocation10 + $0x8] ss:$16 sps:$4 sm:$0xff]   ;;  %v5774_v28 = vld [vmem:[#allocation10 + $0x24] ss:$16 sps:$4 sm:$0xff]  }
 0x247   :  { %v1251_v40 = vrot.slane %v1237_v29, %v6926_v20  ;;  %v1261_v41 = vcombine.high %v1260_v63, %v1260_v63  ;;  %v5777_v29 = vld [vmem:[#allocation10 + $0x2c] ss:$16 sps:$4 sm:$0xff]  }
 0x248   :  { %v1200_v33 = vrot.slane %v1166_v30, 4  ;;  %v1201_v42 = vrot.slane %v1173_v31, 4  ;;  %v1180_v43 = vrot.slane %v1122_v32, %v6911_v7  ;;  %v1187_v14 = vrot.slane %v1123_v35, %v6911_v7  ;;  %v5780_v32 = vld [vmem:[#allocation10 + $0x44] ss:$16 sps:$4 sm:$0xff]   ;;  %v5783_v35 = vld [vmem:[#allocation10 + $0x4c] ss:$16 sps:$4 sm:$0xff]  }
 0x249   :  { %v1252_v44 = vcombine.low %v1244_v38, %v1251_v40  ;;  %v1253_v46 = vcombine.high %v1244_v38, %v1251_v40  ;;  %1299 = vst [vmem:[#allocation3 + $0x18] sm:$0x3] %v1261_v41  ;;  %v5778_v38 = vld [vmem:[#allocation10 + $0x40] ss:$16 sps:$4 sm:$0xff]   ;;  %v5781_v40 = vld [vmem:[#allocation10 + $0x48] ss:$16 sps:$4 sm:$0xff]  }
 0x24a   :  { %v1216_v47 = vmax.f32 %v1166_v30, %v1200_v33  ;;  %v1202_v48 = vrot.slane %v1180_v43, 4  ;;  %v1203_v49 = vrot.slane %v1187_v14, 4  ;;  %v1217_v50 = vmax.f32 %v1173_v31, %v1201_v42  ;;  %v5772_v30 = vld [vmem:[#allocation10 + $0x20] ss:$16 sps:$4 sm:$0xff]   ;;  %v5775_v31 = vld [vmem:[#allocation10 + $0x28] ss:$16 sps:$4 sm:$0xff]  }
 0x24b   :  { %1296 = vst [vmem:[#allocation3] sm:$0xfc] %v1252_v44  ;;  %1297 = vst [vmem:[#allocation3 + $0x8] sm:$0xfc] %v1253_v46  ;;  %v5786_v41 = vld [vmem:[#allocation10 + $0x64] ss:$16 sps:$4 sm:$0xff]  }
 0x24c   :  { %v1262_v55 = vcombine.low %v1216_v47, %v1216_v47  ;;  %v1218_v56 = vmax.f32 %v1180_v43, %v1202_v48  ;;  %v1219_v51 = vmax.f32 %v1187_v14, %v1203_v49  ;;  %v1376_v10 = vld [vmem:[#allocation3 + $0x10] sm:$0x1]  ;;  %v5789_v33 = vld [vmem:[#allocation10 + $0x6c] ss:$16 sps:$4 sm:$0xff]   ;;  %v5784_v42 = vld [vmem:[#allocation10 + $0x60] ss:$16 sps:$4 sm:$0xff]  }
 0x24d   :  { %v1392_v17 = vrot.slane %v1376_v10, 1  ;;  %v5787_v43 = vld [vmem:[#allocation10 + $0x68] ss:$16 sps:$4 sm:$0xff]   ;;  %v5792_v14 = vld [vmem:[#allocation10 + $0x84] ss:$16 sps:$4 sm:$0xff]  }
 0x24e   :  { %v1263_v45 = vcombine.low %v1217_v50, %v1218_v56  ;;  %v1286_v52 = vrot.slane %v1219_v51, %v6926_v20  ;;  %4967 = vst.sshfl [vmem:[#allocation3 + $0x30] sm:$0x3 pattern:$0x76325410] %v1219_v51  ;;  %v1270_v57 = vrot.slane %v1262_v55, %v6926_v20  ;;  %v5795_v44 = vld [vmem:[#allocation10 + $0x8c] ss:$16 sps:$4 sm:$0xff]  }
 0x24f   :  { %v5790_v46 = vld [vmem:[#allocation10 + $0x80] ss:$16 sps:$4 sm:$0xff]   ;;  %v5793_v47 = vld [vmem:[#allocation10 + $0x88] ss:$16 sps:$4 sm:$0xff]   ;;  %v5798_v48 = vld [vmem:[#allocation10 + $0xa4] ss:$16 sps:$4 sm:$0xff]  }
 0x250   :  { %v1277_v60 = vrot.slane %v1263_v45, %v6926_v20  ;;  %v1287_v61 = vcombine.high %v1286_v52, %v1286_v52  ;;  %v1377_v6 = vld [vmem:[#allocation3 + $0x18] sm:$0x1]  ;;  %v5801_v49 = vld [vmem:[#allocation10 + $0xac] ss:$16 sps:$4 sm:$0xff]   ;;  %v5799_v55 = vld [vmem:[#allocation10 + $0xa8] ss:$16 sps:$4 sm:$0xff]  }
 0x251   :  { %v1395_v54 = vrot.slane %v1377_v6, 1  ;;  %v5796_v50 = vld [vmem:[#allocation10 + $0xa0] ss:$16 sps:$4 sm:$0xff]   ;;  %v5804_v56 = vld [vmem:[#allocation10 + $0xc4] ss:$16 sps:$4 sm:$0xff]  }
 0x252   :  { %v1278_v62 = vcombine.low %v1270_v57, %v1277_v60  ;;  %v1279_v2 = vcombine.high %v1270_v57, %v1277_v60  ;;  %1303 = vst [vmem:[#allocation3 + $0x38] sm:$0x3] %v1287_v61  ;;  %v1375_v4 = vld [vmem:[#allocation3 + $0x8] sm:$0xfe]  ;;  %v1374_v5 = vld [vmem:[#allocation3] sm:$0xfe] }
 0x253   :  { %v1394_v13 = vrot.slane %v1375_v4, 1  ;;  %v1391_v15 = vrot.slane %v1374_v5, 1  ;;  %v1305_v27 = vld [vmem:[#allocation3 + $0x8] sm:$0xff]  ;;  %v5807_v51 = vld [vmem:[#allocation10 + $0xcc] ss:$16 sps:$4 sm:$0xff]  }
 0x254   :  { %1300 = vst [vmem:[#allocation3 + $0x20] sm:$0xfc] %v1278_v62  ;;  %1301 = vst [vmem:[#allocation3 + $0x28] sm:$0xfc] %v1279_v2  ;;  %v5802_v45 = vld [vmem:[#allocation10 + $0xc0] ss:$16 sps:$4 sm:$0xff]  }
 0x255   :  { %v1380_v12 = vld [vmem:[#allocation3 + $0x30] sm:$0x1]  ;;  %v1396_v59 = vsel %vm1390_vm10, %v1394_v13, %v1395_v54  ;;  %v1393_v58 = vsel %vm1390_vm10, %v1391_v15, %v1392_v17  ;;  %v5810_v57 = vld [vmem:[#allocation10 + $0xe4] ss:$16 sps:$4 sm:$0xff]   ;;  %v5813_v60 = vld [vmem:[#allocation10 + $0xec] ss:$16 sps:$4 sm:$0xff]  }
 0x256   :  { %v1398_v22 = vrot.slane %v1380_v12, 1  ;;  %v5805_v52 = vld [vmem:[#allocation10 + $0xc8] ss:$16 sps:$4 sm:$0xff]   ;;  %v5808_v61 = vld [vmem:[#allocation10 + $0xe0] ss:$16 sps:$4 sm:$0xff]  }
 0x257   :  { %v5811_v62 = vld [vmem:[#allocation10 + $0xe8] ss:$16 sps:$4 sm:$0xff]   ;;  %v5816_v2 = vld [vmem:[#allocation10 + $0x104] ss:$16 sps:$4 sm:$0xff]   ;;  %v5819_v4 = vld [vmem:[#allocation10 + $0x10c] ss:$16 sps:$4 sm:$0xff]  }
 0x258   :  { %v5814_v5 = vld [vmem:[#allocation10 + $0x100] ss:$16 sps:$4 sm:$0xff]   ;;  %v5817_v6 = vld [vmem:[#allocation10 + $0x108] ss:$16 sps:$4 sm:$0xff]   ;;  %v5822_v10 = vld [vmem:[#allocation10 + $0x124] ss:$16 sps:$4 sm:$0xff]  }
 0x259   :  { %v1381_v11 = vld [vmem:[#allocation3 + $0x38] sm:$0x1]  ;;  %v5823_v13 = vld [vmem:[#allocation10 + $0x128] ss:$16 sps:$4 sm:$0xff]   ;;  %v5828_v15 = vld [vmem:[#allocation10 + $0x144] ss:$16 sps:$4 sm:$0xff]  }
 0x25a   :  { %v1401_v19 = vrot.slane %v1381_v11, 1  ;;  %v5825_v11 = vld [vmem:[#allocation10 + $0x12c] ss:$16 sps:$4 sm:$0xff]   ;;  %v5820_v12 = vld [vmem:[#allocation10 + $0x120] ss:$16 sps:$4 sm:$0xff]  }
 0x25b   :  { %v1379_v53 = vld [vmem:[#allocation3 + $0x28] sm:$0xfe]  ;;  %v1378_v16 = vld [vmem:[#allocation3 + $0x20] sm:$0xfe] }
 0x25c   :  { %v1400_v18 = vrot.slane %v1379_v53, 1  ;;  %v1397_v21 = vrot.slane %v1378_v16, 1  ;;  %v1307_v0 = vld [vmem:[#allocation3 + $0x28] sm:$0xff]  ;;  %v5831_v53 = vld [vmem:[#allocation10 + $0x14c] ss:$16 sps:$4 sm:$0xff]  }
 0x25d   :  { %v1309_v63 = vpack.c.bf16 %v1307_v0, %v1305_v27  ;;  %v5826_v54 = vld [vmem:[#allocation10 + $0x140] ss:$16 sps:$4 sm:$0xff]   ;;  %v5829_v16 = vld [vmem:[#allocation10 + $0x148] ss:$16 sps:$4 sm:$0xff]   ;;  %v5834_v17 = vld [vmem:[#allocation10 + $0x164] ss:$16 sps:$4 sm:$0xff]  }
 0x25e   :  { %v1402_v23 = vsel %vm1390_vm10, %v1400_v18, %v1401_v19  ;;  %v1399_v24 = vsel %vm1390_vm10, %v1397_v21, %v1398_v22  ;;  %v5837_v18 = vld [vmem:[#allocation10 + $0x16c] ss:$16 sps:$4 sm:$0xff]   ;;  %v5832_v19 = vld [vmem:[#allocation10 + $0x160] ss:$16 sps:$4 sm:$0xff]   ;;  %v5835_v21 = vld [vmem:[#allocation10 + $0x168] ss:$16 sps:$4 sm:$0xff]  }
 0x25f   :  { %v1408_v3 = vpack.c.bf16 %v1402_v23, %v1396_v59  ;;  %v1407_v36 = vpack.c.bf16 %v1399_v24, %v1393_v58  ;;  %v5840_v22 = vld [vmem:[#allocation10 + $0x184] ss:$16 sps:$4 sm:$0xff]   ;;  %v5843_v59 = vld [vmem:[#allocation10 + $0x18c] ss:$16 sps:$4 sm:$0xff]   ;;  %v5838_v23 = vld [vmem:[#allocation10 + $0x180] ss:$16 sps:$4 sm:$0xff]  }
 0x260   :  { %v5841_v58 = vld [vmem:[#allocation10 + $0x188] ss:$16 sps:$4 sm:$0xff]   ;;  %v5846_v24 = vld [vmem:[#allocation10 + $0x1a4] ss:$16 sps:$4 sm:$0xff]   ;;  %v5855_v0 = vld [vmem:[#allocation10 + $0x1cc] ss:$16 sps:$4 sm:$0xff]  }
 0x261   :  { %1826 = vmatprep.mubr.bf16.mxu0 %v1408_v3  ;;  %1869 = vmatprep.mubr.bf16.mxu1 %v1408_v3  ;;  %v5849_v3 = vld [vmem:[#allocation10 + $0x1ac] ss:$16 sps:$4 sm:$0xff]   ;;  %v5850_v27 = vld [vmem:[#allocation10 + $0x1c0] ss:$16 sps:$4 sm:$0xff]  }
 0x262   :  { %1827 = vmatmul.mubr.bf16.vlgmr.msra.gmra.mrb[8].mxu0 %v1407_v36  ;;  %1870 = vmatmul.mubr.bf16.vlgmr.msra.gmra.mrb[16].mxu1 %v1407_v36  ;;  %v5852_v36 = vld [vmem:[#allocation10 + $0x1c4] ss:$16 sps:$4 sm:$0xff]  }
 0x263   :  { %2201 = vmatpush1.bf16.msra.mxu0 %v5766_v9  ;;  %2244 = vmatpush1.bf16.msra.mxu1 %v5769_v25  ;;  %v5844_v9 = vld [vmem:[#allocation10 + $0x1a0] ss:$16 sps:$4 sm:$0xff]   ;;  %v5847_v25 = vld [vmem:[#allocation10 + $0x1a8] ss:$16 sps:$4 sm:$0xff]  }
 0x264   :  { %2232 = vmatprep.mubr.bf16.mxu0 %v1309_v63  ;;  %2275 = vmatprep.mubr.bf16.mxu1 %v1309_v63  ;;  %v5858_v63 = vld [vmem:[#allocation10 + $0x1e4] ss:$16 sps:$4 sm:$0xff]  }
 0x265   :  { %2202 = vmatprep.subr.bf16.mxu0 %v5774_v28  ;;  %2245 = vmatprep.subr.bf16.mxu1 %v5777_v29  ;;  %v5853_v28 = vld [vmem:[#allocation10 + $0x1c8] ss:$16 sps:$4 sm:$0xff]   ;;  %v2291_v29 = vld [vmem:[#allocation3 + $0x28] sm:$0xfc] }
 0x267   :  { %2203 = vmatpush1.bf16.msra.mxu0 %v5772_v30  ;;  %2246 = vmatpush1.bf16.msra.mxu1 %v5775_v31  ;;  %v5861_v30 = vld [vmem:[#allocation10 + $0x1ec] ss:$16 sps:$4 sm:$0xff]   ;;  %v2287_v31 = vld [vmem:[#allocation3 + $0x8] sm:$0xfc] }
 0x268   :  { %2204 = vmatprep.subr.bf16.mxu0 %v5780_v32  ;;  %2247 = vmatprep.subr.bf16.mxu1 %v5783_v35  ;;  %v2293_v32 = vld [vmem:[#allocation3 + $0x38] sm:$0x3]  ;;  %v2312_v35 = vrot.slane %v2291_v29, 2 }
 0x269   :  { %v5916_v29 = vld [vmem:[#allocation10 + $0x520] ss:$16 sps:$4 sm:$0xff]  }
 0x26b   :  { %2205 = vmatpush1.bf16.msra.mxu0 %v5778_v38  ;;  %2248 = vmatpush1.bf16.msra.mxu1 %v5781_v40  ;;  %v5856_v38 = vld [vmem:[#allocation10 + $0x1e0] ss:$16 sps:$4 sm:$0xff]   ;;  %v5859_v40 = vld [vmem:[#allocation10 + $0x1e8] ss:$16 sps:$4 sm:$0xff]  }
 0x26c   :  { %2206 = vmatprep.subr.bf16.mxu0 %v5786_v41  ;;  %2249 = vmatprep.subr.bf16.mxu1 %v5789_v33  ;;  %v2289_v41 = vld [vmem:[#allocation3 + $0x18] sm:$0x3]  ;;  %v5864_v33 = vld [vmem:[#allocation10 + $0x404] ss:$16 sps:$4 sm:$0xff]  }
 0x26f   :  { %2207 = vmatpush1.bf16.msra.mxu0 %v5784_v42  ;;  %2250 = vmatpush1.bf16.msra.mxu1 %v5787_v43  ;;  %v5867_v42 = vld [vmem:[#allocation10 + $0x40c] ss:$16 sps:$4 sm:$0xff]   ;;  %v2306_v43 = vrot.slane %v2287_v31, 2 }
 0x270   :  { %2208 = vmatprep.subr.bf16.mxu0 %v5792_v14  ;;  %2251 = vmatprep.subr.bf16.mxu1 %v5795_v44  ;;  %v2313_v14 = vrot.slane %v2293_v32, 2  ;;  %v1306_v44 = vld [vmem:[#allocation3 + $0x20] sm:$0xff]  ;;  %v5922_v32 = vld [vmem:[#allocation10 + $0x540] ss:$16 sps:$4 sm:$0xff]  }
 0x271   :  { %v5927_v31 = vld [vmem:[#allocation10 + $0x54c] ss:$16 sps:$4 sm:$0xff]  }
 0x273   :  { %2209 = vmatpush1.bf16.msra.mxu0 %v5790_v46  ;;  %2252 = vmatpush1.bf16.msra.mxu1 %v5793_v47  ;;  %v2307_v46 = vrot.slane %v2289_v41, 2  ;;  %v2314_v47 = vsel %vm2302_vm11, %v2312_v35, %v2313_v14  ;;  %v5925_v35 = vld [vmem:[#allocation10 + $0x548] ss:$16 sps:$4 sm:$0xff]   ;;  %v5928_v41 = vld [vmem:[#allocation10 + $0x560] ss:$16 sps:$4 sm:$0xff]  }
 0x274   :  { %2210 = vmatprep.subr.bf16.mxu0 %v5798_v48  ;;  %2253 = vmatprep.subr.bf16.mxu1 %v5801_v49  ;;  %v1304_v48 = vld [vmem:[#allocation3] sm:$0xff]  ;;  %v5862_v49 = vld [vmem:[#allocation10 + $0x400] ss:$16 sps:$4 sm:$0xff]  }
 0x275   :  { %v5934_v14 = vld [vmem:[#allocation10 + $0x580] ss:$16 sps:$4 sm:$0xff]  }
 0x277   :  { %2211 = vmatpush1.bf16.msra.mxu0 %v5796_v50  ;;  %2254 = vmatpush1.bf16.msra.mxu1 %v5799_v55  ;;  %v1308_v50 = vpack.c.bf16 %v1306_v44, %v1304_v48  ;;  %v5865_v55 = vld [vmem:[#allocation10 + $0x408] ss:$16 sps:$4 sm:$0xff]   ;;  %v5940_v48 = vld [vmem:[#allocation10 + $0x5a0] ss:$16 sps:$4 sm:$0xff]  }
 0x278   :  { %2212 = vmatprep.subr.bf16.mxu0 %v5804_v56  ;;  %2255 = vmatprep.subr.bf16.mxu1 %v5807_v51  ;;  %v2308_v56 = vsel %vm2302_vm11, %v2306_v43, %v2307_v46  ;;  %v5939_v43 = vld [vmem:[#allocation10 + $0x58c] ss:$16 sps:$4 sm:$0xff]   ;;  %v5937_v44 = vld [vmem:[#allocation10 + $0x588] ss:$16 sps:$4 sm:$0xff]   ;;  %v5942_v46 = vld [vmem:[#allocation10 + $0x5a4] ss:$16 sps:$4 sm:$0xff]  }
 0x279   :  { %v2320_v51 = vpack.c.bf16 %v2314_v47, %v2308_v56  ;;  %v5945_v47 = vld [vmem:[#allocation10 + $0x5ac] ss:$16 sps:$4 sm:$0xff]  }
 0x27a   :  { %v2290_v56 = vld [vmem:[#allocation3 + $0x20] sm:$0xfc] }
 0x27b   :  { %2213 = vmatpush1.bf16.msra.mxu0 %v5802_v45  ;;  %2256 = vmatpush1.bf16.msra.mxu1 %v5805_v52  ;;  %v5870_v45 = vld [vmem:[#allocation10 + $0x424] ss:$16 sps:$4 sm:$0xff]   ;;  %v5873_v52 = vld [vmem:[#allocation10 + $0x42c] ss:$16 sps:$4 sm:$0xff]  }
 0x27c   :  { %2214 = vmatprep.subr.bf16.mxu0 %v5810_v57  ;;  %2257 = vmatprep.subr.bf16.mxu1 %v5813_v60  ;;  %v5868_v57 = vld [vmem:[#allocation10 + $0x420] ss:$16 sps:$4 sm:$0xff]   ;;  %v5871_v60 = vld [vmem:[#allocation10 + $0x428] ss:$16 sps:$4 sm:$0xff]  }
 0x27f   :  { %2215 = vmatpush1.bf16.msra.mxu0 %v5808_v61  ;;  %2258 = vmatpush1.bf16.msra.mxu1 %v5811_v62  ;;  %v5876_v61 = vld [vmem:[#allocation10 + $0x444] ss:$16 sps:$4 sm:$0xff]   ;;  %v5879_v62 = vld [vmem:[#allocation10 + $0x44c] ss:$16 sps:$4 sm:$0xff]  }
 0x280   :  { %2216 = vmatprep.subr.bf16.mxu0 %v5816_v2  ;;  %2259 = vmatprep.subr.bf16.mxu1 %v5819_v4  ;;  %v5874_v2 = vld [vmem:[#allocation10 + $0x440] ss:$16 sps:$4 sm:$0xff]   ;;  %v5877_v4 = vld [vmem:[#allocation10 + $0x448] ss:$16 sps:$4 sm:$0xff]  }
 0x283   :  { %2217 = vmatpush1.bf16.msra.mxu0 %v5814_v5  ;;  %2260 = vmatpush1.bf16.msra.mxu1 %v5817_v6  ;;  %v5882_v5 = vld [vmem:[#allocation10 + $0x464] ss:$16 sps:$4 sm:$0xff]   ;;  %v5885_v6 = vld [vmem:[#allocation10 + $0x46c] ss:$16 sps:$4 sm:$0xff]  }
 0x284   :  { %2218 = vmatprep.subr.bf16.mxu0 %v5822_v10  ;;  %2261 = vmatprep.subr.bf16.mxu1 %v5825_v11  ;;  %v5880_v10 = vld [vmem:[#allocation10 + $0x460] ss:$16 sps:$4 sm:$0xff]   ;;  %v5883_v11 = vld [vmem:[#allocation10 + $0x468] ss:$16 sps:$4 sm:$0xff]  }
 0x287   :  { %2219 = vmatpush1.bf16.msra.mxu0 %v5820_v12  ;;  %2262 = vmatpush1.bf16.msra.mxu1 %v5823_v13  ;;  %v5888_v12 = vld [vmem:[#allocation10 + $0x484] ss:$16 sps:$4 sm:$0xff]   ;;  %v5891_v13 = vld [vmem:[#allocation10 + $0x48c] ss:$16 sps:$4 sm:$0xff]  }
 0x288   :  { %2220 = vmatprep.subr.bf16.mxu0 %v5828_v15  ;;  %2263 = vmatprep.subr.bf16.mxu1 %v5831_v53  ;;  %v5886_v15 = vld [vmem:[#allocation10 + $0x480] ss:$16 sps:$4 sm:$0xff]   ;;  %v5889_v53 = vld [vmem:[#allocation10 + $0x488] ss:$16 sps:$4 sm:$0xff]  }
 0x28b   :  { %2221 = vmatpush1.bf16.msra.mxu0 %v5826_v54  ;;  %2264 = vmatpush1.bf16.msra.mxu1 %v5829_v16  ;;  %v5894_v54 = vld [vmem:[#allocation10 + $0x4a4] ss:$16 sps:$4 sm:$0xff]   ;;  %v5897_v16 = vld [vmem:[#allocation10 + $0x4ac] ss:$16 sps:$4 sm:$0xff]  }
 0x28c   :  { %2222 = vmatprep.subr.bf16.mxu0 %v5834_v17  ;;  %2265 = vmatprep.subr.bf16.mxu1 %v5837_v18  ;;  %v5892_v17 = vld [vmem:[#allocation10 + $0x4a0] ss:$16 sps:$4 sm:$0xff]   ;;  %v5895_v18 = vld [vmem:[#allocation10 + $0x4a8] ss:$16 sps:$4 sm:$0xff]  }
 0x28f   :  { %2223 = vmatpush1.bf16.msra.mxu0 %v5832_v19  ;;  %2266 = vmatpush1.bf16.msra.mxu1 %v5835_v21  ;;  %v5900_v19 = vld [vmem:[#allocation10 + $0x4c4] ss:$16 sps:$4 sm:$0xff]   ;;  %v5903_v21 = vld [vmem:[#allocation10 + $0x4cc] ss:$16 sps:$4 sm:$0xff]  }
 0x290   :  { %2224 = vmatprep.subr.bf16.mxu0 %v5840_v22  ;;  %2267 = vmatprep.subr.bf16.mxu1 %v5843_v59  ;;  %v5898_v22 = vld [vmem:[#allocation10 + $0x4c0] ss:$16 sps:$4 sm:$0xff]   ;;  %v5901_v59 = vld [vmem:[#allocation10 + $0x4c8] ss:$16 sps:$4 sm:$0xff]  }
 0x293   :  { %2225 = vmatpush1.bf16.msra.mxu0 %v5838_v23  ;;  %2268 = vmatpush1.bf16.msra.mxu1 %v5841_v58  ;;  %v5906_v23 = vld [vmem:[#allocation10 + $0x4e4] ss:$16 sps:$4 sm:$0xff]   ;;  %v5909_v58 = vld [vmem:[#allocation10 + $0x4ec] ss:$16 sps:$4 sm:$0xff]  }
 0x294   :  { %2226 = vmatprep.subr.bf16.mxu0 %v5846_v24  ;;  %2269 = vmatprep.subr.bf16.mxu1 %v5849_v3  ;;  %v5904_v24 = vld [vmem:[#allocation10 + $0x4e0] ss:$16 sps:$4 sm:$0xff]   ;;  %v5907_v3 = vld [vmem:[#allocation10 + $0x4e8] ss:$16 sps:$4 sm:$0xff]  }
 0x297   :  { %2227 = vmatpush1.bf16.msra.mxu0 %v5844_v9  ;;  %2270 = vmatpush1.bf16.msra.mxu1 %v5847_v25  ;;  %v5912_v9 = vld [vmem:[#allocation10 + $0x504] ss:$16 sps:$4 sm:$0xff]   ;;  %v5915_v25 = vld [vmem:[#allocation10 + $0x50c] ss:$16 sps:$4 sm:$0xff]  }
 0x298   :  { %2228 = vmatprep.subr.bf16.mxu0 %v5852_v36  ;;  %2271 = vmatprep.subr.bf16.mxu1 %v5855_v0  ;;  %v5910_v36 = vld [vmem:[#allocation10 + $0x500] ss:$16 sps:$4 sm:$0xff]   ;;  %v5913_v0 = vld [vmem:[#allocation10 + $0x508] ss:$16 sps:$4 sm:$0xff]  }
 0x29b   :  { %2229 = vmatpush1.bf16.msra.mxu0 %v5850_v27  ;;  %2272 = vmatpush1.bf16.msra.mxu1 %v5853_v28  ;;  %v5918_v27 = vld [vmem:[#allocation10 + $0x524] ss:$16 sps:$4 sm:$0xff]   ;;  %v5921_v28 = vld [vmem:[#allocation10 + $0x52c] ss:$16 sps:$4 sm:$0xff]  }
 0x29c   :  { %2230 = vmatprep.subr.bf16.mxu0 %v5858_v63  ;;  %2273 = vmatprep.subr.bf16.mxu1 %v5861_v30  ;;  %v5919_v63 = vld [vmem:[#allocation10 + $0x528] ss:$16 sps:$4 sm:$0xff]   ;;  %v5924_v30 = vld [vmem:[#allocation10 + $0x544] ss:$16 sps:$4 sm:$0xff]  }
 0x29f   :  { %2231 = vmatpush1.bf16.msra.mxu0 %v5856_v38  ;;  %2274 = vmatpush1.bf16.msra.mxu1 %v5859_v40  ;;  %v5930_v38 = vld [vmem:[#allocation10 + $0x564] ss:$16 sps:$4 sm:$0xff]   ;;  %v5933_v40 = vld [vmem:[#allocation10 + $0x56c] ss:$16 sps:$4 sm:$0xff]  }
 0x2a0   :  { %2706 = vmatprep.subr.bf16.mxu0 %v5864_v33  ;;  %2749 = vmatprep.subr.bf16.mxu1 %v5867_v42  ;;  %v5931_v33 = vld [vmem:[#allocation10 + $0x568] ss:$16 sps:$4 sm:$0xff]   ;;  %v5936_v42 = vld [vmem:[#allocation10 + $0x584] ss:$16 sps:$4 sm:$0xff]  }
 0x2a2   :  { %2233 = vmatmul.mubr.bf16.vlgmr.msra.gmra.mrb[8].mxu0 %v1308_v50  ;;  %2276 = vmatmul.mubr.bf16.vlgmr.msra.gmra.mrb[16].mxu1 %v1308_v50  ;;  %v5948_v50 = vld [vmem:[#allocation10 + $0x5c4] ss:$16 sps:$4 sm:$0xff]  }
 0x2a3   :  { %2707 = vmatpush1.bf16.msra.mxu0 %v5862_v49  ;;  %2738 = vmatprep.mubr.bf16.mxu0 %v2320_v51  ;;  %v5943_v49 = vld [vmem:[#allocation10 + $0x5a8] ss:$16 sps:$4 sm:$0xff]  }
 0x2a4   :  { %2750 = vmatpush1.bf16.msra.mxu1 %v5865_v55  ;;  %2781 = vmatprep.mubr.bf16.mxu1 %v2320_v51  ;;  %v5951_v55 = vld [vmem:[#allocation10 + $0x5cc] ss:$16 sps:$4 sm:$0xff]   ;;  %v5946_v51 = vld [vmem:[#allocation10 + $0x5c0] ss:$16 sps:$4 sm:$0xff]  }
 0x2a5   :  { %2708 = vmatprep.subr.bf16.mxu0 %v5870_v45  ;;  %2751 = vmatprep.subr.bf16.mxu1 %v5873_v52  ;;  %v2286_v45 = vld [vmem:[#allocation3] sm:$0xfc]  ;;  %v2292_v52 = vld [vmem:[#allocation3 + $0x30] sm:$0x3] }
 0x2a7   :  { %2709 = vmatpush1.bf16.msra.mxu0 %v5868_v57  ;;  %v5949_v57 = vld [vmem:[#allocation10 + $0x5c8] ss:$16 sps:$4 sm:$0xff]  }
 0x2a8   :  { %2752 = vmatpush1.bf16.msra.mxu1 %v5871_v60  ;;  %2710 = vmatprep.subr.bf16.mxu0 %v5876_v61  ;;  %v5954_v60 = vld [vmem:[#allocation10 + $0x5e4] ss:$16 sps:$4 sm:$0xff]  }
 0x2a9   :  { %2753 = vmatprep.subr.bf16.mxu1 %v5879_v62  ;;  %v2805_v61 = vld [vmem:[#allocation3 + $0x28] sm:$0xf8]  ;;  %v5957_v62 = vld [vmem:[#allocation10 + $0x5ec] ss:$16 sps:$4 sm:$0xff]  }
 0x2ab   :  { %2711 = vmatpush1.bf16.msra.mxu0 %v5874_v2  ;;  %v2309_v2 = vrot.slane %v2290_v56, 2  ;;  %v6002_v56 = vld [vmem:[#allocation10 + $0x6e4] ss:$16 sps:$4 sm:$0xff]  }
 0x2ac   :  { %2754 = vmatpush1.bf16.msra.mxu1 %v5877_v4  ;;  %2712 = vmatprep.subr.bf16.mxu0 %v5882_v5  ;;  %v2288_v4 = vld [vmem:[#allocation3 + $0x10] sm:$0x3]  ;;  %v2801_v5 = vld [vmem:[#allocation3 + $0x8] sm:$0xf8] }
 0x2ad   :  { %2755 = vmatprep.subr.bf16.mxu1 %v5885_v6  ;;  %v2807_v6 = vld [vmem:[#allocation3 + $0x38] sm:$0x7] }
 0x2af   :  { %2713 = vmatpush1.bf16.msra.mxu0 %v5880_v10  ;;  %v5952_v10 = vld [vmem:[#allocation10 + $0x5e0] ss:$16 sps:$4 sm:$0xff]  }
 0x2b0   :  { %2756 = vmatpush1.bf16.msra.mxu1 %v5883_v11  ;;  %2714 = vmatprep.subr.bf16.mxu0 %v5888_v12  ;;  %v2303_v11 = vrot.slane %v2286_v45, 2  ;;  %v2310_v12 = vrot.slane %v2292_v52, 2  ;;  %v6000_v45 = vld [vmem:[#allocation10 + $0x6e0] ss:$16 sps:$4 sm:$0xff]   ;;  %v6003_v52 = vld [vmem:[#allocation10 + $0x6e8] ss:$16 sps:$4 sm:$0xff]  }
 0x2b1   :  { %2757 = vmatprep.subr.bf16.mxu1 %v5891_v13  ;;  %v2826_v13 = vrot.slane %v2805_v61, 3  ;;  %v6006_v61 = vld [vmem:[#allocation10 + $0x700] ss:$16 sps:$4 sm:$0xff]  }
 0x2b3   :  { %2715 = vmatpush1.bf16.msra.mxu0 %v5886_v15  ;;  %v5955_v15 = vld [vmem:[#allocation10 + $0x5e8] ss:$16 sps:$4 sm:$0xff]  }
 0x2b4   :  { %2758 = vmatpush1.bf16.msra.mxu1 %v5889_v53  ;;  %2716 = vmatprep.subr.bf16.mxu0 %v5894_v54  ;;  %v5960_v53 = vld [vmem:[#allocation10 + $0x604] ss:$16 sps:$4 sm:$0xff]   ;;  %v2803_v54 = vld [vmem:[#allocation3 + $0x18] sm:$0x7] }
 0x2b5   :  { %2759 = vmatprep.subr.bf16.mxu1 %v5897_v16  ;;  %v2304_v16 = vrot.slane %v2288_v4, 2  ;;  %v6017_v4 = vld [vmem:[#allocation10 + $0x72c] ss:$16 sps:$4 sm:$0xff]  }
 0x2b7   :  { %2717 = vmatpush1.bf16.msra.mxu0 %v5892_v17  ;;  %v2311_v17 = vsel %vm2302_vm11, %v2309_v2, %v2310_v12  ;;  %v6014_v2 = vld [vmem:[#allocation10 + $0x724] ss:$16 sps:$4 sm:$0xff]   ;;  %v6018_v12 = vld [vmem:[#allocation10 + $0x740] ss:$16 sps:$4 sm:$0xff]  }
 0x2b8   :  { %2760 = vmatpush1.bf16.msra.mxu1 %v5895_v18  ;;  %2718 = vmatprep.subr.bf16.mxu0 %v5900_v19  ;;  %v5963_v18 = vld [vmem:[#allocation10 + $0x60c] ss:$16 sps:$4 sm:$0xff]   ;;  %v2820_v19 = vrot.slane %v2801_v5, 3  ;;  %v6012_v5 = vld [vmem:[#allocation10 + $0x720] ss:$16 sps:$4 sm:$0xff]  }
 0x2b9   :  { %2761 = vmatprep.subr.bf16.mxu1 %v5903_v21  ;;  %v2827_v21 = vrot.slane %v2807_v6, 3  ;;  %v6015_v6 = vld [vmem:[#allocation10 + $0x728] ss:$16 sps:$4 sm:$0xff]  }
 0x2bb   :  { %2719 = vmatpush1.bf16.msra.mxu0 %v5898_v22  ;;  %v2305_v22 = vsel %vm2302_vm11, %v2303_v11, %v2304_v16  ;;  %v6023_v11 = vld [vmem:[#allocation10 + $0x74c] ss:$16 sps:$4 sm:$0xff]   ;;  %v6027_v16 = vld [vmem:[#allocation10 + $0x768] ss:$16 sps:$4 sm:$0xff]  }
 0x2bc   :  { %2762 = vmatpush1.bf16.msra.mxu1 %v5901_v59  ;;  %2720 = vmatprep.subr.bf16.mxu0 %v5906_v23  ;;  %v5958_v59 = vld [vmem:[#allocation10 + $0x600] ss:$16 sps:$4 sm:$0xff]   ;;  %v2821_v23 = vrot.slane %v2803_v54, 3 }
 0x2bd   :  { %2763 = vmatprep.subr.bf16.mxu1 %v5909_v58  ;;  %v2828_v58 = vsel %vm2816_vm12, %v2826_v13, %v2827_v21  ;;  %v6021_v13 = vld [vmem:[#allocation10 + $0x748] ss:$16 sps:$4 sm:$0xff]   ;;  %v6024_v54 = vld [vmem:[#allocation10 + $0x760] ss:$16 sps:$4 sm:$0xff]  }
 0x2be   :  { %v6033_v21 = vld [vmem:[#allocation10 + $0x788] ss:$16 sps:$4 sm:$0xff]  }
 0x2bf   :  { %2721 = vmatpush1.bf16.msra.mxu0 %v5904_v24  ;;  %v2319_v24 = vpack.c.bf16 %v2311_v17, %v2305_v22  ;;  %v6032_v17 = vld [vmem:[#allocation10 + $0x784] ss:$16 sps:$4 sm:$0xff]  }
 0x2c0   :  { %2764 = vmatpush1.bf16.msra.mxu1 %v5907_v3  ;;  %2722 = vmatprep.subr.bf16.mxu0 %v5912_v9  ;;  %v5961_v3 = vld [vmem:[#allocation10 + $0x608] ss:$16 sps:$4 sm:$0xff]   ;;  %v2822_v9 = vsel %vm2816_vm12, %v2820_v19, %v2821_v23  ;;  %v6030_v19 = vld [vmem:[#allocation10 + $0x780] ss:$16 sps:$4 sm:$0xff]   ;;  %v6038_v22 = vld [vmem:[#allocation10 + $0x7a4] ss:$16 sps:$4 sm:$0xff]  }
 0x2c1   :  { %2765 = vmatprep.subr.bf16.mxu1 %v5915_v25  ;;  %v5966_v25 = vld [vmem:[#allocation10 + $0x624] ss:$16 sps:$4 sm:$0xff]   ;;  %v6036_v23 = vld [vmem:[#allocation10 + $0x7a0] ss:$16 sps:$4 sm:$0xff]  }
 0x2c3   :  { %2723 = vmatpush1.bf16.msra.mxu0 %v5910_v36  ;;  %v2834_v36 = vpack.c.bf16 %v2828_v58, %v2822_v9  ;;  %v6039_v58 = vld [vmem:[#allocation10 + $0x7a8] ss:$16 sps:$4 sm:$0xff]  }
 0x2c4   :  { %2766 = vmatpush1.bf16.msra.mxu1 %v5913_v0  ;;  %2724 = vmatprep.subr.bf16.mxu0 %v5918_v27  ;;  %v5969_v0 = vld [vmem:[#allocation10 + $0x62c] ss:$16 sps:$4 sm:$0xff]   ;;  %v5964_v27 = vld [vmem:[#allocation10 + $0x620] ss:$16 sps:$4 sm:$0xff]  }
 0x2c5   :  { %2767 = vmatprep.subr.bf16.mxu1 %v5921_v28  ;;  %v5967_v28 = vld [vmem:[#allocation10 + $0x628] ss:$16 sps:$4 sm:$0xff]  }
 0x2c6   :  { %v2804_v9 = vld [vmem:[#allocation3 + $0x20] sm:$0xf8] }
 0x2c7   :  { %2725 = vmatpush1.bf16.msra.mxu0 %v5916_v29  ;;  %v5972_v29 = vld [vmem:[#allocation10 + $0x644] ss:$16 sps:$4 sm:$0xff]  }
 0x2c8   :  { %2768 = vmatpush1.bf16.msra.mxu1 %v5919_v63  ;;  %2726 = vmatprep.subr.bf16.mxu0 %v5924_v30  ;;  %v5975_v63 = vld [vmem:[#allocation10 + $0x64c] ss:$16 sps:$4 sm:$0xff]   ;;  %v5970_v30 = vld [vmem:[#allocation10 + $0x640] ss:$16 sps:$4 sm:$0xff]  }
 0x2c9   :  { %2769 = vmatprep.subr.bf16.mxu1 %v5927_v31  ;;  %v5973_v31 = vld [vmem:[#allocation10 + $0x648] ss:$16 sps:$4 sm:$0xff]  }
 0x2cb   :  { %2727 = vmatpush1.bf16.msra.mxu0 %v5922_v32  ;;  %v5978_v32 = vld [vmem:[#allocation10 + $0x664] ss:$16 sps:$4 sm:$0xff]  }
 0x2cc   :  { %2770 = vmatpush1.bf16.msra.mxu1 %v5925_v35  ;;  %2728 = vmatprep.subr.bf16.mxu0 %v5930_v38  ;;  %v5981_v35 = vld [vmem:[#allocation10 + $0x66c] ss:$16 sps:$4 sm:$0xff]   ;;  %v5976_v38 = vld [vmem:[#allocation10 + $0x660] ss:$16 sps:$4 sm:$0xff]  }
 0x2cd   :  { %2771 = vmatprep.subr.bf16.mxu1 %v5933_v40  ;;  %v5979_v40 = vld [vmem:[#allocation10 + $0x668] ss:$16 sps:$4 sm:$0xff]  }
 0x2cf   :  { %2729 = vmatpush1.bf16.msra.mxu0 %v5928_v41  ;;  %v5984_v41 = vld [vmem:[#allocation10 + $0x684] ss:$16 sps:$4 sm:$0xff]  }
 0x2d0   :  { %2772 = vmatpush1.bf16.msra.mxu1 %v5931_v33  ;;  %2730 = vmatprep.subr.bf16.mxu0 %v5936_v42  ;;  %v5987_v33 = vld [vmem:[#allocation10 + $0x68c] ss:$16 sps:$4 sm:$0xff]   ;;  %v5982_v42 = vld [vmem:[#allocation10 + $0x680] ss:$16 sps:$4 sm:$0xff]  }
 0x2d1   :  { %2773 = vmatprep.subr.bf16.mxu1 %v5939_v43  ;;  %v5985_v43 = vld [vmem:[#allocation10 + $0x688] ss:$16 sps:$4 sm:$0xff]  }
 0x2d3   :  { %2731 = vmatpush1.bf16.msra.mxu0 %v5934_v14  ;;  %v5990_v14 = vld [vmem:[#allocation10 + $0x6a4] ss:$16 sps:$4 sm:$0xff]  }
 0x2d4   :  { %2774 = vmatpush1.bf16.msra.mxu1 %v5937_v44  ;;  %2732 = vmatprep.subr.bf16.mxu0 %v5942_v46  ;;  %v5993_v44 = vld [vmem:[#allocation10 + $0x6ac] ss:$16 sps:$4 sm:$0xff]   ;;  %v5988_v46 = vld [vmem:[#allocation10 + $0x6a0] ss:$16 sps:$4 sm:$0xff]  }
 0x2d5   :  { %2775 = vmatprep.subr.bf16.mxu1 %v5945_v47  ;;  %v5991_v47 = vld [vmem:[#allocation10 + $0x6a8] ss:$16 sps:$4 sm:$0xff]  }
 0x2d7   :  { %2733 = vmatpush1.bf16.msra.mxu0 %v5940_v48  ;;  %v5996_v48 = vld [vmem:[#allocation10 + $0x6c4] ss:$16 sps:$4 sm:$0xff]  }
 0x2d8   :  { %2776 = vmatpush1.bf16.msra.mxu1 %v5943_v49  ;;  %2734 = vmatprep.subr.bf16.mxu0 %v5948_v50  ;;  %v5999_v49 = vld [vmem:[#allocation10 + $0x6cc] ss:$16 sps:$4 sm:$0xff]   ;;  %v5994_v50 = vld [vmem:[#allocation10 + $0x6c0] ss:$16 sps:$4 sm:$0xff]  }
 0x2d9   :  { %2777 = vmatprep.subr.bf16.mxu1 %v5951_v55  ;;  %v5997_v55 = vld [vmem:[#allocation10 + $0x6c8] ss:$16 sps:$4 sm:$0xff]  }
 0x2db   :  { %2735 = vmatpush1.bf16.msra.mxu0 %v5946_v51  ;;  %v6005_v51 = vld [vmem:[#allocation10 + $0x6ec] ss:$16 sps:$4 sm:$0xff]  }
 0x2dc   :  { %2778 = vmatpush1.bf16.msra.mxu1 %v5949_v57  ;;  %2736 = vmatprep.subr.bf16.mxu0 %v5954_v60  ;;  %v6008_v57 = vld [vmem:[#allocation10 + $0x704] ss:$16 sps:$4 sm:$0xff]   ;;  %v6011_v60 = vld [vmem:[#allocation10 + $0x70c] ss:$16 sps:$4 sm:$0xff]  }
 0x2dd   :  { %2779 = vmatprep.subr.bf16.mxu1 %v5957_v62  ;;  %v6009_v62 = vld [vmem:[#allocation10 + $0x708] ss:$16 sps:$4 sm:$0xff]  }
 0x2df   :  { %2737 = vmatpush1.bf16.msra.mxu0 %v5952_v10  ;;  %v6020_v10 = vld [vmem:[#allocation10 + $0x744] ss:$16 sps:$4 sm:$0xff]  }
 0x2e0   :  { %2780 = vmatpush1.bf16.msra.mxu1 %v5955_v15  ;;  %3220 = vmatprep.subr.bf16.mxu0 %v5960_v53  ;;  %v6026_v15 = vld [vmem:[#allocation10 + $0x764] ss:$16 sps:$4 sm:$0xff]   ;;  %v6029_v53 = vld [vmem:[#allocation10 + $0x76c] ss:$16 sps:$4 sm:$0xff]  }
 0x2e1   :  { %3263 = vmatprep.subr.bf16.mxu1 %v5963_v18  ;;  %v6035_v18 = vld [vmem:[#allocation10 + $0x78c] ss:$16 sps:$4 sm:$0xff]  }
 0x2e2   :  { %2739 = vmatmul.mubr.bf16.vlgmr.msra.gmra.mrb[8].mxu0 %v2319_v24 }
 0x2e3   :  { %2782 = vmatmul.mubr.bf16.vlgmr.msra.gmra.mrb[16].mxu1 %v2319_v24  ;;  %3221 = vmatpush1.bf16.msra.mxu0 %v5958_v59  ;;  %v6041_v59 = vld [vmem:[#allocation10 + $0x7ac] ss:$16 sps:$4 sm:$0xff]   ;;  %v6044_v24 = vld [vmem:[#allocation10 + $0x7c4] ss:$16 sps:$4 sm:$0xff]  }
 0x2e4   :  { %3252 = vmatprep.mubr.bf16.mxu0 %v2834_v36  ;;  %3264 = vmatpush1.bf16.msra.mxu1 %v5961_v3  ;;  %v6047_v3 = vld [vmem:[#allocation10 + $0x7cc] ss:$16 sps:$4 sm:$0xff]  }
 0x2e5   :  { %3295 = vmatprep.mubr.bf16.mxu1 %v2834_v36  ;;  %3222 = vmatprep.subr.bf16.mxu0 %v5966_v25  ;;  %v6042_v25 = vld [vmem:[#allocation10 + $0x7c0] ss:$16 sps:$4 sm:$0xff]   ;;  %v2800_v36 = vld [vmem:[#allocation3] sm:$0xf8] }
 0x2e6   :  { %3265 = vmatprep.subr.bf16.mxu1 %v5969_v0  ;;  %v2806_v0 = vld [vmem:[#allocation3 + $0x30] sm:$0x7] }
 0x2e7   :  { %3223 = vmatpush1.bf16.msra.mxu0 %v5964_v27  ;;  %v6045_v27 = vld [vmem:[#allocation10 + $0x7c8] ss:$16 sps:$4 sm:$0xff]  }
 0x2e8   :  { %3266 = vmatpush1.bf16.msra.mxu1 %v5967_v28  ;;  %3224 = vmatprep.subr.bf16.mxu0 %v5972_v29  ;;  %v6050_v28 = vld [vmem:[#allocation10 + $0x7e4] ss:$16 sps:$4 sm:$0xff]  }
 0x2e9   :  { %3267 = vmatprep.subr.bf16.mxu1 %v5975_v63  ;;  %v3319_v29 = vld [vmem:[#allocation3 + $0x28] sm:$0xf0]  ;;  %v6053_v63 = vld [vmem:[#allocation10 + $0x7ec] ss:$16 sps:$4 sm:$0xff]  }
 0x2eb   :  { %3225 = vmatpush1.bf16.msra.mxu0 %v5970_v30  ;;  %v2823_v30 = vrot.slane %v2804_v9, 3  ;;  %v6098_v9 = vld [vmem:[#allocation10 + $0x8e4] ss:$16 sps:$4 sm:$0xff]  }
 0x2ec   :  { %3268 = vmatpush1.bf16.msra.mxu1 %v5973_v31  ;;  %3226 = vmatprep.subr.bf16.mxu0 %v5978_v32  ;;  %v2802_v31 = vld [vmem:[#allocation3 + $0x10] sm:$0x7]  ;;  %v3315_v32 = vld [vmem:[#allocation3 + $0x8] sm:$0xf0] }
 0x2ed   :  { %3269 = vmatprep.subr.bf16.mxu1 %v5981_v35  ;;  %v3321_v35 = vld [vmem:[#allocation3 + $0x38] sm:$0xf] }
 0x2ef   :  { %3227 = vmatpush1.bf16.msra.mxu0 %v5976_v38  ;;  %v6048_v38 = vld [vmem:[#allocation10 + $0x7e0] ss:$16 sps:$4 sm:$0xff]  }
 0x2f0   :  { %3270 = vmatpush1.bf16.msra.mxu1 %v5979_v40  ;;  %3228 = vmatprep.subr.bf16.mxu0 %v5984_v41  ;;  %v2817_v40 = vrot.slane %v2800_v36, 3  ;;  %v2824_v41 = vrot.slane %v2806_v0, 3  ;;  %v6096_v36 = vld [vmem:[#allocation10 + $0x8e0] ss:$16 sps:$4 sm:$0xff]   ;;  %v6099_v0 = vld [vmem:[#allocation10 + $0x8e8] ss:$16 sps:$4 sm:$0xff]  }
 0x2f1   :  { %3271 = vmatprep.subr.bf16.mxu1 %v5987_v33  ;;  %v3340_v33 = vrot.slane %v3319_v29, 4  ;;  %v6102_v29 = vld [vmem:[#allocation10 + $0x900] ss:$16 sps:$4 sm:$0xff]  }
 0x2f3   :  { %3229 = vmatpush1.bf16.msra.mxu0 %v5982_v42  ;;  %v6051_v42 = vld [vmem:[#allocation10 + $0x7e8] ss:$16 sps:$4 sm:$0xff]  }
 0x2f4   :  { %3272 = vmatpush1.bf16.msra.mxu1 %v5985_v43  ;;  %3230 = vmatprep.subr.bf16.mxu0 %v5990_v14  ;;  %v6056_v43 = vld [vmem:[#allocation10 + $0x804] ss:$16 sps:$4 sm:$0xff]   ;;  %v3317_v14 = vld [vmem:[#allocation3 + $0x18] sm:$0xf] }
 0x2f5   :  { %3273 = vmatprep.subr.bf16.mxu1 %v5993_v44  ;;  %v2818_v44 = vrot.slane %v2802_v31, 3  ;;  %v6113_v31 = vld [vmem:[#allocation10 + $0x92c] ss:$16 sps:$4 sm:$0xff]  }
 0x2f7   :  { %3231 = vmatpush1.bf16.msra.mxu0 %v5988_v46  ;;  %v2825_v46 = vsel %vm2816_vm12, %v2823_v30, %v2824_v41  ;;  %v6110_v30 = vld [vmem:[#allocation10 + $0x924] ss:$16 sps:$4 sm:$0xff]   ;;  %v6114_v41 = vld [vmem:[#allocation10 + $0x940] ss:$16 sps:$4 sm:$0xff]  }
 0x2f8   :  { %3274 = vmatpush1.bf16.msra.mxu1 %v5991_v47  ;;  %3232 = vmatprep.subr.bf16.mxu0 %v5996_v48  ;;  %v6059_v47 = vld [vmem:[#allocation10 + $0x80c] ss:$16 sps:$4 sm:$0xff]   ;;  %v3334_v48 = vrot.slane %v3315_v32, 4  ;;  %v6108_v32 = vld [vmem:[#allocation10 + $0x920] ss:$16 sps:$4 sm:$0xff]  }
 0x2f9   :  { %3275 = vmatprep.subr.bf16.mxu1 %v5999_v49  ;;  %v3341_v49 = vrot.slane %v3321_v35, 4  ;;  %v6111_v35 = vld [vmem:[#allocation10 + $0x928] ss:$16 sps:$4 sm:$0xff]  }
 0x2fb   :  { %3233 = vmatpush1.bf16.msra.mxu0 %v5994_v50  ;;  %v2819_v50 = vsel %vm2816_vm12, %v2817_v40, %v2818_v44  ;;  %v6119_v40 = vld [vmem:[#allocation10 + $0x94c] ss:$16 sps:$4 sm:$0xff]   ;;  %v6123_v44 = vld [vmem:[#allocation10 + $0x968] ss:$16 sps:$4 sm:$0xff]  }
 0x2fc   :  { %3276 = vmatpush1.bf16.msra.mxu1 %v5997_v55  ;;  %3234 = vmatprep.subr.bf16.mxu0 %v6002_v56  ;;  %v6054_v55 = vld [vmem:[#allocation10 + $0x800] ss:$16 sps:$4 sm:$0xff]   ;;  %v3335_v56 = vrot.slane %v3317_v14, 4 }
 0x2fd   :  { %3277 = vmatprep.subr.bf16.mxu1 %v6005_v51  ;;  %v3342_v51 = vsel %vm3330_vm13, %v3340_v33, %v3341_v49  ;;  %v6117_v33 = vld [vmem:[#allocation10 + $0x948] ss:$16 sps:$4 sm:$0xff]   ;;  %v6120_v14 = vld [vmem:[#allocation10 + $0x960] ss:$16 sps:$4 sm:$0xff]  }
 0x2fe   :  { %v6129_v49 = vld [vmem:[#allocation10 + $0x988] ss:$16 sps:$4 sm:$0xff]  }
 0x2ff   :  { %3235 = vmatpush1.bf16.msra.mxu0 %v6000_v45  ;;  %v2833_v45 = vpack.c.bf16 %v2825_v46, %v2819_v50  ;;  %v6128_v46 = vld [vmem:[#allocation10 + $0x984] ss:$16 sps:$4 sm:$0xff]  }
 0x300   :  { %3278 = vmatpush1.bf16.msra.mxu1 %v6003_v52  ;;  %3236 = vmatprep.subr.bf16.mxu0 %v6008_v57  ;;  %v6057_v52 = vld [vmem:[#allocation10 + $0x808] ss:$16 sps:$4 sm:$0xff]   ;;  %v3336_v57 = vsel %vm3330_vm13, %v3334_v48, %v3335_v56  ;;  %v6126_v48 = vld [vmem:[#allocation10 + $0x980] ss:$16 sps:$4 sm:$0xff]   ;;  %v6134_v50 = vld [vmem:[#allocation10 + $0x9a4] ss:$16 sps:$4 sm:$0xff]  }
 0x301   :  { %3279 = vmatprep.subr.bf16.mxu1 %v6011_v60  ;;  %v6062_v60 = vld [vmem:[#allocation10 + $0x824] ss:$16 sps:$4 sm:$0xff]   ;;  %v6132_v56 = vld [vmem:[#allocation10 + $0x9a0] ss:$16 sps:$4 sm:$0xff]  }
 0x303   :  { %3237 = vmatpush1.bf16.msra.mxu0 %v6006_v61  ;;  %v3348_v61 = vpack.c.bf16 %v3342_v51, %v3336_v57  ;;  %v6135_v51 = vld [vmem:[#allocation10 + $0x9a8] ss:$16 sps:$4 sm:$0xff]   ;;  %v3318_v57 = vld [vmem:[#allocation3 + $0x20] sm:$0xf0] }
 0x304   :  { %3280 = vmatpush1.bf16.msra.mxu1 %v6009_v62  ;;  %3238 = vmatprep.subr.bf16.mxu0 %v6014_v2  ;;  %v6065_v62 = vld [vmem:[#allocation10 + $0x82c] ss:$16 sps:$4 sm:$0xff]   ;;  %v6060_v2 = vld [vmem:[#allocation10 + $0x820] ss:$16 sps:$4 sm:$0xff]  }
 0x305   :  { %3281 = vmatprep.subr.bf16.mxu1 %v6017_v4  ;;  %v6063_v4 = vld [vmem:[#allocation10 + $0x828] ss:$16 sps:$4 sm:$0xff]  }
 0x307   :  { %3239 = vmatpush1.bf16.msra.mxu0 %v6012_v5  ;;  %v6068_v5 = vld [vmem:[#allocation10 + $0x844] ss:$16 sps:$4 sm:$0xff]  }
 0x308   :  { %3282 = vmatpush1.bf16.msra.mxu1 %v6015_v6  ;;  %3240 = vmatprep.subr.bf16.mxu0 %v6020_v10  ;;  %v6071_v6 = vld [vmem:[#allocation10 + $0x84c] ss:$16 sps:$4 sm:$0xff]   ;;  %v6066_v10 = vld [vmem:[#allocation10 + $0x840] ss:$16 sps:$4 sm:$0xff]  }
 0x309   :  { %3283 = vmatprep.subr.bf16.mxu1 %v6023_v11  ;;  %v6069_v11 = vld [vmem:[#allocation10 + $0x848] ss:$16 sps:$4 sm:$0xff]  }
 0x30b   :  { %3241 = vmatpush1.bf16.msra.mxu0 %v6018_v12  ;;  %v6074_v12 = vld [vmem:[#allocation10 + $0x864] ss:$16 sps:$4 sm:$0xff]  }
 0x30c   :  { %3284 = vmatpush1.bf16.msra.mxu1 %v6021_v13  ;;  %3242 = vmatprep.subr.bf16.mxu0 %v6026_v15  ;;  %v6077_v13 = vld [vmem:[#allocation10 + $0x86c] ss:$16 sps:$4 sm:$0xff]   ;;  %v6072_v15 = vld [vmem:[#allocation10 + $0x860] ss:$16 sps:$4 sm:$0xff]  }
 0x30d   :  { %3285 = vmatprep.subr.bf16.mxu1 %v6029_v53  ;;  %v6075_v53 = vld [vmem:[#allocation10 + $0x868] ss:$16 sps:$4 sm:$0xff]  }
 0x30f   :  { %3243 = vmatpush1.bf16.msra.mxu0 %v6024_v54  ;;  %v6080_v54 = vld [vmem:[#allocation10 + $0x884] ss:$16 sps:$4 sm:$0xff]  }
 0x310   :  { %3286 = vmatpush1.bf16.msra.mxu1 %v6027_v16  ;;  %3244 = vmatprep.subr.bf16.mxu0 %v6032_v17  ;;  %v6083_v16 = vld [vmem:[#allocation10 + $0x88c] ss:$16 sps:$4 sm:$0xff]   ;;  %v6078_v17 = vld [vmem:[#allocation10 + $0x880] ss:$16 sps:$4 sm:$0xff]  }
 0x311   :  { %3287 = vmatprep.subr.bf16.mxu1 %v6035_v18  ;;  %v6081_v18 = vld [vmem:[#allocation10 + $0x888] ss:$16 sps:$4 sm:$0xff]  }
 0x313   :  { %3245 = vmatpush1.bf16.msra.mxu0 %v6030_v19  ;;  %v6086_v19 = vld [vmem:[#allocation10 + $0x8a4] ss:$16 sps:$4 sm:$0xff]  }
 0x314   :  { %3288 = vmatpush1.bf16.msra.mxu1 %v6033_v21  ;;  %3246 = vmatprep.subr.bf16.mxu0 %v6038_v22  ;;  %v6089_v21 = vld [vmem:[#allocation10 + $0x8ac] ss:$16 sps:$4 sm:$0xff]   ;;  %v6084_v22 = vld [vmem:[#allocation10 + $0x8a0] ss:$16 sps:$4 sm:$0xff]  }
 0x315   :  { %3289 = vmatprep.subr.bf16.mxu1 %v6041_v59  ;;  %v6087_v59 = vld [vmem:[#allocation10 + $0x8a8] ss:$16 sps:$4 sm:$0xff]  }
 0x317   :  { %3247 = vmatpush1.bf16.msra.mxu0 %v6036_v23  ;;  %v6092_v23 = vld [vmem:[#allocation10 + $0x8c4] ss:$16 sps:$4 sm:$0xff]  }
 0x318   :  { %3290 = vmatpush1.bf16.msra.mxu1 %v6039_v58  ;;  %3248 = vmatprep.subr.bf16.mxu0 %v6044_v24  ;;  %v6095_v58 = vld [vmem:[#allocation10 + $0x8cc] ss:$16 sps:$4 sm:$0xff]   ;;  %v6090_v24 = vld [vmem:[#allocation10 + $0x8c0] ss:$16 sps:$4 sm:$0xff]  }
 0x319   :  { %3291 = vmatprep.subr.bf16.mxu1 %v6047_v3  ;;  %v6093_v3 = vld [vmem:[#allocation10 + $0x8c8] ss:$16 sps:$4 sm:$0xff]  }
 0x31b   :  { %3249 = vmatpush1.bf16.msra.mxu0 %v6042_v25  ;;  %v6101_v25 = vld [vmem:[#allocation10 + $0x8ec] ss:$16 sps:$4 sm:$0xff]  }
 0x31c   :  { %3292 = vmatpush1.bf16.msra.mxu1 %v6045_v27  ;;  %3250 = vmatprep.subr.bf16.mxu0 %v6050_v28  ;;  %v6104_v27 = vld [vmem:[#allocation10 + $0x904] ss:$16 sps:$4 sm:$0xff]   ;;  %v6107_v28 = vld [vmem:[#allocation10 + $0x90c] ss:$16 sps:$4 sm:$0xff]  }
 0x31d   :  { %3293 = vmatprep.subr.bf16.mxu1 %v6053_v63  ;;  %v6105_v63 = vld [vmem:[#allocation10 + $0x908] ss:$16 sps:$4 sm:$0xff]  }
 0x31f   :  { %3251 = vmatpush1.bf16.msra.mxu0 %v6048_v38  ;;  %v6116_v38 = vld [vmem:[#allocation10 + $0x944] ss:$16 sps:$4 sm:$0xff]  }
 0x320   :  { %3294 = vmatpush1.bf16.msra.mxu1 %v6051_v42  ;;  %3734 = vmatprep.subr.bf16.mxu0 %v6056_v43  ;;  %v6122_v42 = vld [vmem:[#allocation10 + $0x964] ss:$16 sps:$4 sm:$0xff]   ;;  %v6125_v43 = vld [vmem:[#allocation10 + $0x96c] ss:$16 sps:$4 sm:$0xff]  }
 0x321   :  { %3777 = vmatprep.subr.bf16.mxu1 %v6059_v47  ;;  %v6131_v47 = vld [vmem:[#allocation10 + $0x98c] ss:$16 sps:$4 sm:$0xff]  }
 0x322   :  { %3253 = vmatmul.mubr.bf16.vlgmr.msra.gmra.mrb[8].mxu0 %v2833_v45 }
 0x323   :  { %3296 = vmatmul.mubr.bf16.vlgmr.msra.gmra.mrb[16].mxu1 %v2833_v45  ;;  %3735 = vmatpush1.bf16.msra.mxu0 %v6054_v55  ;;  %v6137_v55 = vld [vmem:[#allocation10 + $0x9ac] ss:$16 sps:$4 sm:$0xff]   ;;  %v6140_v45 = vld [vmem:[#allocation10 + $0x9c4] ss:$16 sps:$4 sm:$0xff]  }
 0x324   :  { %3766 = vmatprep.mubr.bf16.mxu0 %v3348_v61  ;;  %3778 = vmatpush1.bf16.msra.mxu1 %v6057_v52  ;;  %v6143_v52 = vld [vmem:[#allocation10 + $0x9cc] ss:$16 sps:$4 sm:$0xff]  }
 0x325   :  { %3809 = vmatprep.mubr.bf16.mxu1 %v3348_v61  ;;  %3736 = vmatprep.subr.bf16.mxu0 %v6062_v60  ;;  %v6138_v60 = vld [vmem:[#allocation10 + $0x9c0] ss:$16 sps:$4 sm:$0xff]   ;;  %v3314_v61 = vld [vmem:[#allocation3] sm:$0xf0] }
 0x326   :  { %3779 = vmatprep.subr.bf16.mxu1 %v6065_v62  ;;  %v6141_v62 = vld [vmem:[#allocation10 + $0x9c8] ss:$16 sps:$4 sm:$0xff]  }
 0x327   :  { %3737 = vmatpush1.bf16.msra.mxu0 %v6060_v2  ;;  %v6146_v2 = vld [vmem:[#allocation10 + $0x9e4] ss:$16 sps:$4 sm:$0xff]  }
 0x328   :  { %3780 = vmatpush1.bf16.msra.mxu1 %v6063_v4  ;;  %3738 = vmatprep.subr.bf16.mxu0 %v6068_v5  ;;  %v3320_v4 = vld [vmem:[#allocation3 + $0x30] sm:$0xf]  ;;  %v6149_v5 = vld [vmem:[#allocation10 + $0x9ec] ss:$16 sps:$4 sm:$0xff]  }
 0x329   :  { %3781 = vmatprep.subr.bf16.mxu1 %v6071_v6  ;;  %v3337_v6 = vrot.slane %v3318_v57, 4 }
 0x32b   :  { %3739 = vmatpush1.bf16.msra.mxu0 %v6066_v10  ;;  %v3316_v10 = vld [vmem:[#allocation3 + $0x10] sm:$0xf] }
 0x32c   :  { %3782 = vmatpush1.bf16.msra.mxu1 %v6069_v11  ;;  %3740 = vmatprep.subr.bf16.mxu0 %v6074_v12  ;;  %v6144_v11 = vld [vmem:[#allocation10 + $0x9e0] ss:$16 sps:$4 sm:$0xff]   ;;  %v3331_v12 = vrot.slane %v3314_v61, 4 }
 0x32d   :  { %3783 = vmatprep.subr.bf16.mxu1 %v6077_v13  ;;  %v3338_v13 = vrot.slane %v3320_v4, 4 }
 0x32f   :  { %3741 = vmatpush1.bf16.msra.mxu0 %v6072_v15  ;;  %v6147_v15 = vld [vmem:[#allocation10 + $0x9e8] ss:$16 sps:$4 sm:$0xff]  }
 0x330   :  { %3784 = vmatpush1.bf16.msra.mxu1 %v6075_v53  ;;  %3742 = vmatprep.subr.bf16.mxu0 %v6080_v54  ;;  %v3332_v53 = vrot.slane %v3316_v10, 4  ;;  %v3339_v54 = vsel %vm3330_vm13, %v3337_v6, %v3338_v13 }
 0x331   :  { %3785 = vmatprep.subr.bf16.mxu1 %v6083_v16 }
 0x332   :  { %v3333_v16 = vsel %vm3330_vm13, %v3331_v12, %v3332_v53 }
 0x333   :  { %3743 = vmatpush1.bf16.msra.mxu0 %v6078_v17  ;;  %v3347_v17 = vpack.c.bf16 %v3339_v54, %v3333_v16 }
 0x334   :  { %3786 = vmatpush1.bf16.msra.mxu1 %v6081_v18  ;;  %3744 = vmatprep.subr.bf16.mxu0 %v6086_v19  ;;  %v6150_v18 = vld [vmem:[#allocation15 + $0x40] sm:$0xff]  }
 0x335   :  { %3787 = vmatprep.subr.bf16.mxu1 %v6089_v21  ;;  %v6151_v19 = vld [vmem:[#allocation15] sm:$0xff]  }
 0x336   :  { %v6152_v21 = vld [vmem:[#allocation15 + $0xc0] sm:$0xff]  }
 0x337   :  { %3745 = vmatpush1.bf16.msra.mxu0 %v6084_v22  ;;  %v6153_v22 = vld [vmem:[#allocation15 + $0x80] sm:$0xff]  }
 0x338   :  { %3788 = vmatpush1.bf16.msra.mxu1 %v6087_v59  ;;  %3746 = vmatprep.subr.bf16.mxu0 %v6092_v23  ;;  %v6154_v59 = vld [vmem:[#allocation15 + $0x48] sm:$0xff]  }
 0x339   :  { %3789 = vmatprep.subr.bf16.mxu1 %v6095_v58  ;;  %v6155_v23 = vld [vmem:[#allocation15 + $0x8] sm:$0xff]  }
 0x33a   :  { %v6156_v58 = vld [vmem:[#allocation15 + $0xc8] sm:$0xff]  }
 0x33b   :  { %3747 = vmatpush1.bf16.msra.mxu0 %v6090_v24  ;;  %v6158_v24 = vld [vmem:[#allocation15 + $0x50] sm:$0xff]  }
 0x33c   :  { %3790 = vmatpush1.bf16.msra.mxu1 %v6093_v3  ;;  %3748 = vmatprep.subr.bf16.mxu0 %v6098_v9  ;;  %v6157_v3 = vld [vmem:[#allocation15 + $0x88] sm:$0xff]   ;;  %v6160_v9 = vld [vmem:[#allocation15 + $0xd0] sm:$0xff]  }
 0x33d   :  { %3791 = vmatprep.subr.bf16.mxu1 %v6101_v25  ;;  %v6159_v25 = vld [vmem:[#allocation15 + $0x10] sm:$0xff]  }
 0x33f   :  { %3749 = vmatpush1.bf16.msra.mxu0 %v6096_v36  ;;  %v6162_v36 = vld [vmem:[#allocation15 + $0x58] sm:$0xff]  }
 0x340   :  { %3792 = vmatpush1.bf16.msra.mxu1 %v6099_v0  ;;  %3750 = vmatprep.subr.bf16.mxu0 %v6104_v27  ;;  %v6161_v0 = vld [vmem:[#allocation15 + $0x90] sm:$0xff]   ;;  %v6164_v27 = vld [vmem:[#allocation15 + $0xd8] sm:$0xff]  }
 0x341   :  { %3793 = vmatprep.subr.bf16.mxu1 %v6107_v28  ;;  %v6163_v28 = vld [vmem:[#allocation15 + $0x18] sm:$0xff]  }
 0x343   :  { %3751 = vmatpush1.bf16.msra.mxu0 %v6102_v29  ;;  %v6166_v29 = vld [vmem:[#allocation15 + $0x60] sm:$0xff]  }
 0x344   :  { %3794 = vmatpush1.bf16.msra.mxu1 %v6105_v63  ;;  %3752 = vmatprep.subr.bf16.mxu0 %v6110_v30  ;;  %v6165_v63 = vld [vmem:[#allocation15 + $0x98] sm:$0xff]   ;;  %v6168_v30 = vld [vmem:[#allocation15 + $0xe0] sm:$0xff]  }
 0x345   :  { %3795 = vmatprep.subr.bf16.mxu1 %v6113_v31  ;;  %v6167_v31 = vld [vmem:[#allocation15 + $0x20] sm:$0xff]  }
 0x347   :  { %3753 = vmatpush1.bf16.msra.mxu0 %v6108_v32  ;;  %v6170_v32 = vld [vmem:[#allocation15 + $0x68] sm:$0xff]  }
 0x348   :  { %3796 = vmatpush1.bf16.msra.mxu1 %v6111_v35  ;;  %3754 = vmatprep.subr.bf16.mxu0 %v6116_v38  ;;  %v6169_v35 = vld [vmem:[#allocation15 + $0xa0] sm:$0xff]   ;;  %v6172_v38 = vld [vmem:[#allocation15 + $0xe8] sm:$0xff]  }
 0x349   :  { %3797 = vmatprep.subr.bf16.mxu1 %v6119_v40  ;;  %v6171_v40 = vld [vmem:[#allocation15 + $0x28] sm:$0xff]  }
 0x34b   :  { %3755 = vmatpush1.bf16.msra.mxu0 %v6114_v41  ;;  %v6174_v41 = vld [vmem:[#allocation15 + $0x70] sm:$0xff]  }
 0x34c   :  { %3798 = vmatpush1.bf16.msra.mxu1 %v6117_v33  ;;  %3756 = vmatprep.subr.bf16.mxu0 %v6122_v42  ;;  %v6173_v33 = vld [vmem:[#allocation15 + $0xa8] sm:$0xff]   ;;  %v6176_v42 = vld [vmem:[#allocation15 + $0xf0] sm:$0xff]  }
 0x34d   :  { %3799 = vmatprep.subr.bf16.mxu1 %v6125_v43  ;;  %v6175_v43 = vld [vmem:[#allocation15 + $0x30] sm:$0xff]  }
 0x34f   :  { %3757 = vmatpush1.bf16.msra.mxu0 %v6120_v14  ;;  %v6178_v14 = vld [vmem:[#allocation15 + $0x78] sm:$0xff]  }
 0x350   :  { %3800 = vmatpush1.bf16.msra.mxu1 %v6123_v44  ;;  %3758 = vmatprep.subr.bf16.mxu0 %v6128_v46  ;;  %v6177_v44 = vld [vmem:[#allocation15 + $0xb0] sm:$0xff]   ;;  %v6180_v46 = vld [vmem:[#allocation15 + $0xf8] sm:$0xff]  }
 0x351   :  { %3801 = vmatprep.subr.bf16.mxu1 %v6131_v47  ;;  %v6179_v47 = vld [vmem:[#allocation15 + $0x38] sm:$0xff]  }
 0x353   :  { %3759 = vmatpush1.bf16.msra.mxu0 %v6126_v48  ;;  %v6182_v48 = vld [vmem:[#allocation15 + $0x140] sm:$0xff]  }
 0x354   :  { %3802 = vmatpush1.bf16.msra.mxu1 %v6129_v49  ;;  %3760 = vmatprep.subr.bf16.mxu0 %v6134_v50  ;;  %v6181_v49 = vld [vmem:[#allocation15 + $0xb8] sm:$0xff]   ;;  %v6184_v50 = vld [vmem:[#allocation15 + $0x1c0] sm:$0xff]  }
 0x355   :  { %3803 = vmatprep.subr.bf16.mxu1 %v6137_v55  ;;  %v3828_v55 = vld [vmem:[#allocation12] sm:$0xf] }
 0x357   :  { %3761 = vmatpush1.bf16.msra.mxu0 %v6132_v56  ;;  %v3858_v56 = vld [vmem:[#allocation13] sm:$0xf] }
 0x358   :  { %3804 = vmatpush1.bf16.msra.mxu1 %v6135_v51  ;;  %3762 = vmatprep.subr.bf16.mxu0 %v6140_v45  ;;  %v3833_v51 = vrot.slane %v3828_v55, %v6886_v34  ;;  %v3841_v45 = vrot.slane %v3828_v55, %v6894_v37  ;;  %v3863_v57 = vrot.slane %v3858_v56, %v6886_v34 }
 0x359   :  { %3805 = vmatprep.subr.bf16.mxu1 %v6143_v52  ;;  %v3837_v52 = vrot.slane %v3828_v55, %v6890_v8  ;;  %v3875_v10 = vrot.slane %v3858_v56, %v6898_v39 }
 0x35b   :  { %3763 = vmatpush1.bf16.msra.mxu0 %v6138_v60  ;;  %v3845_v60 = vrot.slane %v3828_v55, %v6898_v39 }
 0x35c   :  { %3806 = vmatpush1.bf16.msra.mxu1 %v6141_v62  ;;  %3764 = vmatprep.subr.bf16.mxu0 %v6146_v2  ;;  %v3871_v62 = vrot.slane %v3858_v56, %v6894_v37  ;;  %v3867_v2 = vrot.slane %v3858_v56, %v6890_v8 }
 0x35d   :  { %3807 = vmatprep.subr.bf16.mxu1 %v6149_v5 }
 0x35f   :  { %3765 = vmatpush1.bf16.msra.mxu0 %v6144_v11 }
 0x360   :  { %3808 = vmatpush1.bf16.msra.mxu1 %v6147_v15  ;;  %5363 = vmatprep.subr.bf16.mxu0 %v6150_v18 }
 0x361   :  { %5385 = vmatprep.subr.bf16.mxu1 %v6152_v21 }
 0x362   :  { %3767 = vmatmul.mubr.bf16.vlgmr.msra.gmra.mrb[8].mxu0 %v3347_v17 }
 0x363   :  { %3810 = vmatmul.mubr.bf16.vlgmr.msra.gmra.mrb[16].mxu1 %v3347_v17  ;;  %5364 = vmatpush3.bf16.msra.mxu0 %v6151_v19 }
 0x364   :  { %5386 = vmatpush3.bf16.msra.mxu1 %v6153_v22  ;;  %5365 = vmatprep.subr.bf16.mxu0 %v6154_v59 }
 0x365   :  { %5387 = vmatprep.subr.bf16.mxu1 %v6156_v58 }
 0x367   :  { %5366 = vmatpush3.bf16.msra.mxu0 %v6155_v23 }
 0x368   :  { %5367 = vmatprep.subr.bf16.mxu0 %v6158_v24  ;;  %5388 = vmatpush3.bf16.msra.mxu1 %v6157_v3 }
 0x369   :  { %5389 = vmatprep.subr.bf16.mxu1 %v6160_v9 }
 0x36b   :  { %5368 = vmatpush3.bf16.msra.mxu0 %v6159_v25 }
 0x36c   :  { %5369 = vmatprep.subr.bf16.mxu0 %v6162_v36  ;;  %5390 = vmatpush3.bf16.msra.mxu1 %v6161_v0 }
 0x36d   :  { %5391 = vmatprep.subr.bf16.mxu1 %v6164_v27 }
 0x36f   :  { %5370 = vmatpush3.bf16.msra.mxu0 %v6163_v28 }
 0x370   :  { %5371 = vmatprep.subr.bf16.mxu0 %v6166_v29  ;;  %5392 = vmatpush3.bf16.msra.mxu1 %v6165_v63 }
 0x371   :  { %5393 = vmatprep.subr.bf16.mxu1 %v6168_v30 }
 0x373   :  { %5372 = vmatpush3.bf16.msra.mxu0 %v6167_v31 }
 0x374   :  { %5373 = vmatprep.subr.bf16.mxu0 %v6170_v32  ;;  %5394 = vmatpush3.bf16.msra.mxu1 %v6169_v35 }
 0x375   :  { %5395 = vmatprep.subr.bf16.mxu1 %v6172_v38 }
 0x377   :  { %5374 = vmatpush3.bf16.msra.mxu0 %v6171_v40  ;;  %v6519_v40 = vmov 1935823168  }
 0x378   :  { %5375 = vmatprep.subr.bf16.mxu0 %v6174_v41  ;;  %5396 = vmatpush3.bf16.msra.mxu1 %v6173_v33  ;;  %v3979_v41 = vunpack.c.l.s4 %v6519_v40  ;;  %v6203_v40 = vld [vmem:[#allocation15 + $0x128] sm:$0xff]  }
 0x379   :  { %5397 = vmatprep.subr.bf16.mxu1 %v6176_v42 }
 0x37b   :  { %5376 = vmatpush3.bf16.msra.mxu0 %v6175_v43 }
 0x37c   :  { %5377 = vmatprep.subr.bf16.mxu0 %v6178_v14  ;;  %5398 = vmatpush3.bf16.msra.mxu1 %v6177_v44 }
 0x37d   :  { %5399 = vmatprep.subr.bf16.mxu1 %v6180_v46 }
 0x37f   :  { %5378 = vmatpush3.bf16.msra.mxu0 %v6179_v47 }
 0x380   :  { %5407 = vmatprep.subr.bf16.mxu0 %v6182_v48  ;;  %5400 = vmatpush3.bf16.msra.mxu1 %v6181_v49  ;;  %v3980_v49 = vunpack.c.0.s8 %v3979_v41  ;;  %v6206_v41 = vld [vmem:[#allocation15 + $0x170] sm:$0xff]  }
 0x381   :  { %5429 = vmatprep.subr.bf16.mxu1 %v6184_v50 }
 0x435   :  { %v3768_v61 = vpop.f32.mrb[8].mxu0 }
 0x436   :  { %v3850_v4 = vmul.f32 %v3833_v51, %v3768_v61  ;;  %v3811_v5 = vpop.f32.mrb[16].mxu1  ;;  %v3770_v6 = vpop.f32.mrb[9].mxu0 }
 0x437   :  { %v3852_v11 = vmul.f32 %v3841_v45, %v3811_v5  ;;  %v3851_v12 = vmul.f32 %v3837_v52, %v3770_v6  ;;  %v3813_v13 = vpop.f32.mrb[17].mxu1  ;;  %v3772_v15 = vpop.f32.mrb[10].mxu0 }
 0x438   :  { %v3880_v53 = vadd.f32 %v3863_v57, %v3850_v4  ;;  %v3853_v54 = vmul.f32 %v3845_v60, %v3813_v13  ;;  %v3854_v16 = vmul.f32 %v3833_v51, %v3772_v15  ;;  %v3815_v34 = vpop.f32.mrb[18].mxu1  ;;  %v3774_v17 = vpop.f32.mrb[11].mxu0 }
 0x439   :  { %v3882_v18 = vadd.f32 %v3871_v62, %v3852_v11  ;;  %v3881_v19 = vadd.f32 %v3867_v2, %v3851_v12  ;;  %v3856_v21 = vmul.f32 %v3841_v45, %v3815_v34  ;;  %v3855_v37 = vmul.f32 %v3837_v52, %v3774_v17  ;;  %v3817_v22 = vpop.f32.mrb[19].mxu1  ;;  %v6183_v34 = vld [vmem:[#allocation15 + $0x100] sm:$0xff]  }
 0x43a   :  { %v3888_v8 = vmax.f32 %v3880_v53, 0.0  ;;  %v3883_v59 = vadd.f32 %v3875_v10, %v3853_v54  ;;  %v3884_v23 = vadd.f32 %v3863_v57, %v3854_v16  ;;  %v3857_v58 = vmul.f32 %v3845_v60, %v3817_v22  ;;  %v6186_v22 = vld [vmem:[#allocation15 + $0x148] sm:$0xff]  }
 0x43b   :  { %v3890_v24 = vmax.f32 %v3882_v18, 0.0  ;;  %v3889_v39 = vmax.f32 %v3881_v19, 0.0  ;;  %v3886_v3 = vadd.f32 %v3871_v62, %v3856_v21  ;;  %v3885_v9 = vadd.f32 %v3867_v2, %v3855_v37  ;;  %v6185_v37 = vld [vmem:[#allocation15 + $0x180] sm:$0xff]  }
 0x43c   :  { %v3891_v25 = vmax.f32 %v3883_v59, 0.0  ;;  %v3892_v36 = vmax.f32 %v3884_v23, 0.0  ;;  %v3887_v0 = vadd.f32 %v3875_v10, %v3857_v58  ;;  %v3983_v62 = vsub.s32 %v3980_v49, %v6880_v26  ;;  %v6188_v23 = vld [vmem:[#allocation15 + $0x1c8] sm:$0xff]   ;;  %v6213_v49 = vld [vmem:[#allocation15 + $0x1b8] sm:$0xff]  }
 0x43d   :  { %v3896_v27 = vmax.f32 %v3888_v8, %v3890_v24  ;;  %v3894_v28 = vmax.f32 %v3886_v3, 0.0  ;;  %v3893_v29 = vmax.f32 %v3885_v9, 0.0  ;;  %v6187_v58 = vld [vmem:[#allocation15 + $0x108] sm:$0xff]   ;;  %v6192_v9 = vld [vmem:[#allocation15 + $0x1d0] sm:$0xff]  }
 0x43e   :  { %v3897_v63 = vmax.f32 %v3889_v39, %v3891_v25  ;;  %v3895_v30 = vmax.f32 %v3887_v0, 0.0  ;;  %v6190_v39 = vld [vmem:[#allocation15 + $0x150] sm:$0xff]   ;;  %v6189_v3 = vld [vmem:[#allocation15 + $0x188] sm:$0xff]  }
 0x43f   :  { %v3898_v31 = vmax.f32 %v3892_v36, %v3894_v28  ;;  %v6191_v25 = vld [vmem:[#allocation15 + $0x110] sm:$0xff]   ;;  %v6194_v36 = vld [vmem:[#allocation15 + $0x158] sm:$0xff]  }
 0x440   :  { %v3904_v32 = vcombine.low %v3896_v27, %v3897_v63  ;;  %v3905_v35 = vcombine.high %v3896_v27, %v3897_v63  ;;  %v3899_v38 = vmax.f32 %v3893_v29, %v3895_v30  ;;  %v6193_v0 = vld [vmem:[#allocation15 + $0x190] sm:$0xff]   ;;  %v6196_v27 = vld [vmem:[#allocation15 + $0x1d8] sm:$0xff]   ;;  %v6198_v29 = vld [vmem:[#allocation15 + $0x160] sm:$0xff]  }
 0x441   :  { %v6195_v28 = vld [vmem:[#allocation15 + $0x118] sm:$0xff]   ;;  %v6200_v30 = vld [vmem:[#allocation15 + $0x1e0] sm:$0xff]  }
 0x442   :  { %v3918_v33 = vrot.slane %v3904_v32, %v6911_v7  ;;  %v3925_v42 = vrot.slane %v3905_v35, %v6911_v7  ;;  %v3906_v43 = vcombine.low %v3898_v31, %v3899_v38  ;;  %v3907_v14 = vcombine.high %v3898_v31, %v3899_v38  ;;  %v6197_v63 = vld [vmem:[#allocation15 + $0x198] sm:$0xff]   ;;  %v6199_v31 = vld [vmem:[#allocation15 + $0x120] sm:$0xff]   ;;  %v6202_v32 = vld [vmem:[#allocation15 + $0x168] sm:$0xff]  }
 0x443   :  { %v6201_v35 = vld [vmem:[#allocation15 + $0x1a0] sm:$0xff]   ;;  %v6204_v38 = vld [vmem:[#allocation15 + $0x1e8] sm:$0xff]  }
 0x444   :  { %v3944_v44 = vrot.slane %v3918_v33, 4  ;;  %v3945_v46 = vrot.slane %v3925_v42, 4  ;;  %v3932_v47 = vrot.slane %v3906_v43, %v6911_v7  ;;  %v3939_v48 = vrot.slane %v3907_v14, %v6911_v7  ;;  %v6207_v43 = vld [vmem:[#allocation15 + $0x130] sm:$0xff]   ;;  %v6210_v14 = vld [vmem:[#allocation15 + $0x178] sm:$0xff]  }
 0x446   :  { %v3952_v50 = vmax.f32 %v3918_v33, %v3944_v44  ;;  %v3953_v55 = vmax.f32 %v3925_v42, %v3945_v46  ;;  %v3946_v56 = vrot.slane %v3932_v47, 4  ;;  %v3947_v51 = vrot.slane %v3939_v48, 4  ;;  %v6205_v33 = vld [vmem:[#allocation15 + $0x1a8] sm:$0xff]   ;;  %v6208_v42 = vld [vmem:[#allocation15 + $0x1f0] sm:$0xff]   ;;  %v6212_v46 = vld [vmem:[#allocation15 + $0x1f8] sm:$0xff]  }
 0x447   :  { %v6209_v44 = vld [vmem:[#allocation15 + $0x1b0] sm:$0xff]  }
 0x448   :  { %v3960_v45 = vcombine.low %v3952_v50, %v3953_v55  ;;  %v3954_v52 = vmax.f32 %v3932_v47, %v3946_v56  ;;  %v3955_v57 = vmax.f32 %v3939_v48, %v3947_v51  ;;  %v6211_v48 = vld [vmem:[#allocation15 + $0x138] sm:$0xff]   ;;  %v6214_v51 = vld [vmem:[#allocation19] sm:$0xff]  }
 0x44a   :  { %v3967_v60 = vrot.slane %v3960_v45, %v6926_v20  ;;  %v3968_v61 = vcombine.low %v3954_v52, %v3955_v57  ;;  %v6215_v45 = vld [vmem:[#allocation19 + $0x8] sm:$0xff]   ;;  %v6217_v52 = vld [vmem:[#allocation19 + $0x18] sm:$0xff]   ;;  %v6218_v57 = vld [vmem:[#allocation19 + $0x20] sm:$0xff]  }
 0x44c   :  { %v3975_v2 = vrot.slane %v3968_v61, %v6926_v20  ;;  %v3984_v4 = vrot.slane %v3967_v60, %v3983_v62  ;;  %v6219_v60 = vld [vmem:[#allocation19 + $0x28] sm:$0xff]   ;;  %v6220_v61 = vld [vmem:[#allocation19 + $0x30] sm:$0xff]  }
 0x44e   :  { %v3991_v5 = vrot.slane %v3975_v2, %v3983_v62  ;;  %v6221_v62 = vld [vmem:[#allocation19 + $0x38] sm:$0xff]  }
 0x450   :  { %v3994_v6 = vcombine.low %v3984_v4, %v3991_v5  ;;  %v3995_v10 = vcombine.high %v3984_v4, %v3991_v5 }
 0x452   :  { %v4002_v11 = vrot.slane %v3994_v6, %v6911_v7  ;;  %v6967_v12 = vrot.slane %v3995_v10, %v6911_v7 }
 0x454   :  { %v4010_v13 = vcombine.high %v4002_v11, %v4002_v11  ;;  %v4018_v15 = vrot.slane %v4002_v11, %v6911_v7  ;;  %v4011_v53 = vcombine.high %v6967_v12, %v6967_v12  ;;  %v4025_v47 = vrot.slane %v6967_v12, %v6911_v7 }
 0x456   :  { %v4032_v54 = vrot.slane %v4010_v13, %v6911_v7  ;;  %v4039_v26 = vrot.slane %v4011_v53, %v6911_v7  ;;  %v4040_v20 = vcombine.high %v4018_v15, %v4018_v15  ;;  %v4052_v18 = vpack.c.bf16 %v4018_v15, %v4018_v15  ;;  %v6216_v7 = vld [vmem:[#allocation19 + $0x10] sm:$0xff]  }
 0x457   :  { %v4041_v50 = vcombine.high %v4025_v47, %v4025_v47  ;;  %v4056_v55 = vpack.c.bf16 %v4025_v47, %v4025_v47 }
 0x458   :  { %v4053_v16 = vpack.c.bf16 %v4032_v54, %v4032_v54  ;;  %v4042_v17 = vcombine.high %v4032_v54, %v4032_v54  ;;  %v4043_v19 = vcombine.high %v4039_v26, %v4039_v26  ;;  %v4057_v8 = vpack.c.bf16 %v4039_v26, %v4039_v26 }
 0x459   :  { %v4054_v59 = vpack.c.bf16 %v4040_v20, %v4040_v20  ;;  %v4058_v56 = vpack.c.bf16 %v4041_v50, %v4041_v50 }
 0x45a   :  { %4604 = vmatprep.mubr.bf16.mxu0 %v4053_v16  ;;  %v4055_v21 = vpack.c.bf16 %v4042_v17, %v4042_v17  ;;  %v4059_v24 = vpack.c.bf16 %v4043_v19, %v4043_v19 }
 0x45b   :  { %4605 = vmatmul.mubr.bf16.vlgmr.msra.gmra.mrb[12].mxu0 %v4052_v18 }
 0x45c   :  { %5408 = vmatpush3.bf16.msra.mxu0 %v6183_v34  ;;  %4644 = vmatprep.mubr.bf16.mxu1 %v4055_v21 }
 0x45d   :  { %4684 = vmatprep.mubr.bf16.mxu0 %v4057_v8  ;;  %4645 = vmatmul.mubr.bf16.vlgmr.msra.gmra.mrb[20].mxu1 %v4054_v59 }
 0x45e   :  { %5430 = vmatpush3.bf16.msra.mxu1 %v6185_v37  ;;  %5409 = vmatprep.subr.bf16.mxu0 %v6186_v22  ;;  %v5352_v22 = vld [vmem:[#allocation16] ss:$0 sm:$0xff] }
 0x45f   :  { %4724 = vmatprep.mubr.bf16.mxu1 %v4059_v24  ;;  %5431 = vmatprep.subr.bf16.mxu1 %v6188_v23  ;;  %v5353_v23 = vld [vmem:[#allocation18] ss:$0 sm:$0xff] }
 0x460   :  { %5410 = vmatpush3.bf16.msra.mxu0 %v6187_v58 }
 0x461   :  { %5411 = vmatprep.subr.bf16.mxu0 %v6190_v39 }
 0x462   :  { %5432 = vmatpush3.bf16.msra.mxu1 %v6189_v3 }
 0x463   :  { %5433 = vmatprep.subr.bf16.mxu1 %v6192_v9  ;;  %v5354_v9 = vld [vmem:[#allocation21] ss:$0 sm:$0xff] }
 0x464   :  { %5412 = vmatpush3.bf16.msra.mxu0 %v6191_v25 }
 0x465   :  { %5413 = vmatprep.subr.bf16.mxu0 %v6194_v36 }
 0x466   :  { %5434 = vmatpush3.bf16.msra.mxu1 %v6193_v0 }
 0x467   :  { %5435 = vmatprep.subr.bf16.mxu1 %v6196_v27 }
 0x468   :  { %5414 = vmatpush3.bf16.msra.mxu0 %v6195_v28 }
 0x469   :  { %5415 = vmatprep.subr.bf16.mxu0 %v6198_v29 }
 0x46a   :  { %5436 = vmatpush3.bf16.msra.mxu1 %v6197_v63 }
 0x46b   :  { %5437 = vmatprep.subr.bf16.mxu1 %v6200_v30 }
 0x46c   :  { %5416 = vmatpush3.bf16.msra.mxu0 %v6199_v31 }
 0x46d   :  { %5417 = vmatprep.subr.bf16.mxu0 %v6202_v32 }
 0x46e   :  { %5438 = vmatpush3.bf16.msra.mxu1 %v6201_v35 }
 0x46f   :  { %5439 = vmatprep.subr.bf16.mxu1 %v6204_v38 }
 0x470   :  { %5418 = vmatpush3.bf16.msra.mxu0 %v6203_v40 }
 0x471   :  { %5419 = vmatprep.subr.bf16.mxu0 %v6206_v41 }
 0x472   :  { %5440 = vmatpush3.bf16.msra.mxu1 %v6205_v33 }
 0x473   :  { %5441 = vmatprep.subr.bf16.mxu1 %v6208_v42 }
 0x474   :  { %5420 = vmatpush3.bf16.msra.mxu0 %v6207_v43 }
 0x475   :  { %5421 = vmatprep.subr.bf16.mxu0 %v6210_v14 }
 0x476   :  { %5442 = vmatpush3.bf16.msra.mxu1 %v6209_v44 }
 0x477   :  { %5443 = vmatprep.subr.bf16.mxu1 %v6212_v46 }
 0x478   :  { %5422 = vmatpush3.bf16.msra.mxu0 %v6211_v48 }
 0x479   :  { %5460 = vmatprep.subr.bf16.mxu0 %v6516_v1 }
 0x47a   :  { %5444 = vmatpush3.bf16.msra.mxu1 %v6213_v49 }
 0x47b   :  { %4685 = vmatmul.mubr.bf16.vlgmr.msra.gmra.mrb[16].mxu0 %v4056_v55 }
 0x47c   :  { %5461 = vmatpush3.bf16.msra.mxu0 %v6214_v51  ;;  %5476 = vmatprep.mubr.msk.bf16.mxu0 %vm6520_vm14, %v6516_v1 }
 0x47d   :  { %4725 = vmatmul.mubr.bf16.vlgmr.msra.gmra.mrb[24].mxu1 %v4058_v56  ;;  %5462 = vmatprep.subr.bf16.mxu0 %v6516_v1 }
 0x480   :  { %5463 = vmatpush3.bf16.msra.mxu0 %v6215_v45 }
 0x481   :  { %5464 = vmatprep.subr.bf16.mxu0 %v6516_v1 }
 0x484   :  { %5465 = vmatpush3.bf16.msra.mxu0 %v6216_v7 }
 0x485   :  { %5466 = vmatprep.subr.bf16.mxu0 %v6516_v1 }
 0x488   :  { %5467 = vmatpush3.bf16.msra.mxu0 %v6217_v52 }
 0x489   :  { %5468 = vmatprep.subr.bf16.mxu0 %v6516_v1 }
 0x48c   :  { %5469 = vmatpush3.bf16.msra.mxu0 %v6218_v57 }
 0x48d   :  { %5470 = vmatprep.subr.bf16.mxu0 %v6516_v1 }
 0x490   :  { %5471 = vmatpush3.bf16.msra.mxu0 %v6219_v60 }
 0x491   :  { %5472 = vmatprep.subr.bf16.mxu0 %v6516_v1 }
 0x494   :  { %5473 = vmatpush3.bf16.msra.mxu0 %v6220_v61 }
 0x495   :  { %5474 = vmatprep.subr.bf16.mxu0 %v6516_v1 }
 0x498   :  { %5475 = vmatpush3.bf16.msra.mxu0 %v6221_v62 }
 0x52e   :  { %v5379_v2 = vpop.f32.mrb[12].mxu0 }
 0x52f   :  { %v5380_v4 = vpop.f32.mrb[13].mxu0 }
 0x530   :  { %v5381_v5 = vadd.f32 %v5380_v4, %v5379_v2  ;;  %v5382_v6 = vpop.f32.mrb[14].mxu0  ;;  %v5401_v10 = vpop.f32.mrb[20].mxu1 }
 0x531   :  { %v5383_v11 = vpop.f32.mrb[15].mxu0  ;;  %v5402_v12 = vpop.f32.mrb[21].mxu1 }
 0x532   :  { %v5403_v13 = vadd.f32 %v5402_v12, %v5401_v10  ;;  %v5404_v15 = vpop.f32.mrb[22].mxu1 }
 0x533   :  { %v5405_v53 = vpop.f32.mrb[23].mxu1 }
 0x534   :  { %v4647_v54 = vadd.f32 %v5403_v13, %v5381_v5 }
 0x54e   :  { %v5423_v26 = vpop.f32.mrb[16].mxu0 }
 0x54f   :  { %v5424_v20 = vpop.f32.mrb[17].mxu0 }
 0x550   :  { %v5425_v16 = vadd.f32 %v5424_v20, %v5423_v26  ;;  %v5426_v34 = vpop.f32.mrb[18].mxu0  ;;  %v5445_v17 = vpop.f32.mrb[24].mxu1 }
 0x551   :  { %v5427_v18 = vpop.f32.mrb[19].mxu0  ;;  %v5446_v19 = vpop.f32.mrb[25].mxu1 }
 0x552   :  { %v4687_v1 = vadd.f32 %v5425_v16, %v4647_v54  ;;  %v5447_v21 = vadd.f32 %v5446_v19, %v5445_v17  ;;  %v5448_v37 = vpop.f32.mrb[26].mxu1 }
 0x553   :  { %v5449_v8 = vpop.f32.mrb[27].mxu1 }
 0x554   :  { %v4727_v59 = vadd.f32 %v5447_v21, %v4687_v1 }
 0x556   :  { %v4739_v58 = vmul.f32 %v5352_v22, %v4727_v59 }
 0x558   :  { %v4747_v24 = vadd.f32 %v5353_v23, %v4739_v58 }
 0x55a   :  { %v4748_v39 = vmax.f32 %v4747_v24, 0.0 }
 0x55c   :  { %v4749_v3 = vpack.c.bf16 %v4748_v39, %v4748_v39 }
 0x55e   :  { %5477 = vmatmul.mubr.bf16.vlgmr.msra.gmra.mrb[20].mxu0 %v4749_v3 }
 0x631   :  { %v4855_v25 = vpop.f32.mrb[20].mxu0 }
 0x632   :  { %v4856_v36 = vadd.f32 %v5354_v9, %v4855_v25  ;;  %v5478_v0 = vpop.f32.mrb[21].mxu0 }
 0x633   :  { %v4858_v27 = vpop.f32.mrb[22].mxu0 }
 0x634   :  { %4861 = vst [vmem:[#allocation22] sm:$0x3] %v4856_v36  ;;  %v5479_v28 = vpop.f32.mrb[23].mxu0 }
 0x635   :  { %6475 = shalt.err (!%p6472_p8)
}
 0x636   :  { %s6476_s20 = scalar_lea.hbm %s7009_s12, 32 }
 0x637   :  { %p6477_p9 = scmp.ne.s32.totalorder %s7009_s12, %s6476_s20  ;;  %p6480_p10 = scmp.lt.u32.totalorder %s6476_s20, %s7009_s12 }
 0x639   :  { %p6482_p11 = pnand %p6480_p10, %p6477_p9 }
 0x63b   :  { %6485 = shalt.err (!%p6482_p11)
}
 0x63c   :  { %4871 = dma.vmem_to_hbm [thread:$0]  %s4869_s27, 32, %s7009_s12, [#allocation6]  }
 0x63d   :  { %6498 = dma.done.wait [#allocation6], 32  }
 0x63e   :  { %6499 = vsyncadd [#allocation6], 4294967264 }
 0x63f   :  { %4875 = vsyncpa [#allocation5], 1 }
 0x640   :  { %4876 = vsyncpa [#allocation8], 1 }
 0x641   :  { %4877 = vsyncpa [#allocation11], 1 }
 0x642   :  { %4878 = vsyncpa [#allocation14], 1 }
 0x643   :  { %4879 = vsyncpa [#allocation17], 1 }
 0x644   :  { %4880 = vsyncpa [#allocation20], 1 }
 0x645   :  { %4881 = vsyncpa [#allocation6], 1 }

</bundles_post_ra>
